<compile_context>
chip_gen: v5e
topology: v5e:2x2
jax: 0.10.0
libtpu: 0.0.40
codegen_flags: <defaults>
</compile_context>

<pallas_src>
import functools

import jax
import jax.numpy as jnp
from jax import lax
from jax.experimental import pallas as pl
from jax.experimental.pallas import tpu as pltpu


# ----------------------------------------------------------------------------
# Fused Pallas kernel: conv1+ReLU -> conv2+ReLU -> global-avg-pool -> fc
# ----------------------------------------------------------------------------
def _fused_chexpert_kernel(H, W, Cin, C1, C2, TH,
                           x_ref, w1_ref, b1_ref, w2_ref, b2_ref,
                           wfc_ref, bfc_ref, o_ref, a1_buf, acc_ref):
    # x_ref   : (1, Cin, H+4, W+2) f32   halo-padded image, channel-first,
    #                                    VMEM-resident across all row tiles
    # w1_ref  : (9*Cin*C1,)        f32   conv1 weights in SMEM,
    #                                    index ((dh*3+dw)*Cin+ci)*C1+co
    # b1_ref  : (C1,)              f32   conv1 bias in SMEM
    # w2_ref  : (9*C1, C2)         bf16  conv2 weights, rows ordered (dh,dw,ci)
    # b2_ref  : (1, C2)            f32
    # wfc_ref : (C2, NC)           f32
    # bfc_ref : (1, NC)            f32
    # o_ref   : (1, 1, NC)         f32   logits for this image
    # a1_buf  : (C1, TH+2, W+2)    bf16  conv1 tile (+1 row/col halo), W in lanes
    # acc_ref : (1, C2)            f32   running sum of conv2 activations (pool)
    m = pl.program_id(1)
    num_m = pl.num_programs(1)
    r0 = pl.multiple_of(m * TH, TH)                  # first output row of tile

    # conv2's SAME padding needs zeros in the column halo; it is never written
    # by the interior stores, so zero it once per image.
    @pl.when(m == 0)
    def _():
        zcol = jnp.zeros((C1, TH + 2, 1), jnp.bfloat16)
        a1_buf[:, :, 0:1] = zcol
        a1_buf[:, :, W + 1:W + 2] = zcol

    # ---- conv1 (+bias, ReLU): 27 lane-dense plane MACs per output channel ---
    # Weights are SMEM scalars -> scalar*vector splat, no cross-lane work.
    def conv1_one_channel(co, carry):
        acc = jnp.zeros((TH + 2, W), jnp.float32)
        for dh in range(3):
            for dw in range(3):
                for ci in range(Cin):
                    w = w1_ref[((dh * 3 + dw) * Cin + ci) * C1 + co]
                    acc = acc + x_ref[0, ci, pl.ds(r0 + dh, TH + 2),
                                      dw:dw + W] * w
        plane = jnp.maximum(acc + b1_ref[co], 0.0)
        # Single interior write per tile (no full zero + rewrite of the buffer).
        a1_buf[co, :, 1:W + 1] = plane.astype(jnp.bfloat16)
        return carry

    lax.fori_loop(0, C1, conv1_one_channel, 0)

    # conv2's SAME padding expects zeros (not conv1-of-padding) in the row halo
    # rows that fall outside the image; only the first/last tile touches them.
    @pl.when(m == 0)
    def _():
        a1_buf[:, 0:1, :] = jnp.zeros((C1, 1, W + 2), jnp.bfloat16)

    @pl.when(m == num_m - 1)
    def _():
        a1_buf[:, TH + 1:TH + 2, :] = jnp.zeros((C1, 1, W + 2), jnp.bfloat16)

    # ---- conv2 (+bias, ReLU): one im2col GEMM (TH*W, 9*C1) @ (9*C1, C2) -----
    # bf16 operands, f32 accumulation on the MXU.
    P = TH * W
    pieces = []
    for dh in range(3):
        for dw in range(3):
            pieces.append(a1_buf[:, dh:dh + TH, dw:dw + W].reshape(C1, P))
    lhs_t = jnp.concatenate(pieces, axis=0)                   # (9*C1, P) bf16
    a2 = jnp.dot(lhs_t.T, w2_ref[...],
                 preferred_element_type=jnp.float32)          # (P, C2) f32
    a2 = jnp.maximum(a2 + b2_ref[...], 0.0)

    # ---- global-average-pool accumulation across row tiles ------------------
    # Correctness relies on the m axis staying innermost, sequential and
    # "arbitrary" (zeroed at m==0, consumed at m==num_m-1).
    @pl.when(m == 0)
    def _():
        acc_ref[...] = jnp.zeros_like(acc_ref)

    acc_ref[...] = acc_ref[...] + jnp.sum(a2, axis=0, keepdims=True)

    # ---- last-tile epilogue: mean + fc --------------------------------------
    @pl.when(m == num_m - 1)
    def _():
        pooled = acc_ref[...] * (1.0 / float(H * W))          # (1, C2)
        logits = jnp.dot(pooled, wfc_ref[...],
                         preferred_element_type=jnp.float32) + bfc_ref[...]
        o_ref[0] = logits.astype(o_ref.dtype)


# ----------------------------------------------------------------------------
# VMEM budgeting ((8,128)-tile-padding aware) and tile selection
# ----------------------------------------------------------------------------
def _padded_vmem_bytes(shape, dtype):
    """VMEM footprint of one buffer, rounding the minor dim to 128 lanes and
    the second-minor dim to the dtype's sublane tile (8 f32 / 16 bf16)."""
    itemsize = jnp.dtype(dtype).itemsize
    shape = tuple(int(d) for d in shape)
    if len(shape) == 0:
        shape = (1, 1)
    elif len(shape) == 1:
        shape = (1,) + shape
    sublane = 8 * (4 // itemsize)
    lead = 1
    for d in shape[:-2]:
        lead *= d
    rows = -(-shape[-2] // sublane) * sublane
    lanes = -(-shape[-1] // 128) * 128
    return lead * rows * lanes * itemsize


def _vmem_estimate(H, W, Cin, C1, C2, NC, TH):
    """Padding-aware estimate of the kernel's VMEM working set in bytes."""
    P = TH * W
    est = 0
    # Pipelined blocks are double-buffered by default.
    est += 2 * _padded_vmem_bytes((1, Cin, H + 4, W + 2), jnp.float32)  # input
    est += 2 * _padded_vmem_bytes((9 * C1, C2), jnp.bfloat16)           # w2
    est += 2 * (_padded_vmem_bytes((1, C2), jnp.float32)
                + _padded_vmem_bytes((C2, NC), jnp.float32)
                + _padded_vmem_bytes((1, NC), jnp.float32)
                + _padded_vmem_bytes((1, 1, NC), jnp.float32))          # b/fc/out
    # Scratch buffers.
    est += _padded_vmem_bytes((C1, TH + 2, W + 2), jnp.bfloat16)        # a1 tile
    est += _padded_vmem_bytes((1, C2), jnp.float32)                     # pool acc
    # In-kernel temporaries: conv1 accumulator/slab planes, im2col value and
    # its relayout copy, (P, C2) f32 conv2 activations (padded to 128 lanes).
    est += 4 * _padded_vmem_bytes((TH + 2, W), jnp.float32)
    est += 2 * _padded_vmem_bytes((9 * C1, P), jnp.bfloat16)
    est += _padded_vmem_bytes((P, C2), jnp.float32)
    return int(est * 1.3)                                               # slack


_VMEM_TILE_BUDGET = 40 * 1024 * 1024   # tile selection keeps the estimate here
_VMEM_REQUEST_CAP = 48 * 1024 * 1024   # safe on v7x (64 MiB physical VMEM)


def _pick_row_tile(H, W, Cin, C1, C2, NC, row_tile=None):
    """Rows per grid step: a divisor of H, preferring multiples of 8, targeting
    ~16K output positions per tile within the padded VMEM budget."""
    if row_tile is not None:
        assert H % row_tile == 0, (H, row_tile)
        return row_tile
    target_rows = max(1, 16384 // max(W, 1))
    divisors = [d for d in range(1, H + 1) if H % d == 0]
    ok = [d for d in divisors
          if d <= target_rows
          and _vmem_estimate(H, W, Cin, C1, C2, NC, d) <= _VMEM_TILE_BUDGET]
    if not ok:
        ok = [min(divisors)]
    aligned = [d for d in ok if d % 8 == 0]
    return max(aligned) if aligned else max(ok)


# ----------------------------------------------------------------------------
# Wrapper
# ----------------------------------------------------------------------------
def dummy_chexpert_forward(x_nchw, params, row_tile=None):
    """Accepts NCHW input like the PyTorch module; returns (B, num_classes)."""
    x = x_nchw.astype(jnp.float32)                    # (B, Cin, H, W), W in lanes
    B, Cin, H, W = x.shape
    C1 = params["conv1_b"].shape[0]
    C2 = params["conv2_b"].shape[0]
    NC = params["fc_b"].shape[0]

    TH = _pick_row_tile(H, W, Cin, C1, C2, NC, row_tile)
    num_m = H // TH

    # 2-row / 1-col zero halo so the stacked conv1+conv2 receptive field of any
    # row tile never leaves the resident block.
    x_pad = jnp.pad(x, ((0, 0), (0, 0), (2, 2), (1, 1)))

    w1 = params["conv1_w"].reshape(-1).astype(jnp.float32)        # (9*Cin*C1,)
    b1 = params["conv1_b"].reshape(-1).astype(jnp.float32)        # (C1,)
    w2 = params["conv2_w"].reshape(9 * C1, C2).astype(jnp.bfloat16)
    b2 = params["conv2_b"].reshape(1, C2).astype(jnp.float32)
    wfc = params["fc_w"].astype(jnp.float32)                      # (C2, NC)
    bfc = params["fc_b"].reshape(1, NC).astype(jnp.float32)

    kernel = functools.partial(_fused_chexpert_kernel, H, W, Cin, C1, C2, TH)

    vmem_limit = int(min(_VMEM_REQUEST_CAP,
                         max(32 * 1024 * 1024,
                             _vmem_estimate(H, W, Cin, C1, C2, NC, TH))))

    out = pl.pallas_call(
        kernel,
        out_shape=jax.ShapeDtypeStruct((B, 1, NC), jnp.float32),
        grid=(B, num_m),
        in_specs=[
            # Whole (halo-padded) image, indexed by batch only -> stays
            # VMEM-resident across all row tiles (one HBM read per image).
            pl.BlockSpec((1, Cin, H + 4, W + 2), lambda b, m: (b, 0, 0, 0)),
            # conv1 weights / bias as SMEM scalars (sreg splat per plane MAC).
            pl.BlockSpec(memory_space=pltpu.MemorySpace.SMEM),
            pl.BlockSpec(memory_space=pltpu.MemorySpace.SMEM),
            pl.BlockSpec((9 * C1, C2), lambda b, m: (0, 0)),
            pl.BlockSpec((1, C2), lambda b, m: (0, 0)),
            pl.BlockSpec((C2, NC), lambda b, m: (0, 0)),
            pl.BlockSpec((1, NC), lambda b, m: (0, 0)),
        ],
        out_specs=pl.BlockSpec((1, 1, NC), lambda b, m: (b, 0, 0)),
        scratch_shapes=[
            pltpu.VMEM((C1, TH + 2, W + 2), jnp.bfloat16),   # conv1 tile + halo
            pltpu.VMEM((1, C2), jnp.float32),                # pooling accumulator
        ],
        compiler_params=pltpu.CompilerParams(
            # Batch is parallel (megacore-shardable); the row-tile axis carries
            # the pooling reduction so it must stay innermost and "arbitrary".
            dimension_semantics=("parallel", "arbitrary"),
            vmem_limit_bytes=vmem_limit,
        ),
    )(x_pad, w1, b1, w2, b2, wfc, bfc)
    return out.reshape(B, NC)


# ----------------------------------------------------------------------------
# Params + pure-JAX reference (for the correctness check)
# ----------------------------------------------------------------------------
def init_params(key, num_classes=14):
    ks = jax.random.split(key, 6)

    def uniform(k, shape, fan_in):
        bound = 1.0 / jnp.sqrt(jnp.float32(fan_in))
        return jax.random.uniform(k, shape, jnp.float32, -bound, bound)

    return {
        # HWIO conv weights
        "conv1_w": uniform(ks[0], (3, 3, 3, 16), 3 * 3 * 3),
        "conv1_b": uniform(ks[1], (16,), 3 * 3 * 3),
        "conv2_w": uniform(ks[2], (3, 3, 16, 32), 3 * 3 * 16),
        "conv2_b": uniform(ks[3], (32,), 3 * 3 * 16),
        "fc_w": uniform(ks[4], (32, num_classes), 32),
        "fc_b": uniform(ks[5], (num_classes,), 32),
    }


def reference_forward(x_nchw, params):
    x = jnp.transpose(x_nchw, (0, 2, 3, 1)).astype(jnp.float32)
    dn = ("NHWC", "HWIO", "NHWC")
    y = lax.conv_general_dilated(x, params["conv1_w"], (1, 1), "SAME",
                                 dimension_numbers=dn,
                                 precision=lax.Precision.HIGHEST)
    y = jax.nn.relu(y + params["conv1_b"])
    y = lax.conv_general_dilated(y, params["conv2_w"], (1, 1), "SAME",
                                 dimension_numbers=dn,
                                 precision=lax.Precision.HIGHEST)
    y = jax.nn.relu(y + params["conv2_b"])
    pooled = jnp.mean(y, axis=(1, 2))
    return pooled @ params["fc_w"] + params["fc_b"]


if __name__ == "__main__":
    key = jax.random.PRNGKey(0)
    k_x, k_p = jax.random.split(key)

    x = jax.random.normal(k_x, (2, 3, 16, 16), dtype=jnp.float32)  # NCHW
    params = init_params(k_p, num_classes=14)

    ref = jax.block_until_ready(reference_forward(x, params))

    # row_tile=8 exercises the multi-tile (cross-tile pooling) path;
    # row_tile=None uses the auto-picked single-tile path for 16x16.
    # Tolerance covers bf16 storage of the conv2 operands (f32 accumulation).
    for rt in (8, None):
        logits = jax.block_until_ready(
            dummy_chexpert_forward(x, params, row_tile=rt))
        assert logits.shape == (2, 14), logits.shape
        assert bool(jnp.all(jnp.isfinite(logits)))
        assert bool(jnp.allclose(logits, ref, atol=1e-2, rtol=1e-2)), (
            f"row_tile={rt} max abs err {float(jnp.max(jnp.abs(logits - ref)))}")

    print("KERNEL_OK")
</pallas_src>

<mosaic_0001>
module attributes {stable_mosaic.version = 11 : i64} {
  func.func @_fused_chexpert_kernel(%arg0: i32, %arg1: i32, %arg2: memref<1x3x20x18xf32, #tpu.memory_space<vmem>>, %arg3: memref<432xf32, #tpu.memory_space<smem>>, %arg4: memref<16xf32, #tpu.memory_space<smem>>, %arg5: memref<144x32xbf16, #tpu.memory_space<vmem>>, %arg6: memref<1x32xf32, #tpu.memory_space<vmem>>, %arg7: memref<32x14xf32, #tpu.memory_space<vmem>>, %arg8: memref<1x14xf32, #tpu.memory_space<vmem>>, %arg9: memref<1x1x14xf32, #tpu.memory_space<vmem>>, %arg10: memref<16x10x18xbf16, #tpu.memory_space<vmem>>, %arg11: memref<1x32xf32, #tpu.memory_space<vmem>>) attributes {dimension_semantics = [#tpu.dimension_semantics<parallel>, #tpu.dimension_semantics<arbitrary>], iteration_bounds = array<i64: 2, 2>, scalar_prefetch = 0 : i64, scratch_operands = 2 : i64, tpu.core_type = #tpu.core_type<tc>, window_params = [{transform_indices = @transform_0, window_bounds = array<i64: 1, 3, 20, 18>}, {transform_indices = @transform_1, window_bounds = array<i64: 432>}, {transform_indices = @transform_2, window_bounds = array<i64: 16>}, {pipeline_mode = #tpu.pipeline_mode<synchronous>, transform_indices = @transform_3, window_bounds = array<i64: 144, 32>}, {pipeline_mode = #tpu.pipeline_mode<synchronous>, transform_indices = @transform_4, window_bounds = array<i64: 1, 32>}, {pipeline_mode = #tpu.pipeline_mode<synchronous>, transform_indices = @transform_5, window_bounds = array<i64: 32, 14>}, {pipeline_mode = #tpu.pipeline_mode<synchronous>, transform_indices = @transform_6, window_bounds = array<i64: 1, 14>}, {transform_indices = @transform_7, window_bounds = array<i64: 1, 1, 14>}]} {
    %c8_i32 = arith.constant 8 : i32
    %0 = arith.muli %arg1, %c8_i32 : i32
    %1 = tpu.assume_multiple %0, 8 : i32
    %c0_i32 = arith.constant 0 : i32
    %2 = arith.cmpi eq, %arg1, %c0_i32 : i32
    %3 = arith.extui %2 : i1 to i32
    %c0_i32_0 = arith.constant 0 : i32
    %4 = arith.cmpi ne, %3, %c0_i32_0 : i32
    scf.if %4 {
      %cst_45 = arith.constant 0.000000e+00 : bf16
      %50 = vector.broadcast %cst_45 : bf16 to vector<16x10x1xbf16>
      %c0_46 = arith.constant 0 : index
      %c0_47 = arith.constant 0 : index
      %c0_48 = arith.constant 0 : index
      %51 = vector.load %arg10[%c0_46, %c0_47, %c0_48] : memref<16x10x18xbf16, #tpu.memory_space<vmem>>, vector<16x10x1xbf16>
      tpu.vector_store %arg10[%c0_46, %c0_47, %c0_48], %50 {strides = array<i32>} : memref<16x10x18xbf16, #tpu.memory_space<vmem>>, vector<16x10x1xbf16>,
      %c0_49 = arith.constant 0 : index
      %c0_50 = arith.constant 0 : index
      %c17 = arith.constant 17 : index
      %52 = vector.load %arg10[%c0_49, %c0_50, %c17] : memref<16x10x18xbf16, #tpu.memory_space<vmem>>, vector<16x10x1xbf16>
      tpu.vector_store %arg10[%c0_49, %c0_50, %c17], %50 {strides = array<i32>} : memref<16x10x18xbf16, #tpu.memory_space<vmem>>, vector<16x10x1xbf16>,
    } else {
    }
    %c0_i32_1 = arith.constant 0 : i32
    %c16_i32 = arith.constant 16 : i32
    %5 = arith.addi %c0_i32_1, %c16_i32 : i32
    %c1_i32 = arith.constant 1 : i32
    scf.for %arg12 = %c0_i32_1 to %5 step %c1_i32  : i32 {
      %cst_45 = arith.constant 0.000000e+00 : f32
      %50 = vector.broadcast %cst_45 : f32 to vector<10x16xf32>
      %c0_i32_46 = arith.constant 0 : i32
      %51 = arith.addi %c0_i32_46, %arg12 : i32
      %52 = arith.index_cast %51 : i32 to index
      %53 = memref.load %arg3[%52] : memref<432xf32, #tpu.memory_space<smem>>
      %c0_i32_47 = arith.constant 0 : i32
      %54 = arith.addi %1, %c0_i32_47 : i32
      %c0_48 = arith.constant 0 : index
      %c0_49 = arith.constant 0 : index
      %55 = arith.index_cast %54 : i32 to index
      %c0_50 = arith.constant 0 : index
      %56 = vector.load %arg2[%c0_48, %c0_49, %55, %c0_50] : memref<1x3x20x18xf32, #tpu.memory_space<vmem>>, vector<1x1x10x16xf32>
      %57 = vector.shape_cast %56 : vector<1x1x10x16xf32> to vector<10x16xf32>
      %58 = vector.broadcast %53 : f32 to vector<10x16xf32>
      %59 = arith.mulf %57, %58 : vector<10x16xf32>
      %60 = arith.addf %50, %59 : vector<10x16xf32>
      %c16_i32_51 = arith.constant 16 : i32
      %61 = arith.addi %c16_i32_51, %arg12 : i32
      %62 = arith.index_cast %61 : i32 to index
      %63 = memref.load %arg3[%62] : memref<432xf32, #tpu.memory_space<smem>>
      %c0_i32_52 = arith.constant 0 : i32
      %64 = arith.addi %1, %c0_i32_52 : i32
      %c0_53 = arith.constant 0 : index
      %c1_54 = arith.constant 1 : index
      %65 = arith.index_cast %64 : i32 to index
      %c0_55 = arith.constant 0 : index
      %66 = vector.load %arg2[%c0_53, %c1_54, %65, %c0_55] : memref<1x3x20x18xf32, #tpu.memory_space<vmem>>, vector<1x1x10x16xf32>
      %67 = vector.shape_cast %66 : vector<1x1x10x16xf32> to vector<10x16xf32>
      %68 = vector.broadcast %63 : f32 to vector<10x16xf32>
      %69 = arith.mulf %67, %68 : vector<10x16xf32>
      %70 = arith.addf %60, %69 : vector<10x16xf32>
      %c32_i32 = arith.constant 32 : i32
      %71 = arith.addi %c32_i32, %arg12 : i32
      %72 = arith.index_cast %71 : i32 to index
      %73 = memref.load %arg3[%72] : memref<432xf32, #tpu.memory_space<smem>>
      %c0_i32_56 = arith.constant 0 : i32
      %74 = arith.addi %1, %c0_i32_56 : i32
      %c0_57 = arith.constant 0 : index
      %c2_58 = arith.constant 2 : index
      %75 = arith.index_cast %74 : i32 to index
      %c0_59 = arith.constant 0 : index
      %76 = vector.load %arg2[%c0_57, %c2_58, %75, %c0_59] : memref<1x3x20x18xf32, #tpu.memory_space<vmem>>, vector<1x1x10x16xf32>
      %77 = vector.shape_cast %76 : vector<1x1x10x16xf32> to vector<10x16xf32>
      %78 = vector.broadcast %73 : f32 to vector<10x16xf32>
      %79 = arith.mulf %77, %78 : vector<10x16xf32>
      %80 = arith.addf %70, %79 : vector<10x16xf32>
      %c48_i32 = arith.constant 48 : i32
      %81 = arith.addi %c48_i32, %arg12 : i32
      %82 = arith.index_cast %81 : i32 to index
      %83 = memref.load %arg3[%82] : memref<432xf32, #tpu.memory_space<smem>>
      %c0_i32_60 = arith.constant 0 : i32
      %84 = arith.addi %1, %c0_i32_60 : i32
      %c0_61 = arith.constant 0 : index
      %c0_62 = arith.constant 0 : index
      %85 = arith.index_cast %84 : i32 to index
      %c1_63 = arith.constant 1 : index
      %86 = vector.load %arg2[%c0_61, %c0_62, %85, %c1_63] : memref<1x3x20x18xf32, #tpu.memory_space<vmem>>, vector<1x1x10x16xf32>
      %87 = vector.shape_cast %86 : vector<1x1x10x16xf32> to vector<10x16xf32>
      %88 = vector.broadcast %83 : f32 to vector<10x16xf32>
      %89 = arith.mulf %87, %88 : vector<10x16xf32>
      %90 = arith.addf %80, %89 : vector<10x16xf32>
      %c64_i32 = arith.constant 64 : i32
      %91 = arith.addi %c64_i32, %arg12 : i32
      %92 = arith.index_cast %91 : i32 to index
      %93 = memref.load %arg3[%92] : memref<432xf32, #tpu.memory_space<smem>>
      %c0_i32_64 = arith.constant 0 : i32
      %94 = arith.addi %1, %c0_i32_64 : i32
      %c0_65 = arith.constant 0 : index
      %c1_66 = arith.constant 1 : index
      %95 = arith.index_cast %94 : i32 to index
      %c1_67 = arith.constant 1 : index
      %96 = vector.load %arg2[%c0_65, %c1_66, %95, %c1_67] : memref<1x3x20x18xf32, #tpu.memory_space<vmem>>, vector<1x1x10x16xf32>
      %97 = vector.shape_cast %96 : vector<1x1x10x16xf32> to vector<10x16xf32>
      %98 = vector.broadcast %93 : f32 to vector<10x16xf32>
      %99 = arith.mulf %97, %98 : vector<10x16xf32>
      %100 = arith.addf %90, %99 : vector<10x16xf32>
      %c80_i32 = arith.constant 80 : i32
      %101 = arith.addi %c80_i32, %arg12 : i32
      %102 = arith.index_cast %101 : i32 to index
      %103 = memref.load %arg3[%102] : memref<432xf32, #tpu.memory_space<smem>>
      %c0_i32_68 = arith.constant 0 : i32
      %104 = arith.addi %1, %c0_i32_68 : i32
      %c0_69 = arith.constant 0 : index
      %c2_70 = arith.constant 2 : index
      %105 = arith.index_cast %104 : i32 to index
      %c1_71 = arith.constant 1 : index
      %106 = vector.load %arg2[%c0_69, %c2_70, %105, %c1_71] : memref<1x3x20x18xf32, #tpu.memory_space<vmem>>, vector<1x1x10x16xf32>
      %107 = vector.shape_cast %106 : vector<1x1x10x16xf32> to vector<10x16xf32>
      %108 = vector.broadcast %103 : f32 to vector<10x16xf32>
      %109 = arith.mulf %107, %108 : vector<10x16xf32>
      %110 = arith.addf %100, %109 : vector<10x16xf32>
      %c96_i32 = arith.constant 96 : i32
      %111 = arith.addi %c96_i32, %arg12 : i32
      %112 = arith.index_cast %111 : i32 to index
      %113 = memref.load %arg3[%112] : memref<432xf32, #tpu.memory_space<smem>>
      %c0_i32_72 = arith.constant 0 : i32
      %114 = arith.addi %1, %c0_i32_72 : i32
      %c0_73 = arith.constant 0 : index
      %c0_74 = arith.constant 0 : index
      %115 = arith.index_cast %114 : i32 to index
      %c2_75 = arith.constant 2 : index
      %116 = vector.load %arg2[%c0_73, %c0_74, %115, %c2_75] : memref<1x3x20x18xf32, #tpu.memory_space<vmem>>, vector<1x1x10x16xf32>
      %117 = vector.shape_cast %116 : vector<1x1x10x16xf32> to vector<10x16xf32>
      %118 = vector.broadcast %113 : f32 to vector<10x16xf32>
      %119 = arith.mulf %117, %118 : vector<10x16xf32>
      %120 = arith.addf %110, %119 : vector<10x16xf32>
      %c112_i32 = arith.constant 112 : i32
      %121 = arith.addi %c112_i32, %arg12 : i32
      %122 = arith.index_cast %121 : i32 to index
      %123 = memref.load %arg3[%122] : memref<432xf32, #tpu.memory_space<smem>>
      %c0_i32_76 = arith.constant 0 : i32
      %124 = arith.addi %1, %c0_i32_76 : i32
      %c0_77 = arith.constant 0 : index
      %c1_78 = arith.constant 1 : index
      %125 = arith.index_cast %124 : i32 to index
      %c2_79 = arith.constant 2 : index
      %126 = vector.load %arg2[%c0_77, %c1_78, %125, %c2_79] : memref<1x3x20x18xf32, #tpu.memory_space<vmem>>, vector<1x1x10x16xf32>
      %127 = vector.shape_cast %126 : vector<1x1x10x16xf32> to vector<10x16xf32>
      %128 = vector.broadcast %123 : f32 to vector<10x16xf32>
      %129 = arith.mulf %127, %128 : vector<10x16xf32>
      %130 = arith.addf %120, %129 : vector<10x16xf32>
      %c128_i32 = arith.constant 128 : i32
      %131 = arith.addi %c128_i32, %arg12 : i32
      %132 = arith.index_cast %131 : i32 to index
      %133 = memref.load %arg3[%132] : memref<432xf32, #tpu.memory_space<smem>>
      %c0_i32_80 = arith.constant 0 : i32
      %134 = arith.addi %1, %c0_i32_80 : i32
      %c0_81 = arith.constant 0 : index
      %c2_82 = arith.constant 2 : index
      %135 = arith.index_cast %134 : i32 to index
      %c2_83 = arith.constant 2 : index
      %136 = vector.load %arg2[%c0_81, %c2_82, %135, %c2_83] : memref<1x3x20x18xf32, #tpu.memory_space<vmem>>, vector<1x1x10x16xf32>
      %137 = vector.shape_cast %136 : vector<1x1x10x16xf32> to vector<10x16xf32>
      %138 = vector.broadcast %133 : f32 to vector<10x16xf32>
      %139 = arith.mulf %137, %138 : vector<10x16xf32>
      %140 = arith.addf %130, %139 : vector<10x16xf32>
      %c144_i32 = arith.constant 144 : i32
      %141 = arith.addi %c144_i32, %arg12 : i32
      %142 = arith.index_cast %141 : i32 to index
      %143 = memref.load %arg3[%142] : memref<432xf32, #tpu.memory_space<smem>>
      %c1_i32_84 = arith.constant 1 : i32
      %144 = arith.addi %1, %c1_i32_84 : i32
      %c0_85 = arith.constant 0 : index
      %c0_86 = arith.constant 0 : index
      %145 = arith.index_cast %144 : i32 to index
      %c0_87 = arith.constant 0 : index
      %146 = vector.load %arg2[%c0_85, %c0_86, %145, %c0_87] : memref<1x3x20x18xf32, #tpu.memory_space<vmem>>, vector<1x1x10x16xf32>
      %147 = vector.shape_cast %146 : vector<1x1x10x16xf32> to vector<10x16xf32>
      %148 = vector.broadcast %143 : f32 to vector<10x16xf32>
      %149 = arith.mulf %147, %148 : vector<10x16xf32>
      %150 = arith.addf %140, %149 : vector<10x16xf32>
      %c160_i32 = arith.constant 160 : i32
      %151 = arith.addi %c160_i32, %arg12 : i32
      %152 = arith.index_cast %151 : i32 to index
      %153 = memref.load %arg3[%152] : memref<432xf32, #tpu.memory_space<smem>>
      %c1_i32_88 = arith.constant 1 : i32
      %154 = arith.addi %1, %c1_i32_88 : i32
      %c0_89 = arith.constant 0 : index
      %c1_90 = arith.constant 1 : index
      %155 = arith.index_cast %154 : i32 to index
      %c0_91 = arith.constant 0 : index
      %156 = vector.load %arg2[%c0_89, %c1_90, %155, %c0_91] : memref<1x3x20x18xf32, #tpu.memory_space<vmem>>, vector<1x1x10x16xf32>
      %157 = vector.shape_cast %156 : vector<1x1x10x16xf32> to vector<10x16xf32>
      %158 = vector.broadcast %153 : f32 to vector<10x16xf32>
      %159 = arith.mulf %157, %158 : vector<10x16xf32>
      %160 = arith.addf %150, %159 : vector<10x16xf32>
      %c176_i32 = arith.constant 176 : i32
      %161 = arith.addi %c176_i32, %arg12 : i32
      %162 = arith.index_cast %161 : i32 to index
      %163 = memref.load %arg3[%162] : memref<432xf32, #tpu.memory_space<smem>>
      %c1_i32_92 = arith.constant 1 : i32
      %164 = arith.addi %1, %c1_i32_92 : i32
      %c0_93 = arith.constant 0 : index
      %c2_94 = arith.constant 2 : index
      %165 = arith.index_cast %164 : i32 to index
      %c0_95 = arith.constant 0 : index
      %166 = vector.load %arg2[%c0_93, %c2_94, %165, %c0_95] : memref<1x3x20x18xf32, #tpu.memory_space<vmem>>, vector<1x1x10x16xf32>
      %167 = vector.shape_cast %166 : vector<1x1x10x16xf32> to vector<10x16xf32>
      %168 = vector.broadcast %163 : f32 to vector<10x16xf32>
      %169 = arith.mulf %167, %168 : vector<10x16xf32>
      %170 = arith.addf %160, %169 : vector<10x16xf32>
      %c192_i32 = arith.constant 192 : i32
      %171 = arith.addi %c192_i32, %arg12 : i32
      %172 = arith.index_cast %171 : i32 to index
      %173 = memref.load %arg3[%172] : memref<432xf32, #tpu.memory_space<smem>>
      %c1_i32_96 = arith.constant 1 : i32
      %174 = arith.addi %1, %c1_i32_96 : i32
      %c0_97 = arith.constant 0 : index
      %c0_98 = arith.constant 0 : index
      %175 = arith.index_cast %174 : i32 to index
      %c1_99 = arith.constant 1 : index
      %176 = vector.load %arg2[%c0_97, %c0_98, %175, %c1_99] : memref<1x3x20x18xf32, #tpu.memory_space<vmem>>, vector<1x1x10x16xf32>
      %177 = vector.shape_cast %176 : vector<1x1x10x16xf32> to vector<10x16xf32>
      %178 = vector.broadcast %173 : f32 to vector<10x16xf32>
      %179 = arith.mulf %177, %178 : vector<10x16xf32>
      %180 = arith.addf %170, %179 : vector<10x16xf32>
      %c208_i32 = arith.constant 208 : i32
      %181 = arith.addi %c208_i32, %arg12 : i32
      %182 = arith.index_cast %181 : i32 to index
      %183 = memref.load %arg3[%182] : memref<432xf32, #tpu.memory_space<smem>>
      %c1_i32_100 = arith.constant 1 : i32
      %184 = arith.addi %1, %c1_i32_100 : i32
      %c0_101 = arith.constant 0 : index
      %c1_102 = arith.constant 1 : index
      %185 = arith.index_cast %184 : i32 to index
      %c1_103 = arith.constant 1 : index
      %186 = vector.load %arg2[%c0_101, %c1_102, %185, %c1_103] : memref<1x3x20x18xf32, #tpu.memory_space<vmem>>, vector<1x1x10x16xf32>
      %187 = vector.shape_cast %186 : vector<1x1x10x16xf32> to vector<10x16xf32>
      %188 = vector.broadcast %183 : f32 to vector<10x16xf32>
      %189 = arith.mulf %187, %188 : vector<10x16xf32>
      %190 = arith.addf %180, %189 : vector<10x16xf32>
      %c224_i32 = arith.constant 224 : i32
      %191 = arith.addi %c224_i32, %arg12 : i32
      %192 = arith.index_cast %191 : i32 to index
      %193 = memref.load %arg3[%192] : memref<432xf32, #tpu.memory_space<smem>>
      %c1_i32_104 = arith.constant 1 : i32
      %194 = arith.addi %1, %c1_i32_104 : i32
      %c0_105 = arith.constant 0 : index
      %c2_106 = arith.constant 2 : index
      %195 = arith.index_cast %194 : i32 to index
      %c1_107 = arith.constant 1 : index
      %196 = vector.load %arg2[%c0_105, %c2_106, %195, %c1_107] : memref<1x3x20x18xf32, #tpu.memory_space<vmem>>, vector<1x1x10x16xf32>
      %197 = vector.shape_cast %196 : vector<1x1x10x16xf32> to vector<10x16xf32>
      %198 = vector.broadcast %193 : f32 to vector<10x16xf32>
      %199 = arith.mulf %197, %198 : vector<10x16xf32>
      %200 = arith.addf %190, %199 : vector<10x16xf32>
      %c240_i32 = arith.constant 240 : i32
      %201 = arith.addi %c240_i32, %arg12 : i32
      %202 = arith.index_cast %201 : i32 to index
      %203 = memref.load %arg3[%202] : memref<432xf32, #tpu.memory_space<smem>>
      %c1_i32_108 = arith.constant 1 : i32
      %204 = arith.addi %1, %c1_i32_108 : i32
      %c0_109 = arith.constant 0 : index
      %c0_110 = arith.constant 0 : index
      %205 = arith.index_cast %204 : i32 to index
      %c2_111 = arith.constant 2 : index
      %206 = vector.load %arg2[%c0_109, %c0_110, %205, %c2_111] : memref<1x3x20x18xf32, #tpu.memory_space<vmem>>, vector<1x1x10x16xf32>
      %207 = vector.shape_cast %206 : vector<1x1x10x16xf32> to vector<10x16xf32>
      %208 = vector.broadcast %203 : f32 to vector<10x16xf32>
      %209 = arith.mulf %207, %208 : vector<10x16xf32>
      %210 = arith.addf %200, %209 : vector<10x16xf32>
      %c256_i32 = arith.constant 256 : i32
      %211 = arith.addi %c256_i32, %arg12 : i32
      %212 = arith.index_cast %211 : i32 to index
      %213 = memref.load %arg3[%212] : memref<432xf32, #tpu.memory_space<smem>>
      %c1_i32_112 = arith.constant 1 : i32
      %214 = arith.addi %1, %c1_i32_112 : i32
      %c0_113 = arith.constant 0 : index
      %c1_114 = arith.constant 1 : index
      %215 = arith.index_cast %214 : i32 to index
      %c2_115 = arith.constant 2 : index
      %216 = vector.load %arg2[%c0_113, %c1_114, %215, %c2_115] : memref<1x3x20x18xf32, #tpu.memory_space<vmem>>, vector<1x1x10x16xf32>
      %217 = vector.shape_cast %216 : vector<1x1x10x16xf32> to vector<10x16xf32>
      %218 = vector.broadcast %213 : f32 to vector<10x16xf32>
      %219 = arith.mulf %217, %218 : vector<10x16xf32>
      %220 = arith.addf %210, %219 : vector<10x16xf32>
      %c272_i32 = arith.constant 272 : i32
      %221 = arith.addi %c272_i32, %arg12 : i32
      %222 = arith.index_cast %221 : i32 to index
      %223 = memref.load %arg3[%222] : memref<432xf32, #tpu.memory_space<smem>>
      %c1_i32_116 = arith.constant 1 : i32
      %224 = arith.addi %1, %c1_i32_116 : i32
      %c0_117 = arith.constant 0 : index
      %c2_118 = arith.constant 2 : index
      %225 = arith.index_cast %224 : i32 to index
      %c2_119 = arith.constant 2 : index
      %226 = vector.load %arg2[%c0_117, %c2_118, %225, %c2_119] : memref<1x3x20x18xf32, #tpu.memory_space<vmem>>, vector<1x1x10x16xf32>
      %227 = vector.shape_cast %226 : vector<1x1x10x16xf32> to vector<10x16xf32>
      %228 = vector.broadcast %223 : f32 to vector<10x16xf32>
      %229 = arith.mulf %227, %228 : vector<10x16xf32>
      %230 = arith.addf %220, %229 : vector<10x16xf32>
      %c288_i32 = arith.constant 288 : i32
      %231 = arith.addi %c288_i32, %arg12 : i32
      %232 = arith.index_cast %231 : i32 to index
      %233 = memref.load %arg3[%232] : memref<432xf32, #tpu.memory_space<smem>>
      %c2_i32 = arith.constant 2 : i32
      %234 = arith.addi %1, %c2_i32 : i32
      %c0_120 = arith.constant 0 : index
      %c0_121 = arith.constant 0 : index
      %235 = arith.index_cast %234 : i32 to index
      %c0_122 = arith.constant 0 : index
      %236 = vector.load %arg2[%c0_120, %c0_121, %235, %c0_122] : memref<1x3x20x18xf32, #tpu.memory_space<vmem>>, vector<1x1x10x16xf32>
      %237 = vector.shape_cast %236 : vector<1x1x10x16xf32> to vector<10x16xf32>
      %238 = vector.broadcast %233 : f32 to vector<10x16xf32>
      %239 = arith.mulf %237, %238 : vector<10x16xf32>
      %240 = arith.addf %230, %239 : vector<10x16xf32>
      %c304_i32 = arith.constant 304 : i32
      %241 = arith.addi %c304_i32, %arg12 : i32
      %242 = arith.index_cast %241 : i32 to index
      %243 = memref.load %arg3[%242] : memref<432xf32, #tpu.memory_space<smem>>
      %c2_i32_123 = arith.constant 2 : i32
      %244 = arith.addi %1, %c2_i32_123 : i32
      %c0_124 = arith.constant 0 : index
      %c1_125 = arith.constant 1 : index
      %245 = arith.index_cast %244 : i32 to index
      %c0_126 = arith.constant 0 : index
      %246 = vector.load %arg2[%c0_124, %c1_125, %245, %c0_126] : memref<1x3x20x18xf32, #tpu.memory_space<vmem>>, vector<1x1x10x16xf32>
      %247 = vector.shape_cast %246 : vector<1x1x10x16xf32> to vector<10x16xf32>
      %248 = vector.broadcast %243 : f32 to vector<10x16xf32>
      %249 = arith.mulf %247, %248 : vector<10x16xf32>
      %250 = arith.addf %240, %249 : vector<10x16xf32>
      %c320_i32 = arith.constant 320 : i32
      %251 = arith.addi %c320_i32, %arg12 : i32
      %252 = arith.index_cast %251 : i32 to index
      %253 = memref.load %arg3[%252] : memref<432xf32, #tpu.memory_space<smem>>
      %c2_i32_127 = arith.constant 2 : i32
      %254 = arith.addi %1, %c2_i32_127 : i32
      %c0_128 = arith.constant 0 : index
      %c2_129 = arith.constant 2 : index
      %255 = arith.index_cast %254 : i32 to index
      %c0_130 = arith.constant 0 : index
      %256 = vector.load %arg2[%c0_128, %c2_129, %255, %c0_130] : memref<1x3x20x18xf32, #tpu.memory_space<vmem>>, vector<1x1x10x16xf32>
      %257 = vector.shape_cast %256 : vector<1x1x10x16xf32> to vector<10x16xf32>
      %258 = vector.broadcast %253 : f32 to vector<10x16xf32>
      %259 = arith.mulf %257, %258 : vector<10x16xf32>
      %260 = arith.addf %250, %259 : vector<10x16xf32>
      %c336_i32 = arith.constant 336 : i32
      %261 = arith.addi %c336_i32, %arg12 : i32
      %262 = arith.index_cast %261 : i32 to index
      %263 = memref.load %arg3[%262] : memref<432xf32, #tpu.memory_space<smem>>
      %c2_i32_131 = arith.constant 2 : i32
      %264 = arith.addi %1, %c2_i32_131 : i32
      %c0_132 = arith.constant 0 : index
      %c0_133 = arith.constant 0 : index
      %265 = arith.index_cast %264 : i32 to index
      %c1_134 = arith.constant 1 : index
      %266 = vector.load %arg2[%c0_132, %c0_133, %265, %c1_134] : memref<1x3x20x18xf32, #tpu.memory_space<vmem>>, vector<1x1x10x16xf32>
      %267 = vector.shape_cast %266 : vector<1x1x10x16xf32> to vector<10x16xf32>
      %268 = vector.broadcast %263 : f32 to vector<10x16xf32>
      %269 = arith.mulf %267, %268 : vector<10x16xf32>
      %270 = arith.addf %260, %269 : vector<10x16xf32>
      %c352_i32 = arith.constant 352 : i32
      %271 = arith.addi %c352_i32, %arg12 : i32
      %272 = arith.index_cast %271 : i32 to index
      %273 = memref.load %arg3[%272] : memref<432xf32, #tpu.memory_space<smem>>
      %c2_i32_135 = arith.constant 2 : i32
      %274 = arith.addi %1, %c2_i32_135 : i32
      %c0_136 = arith.constant 0 : index
      %c1_137 = arith.constant 1 : index
      %275 = arith.index_cast %274 : i32 to index
      %c1_138 = arith.constant 1 : index
      %276 = vector.load %arg2[%c0_136, %c1_137, %275, %c1_138] : memref<1x3x20x18xf32, #tpu.memory_space<vmem>>, vector<1x1x10x16xf32>
      %277 = vector.shape_cast %276 : vector<1x1x10x16xf32> to vector<10x16xf32>
      %278 = vector.broadcast %273 : f32 to vector<10x16xf32>
      %279 = arith.mulf %277, %278 : vector<10x16xf32>
      %280 = arith.addf %270, %279 : vector<10x16xf32>
      %c368_i32 = arith.constant 368 : i32
      %281 = arith.addi %c368_i32, %arg12 : i32
      %282 = arith.index_cast %281 : i32 to index
      %283 = memref.load %arg3[%282] : memref<432xf32, #tpu.memory_space<smem>>
      %c2_i32_139 = arith.constant 2 : i32
      %284 = arith.addi %1, %c2_i32_139 : i32
      %c0_140 = arith.constant 0 : index
      %c2_141 = arith.constant 2 : index
      %285 = arith.index_cast %284 : i32 to index
      %c1_142 = arith.constant 1 : index
      %286 = vector.load %arg2[%c0_140, %c2_141, %285, %c1_142] : memref<1x3x20x18xf32, #tpu.memory_space<vmem>>, vector<1x1x10x16xf32>
      %287 = vector.shape_cast %286 : vector<1x1x10x16xf32> to vector<10x16xf32>
      %288 = vector.broadcast %283 : f32 to vector<10x16xf32>
      %289 = arith.mulf %287, %288 : vector<10x16xf32>
      %290 = arith.addf %280, %289 : vector<10x16xf32>
      %c384_i32 = arith.constant 384 : i32
      %291 = arith.addi %c384_i32, %arg12 : i32
      %292 = arith.index_cast %291 : i32 to index
      %293 = memref.load %arg3[%292] : memref<432xf32, #tpu.memory_space<smem>>
      %c2_i32_143 = arith.constant 2 : i32
      %294 = arith.addi %1, %c2_i32_143 : i32
      %c0_144 = arith.constant 0 : index
      %c0_145 = arith.constant 0 : index
      %295 = arith.index_cast %294 : i32 to index
      %c2_146 = arith.constant 2 : index
      %296 = vector.load %arg2[%c0_144, %c0_145, %295, %c2_146] : memref<1x3x20x18xf32, #tpu.memory_space<vmem>>, vector<1x1x10x16xf32>
      %297 = vector.shape_cast %296 : vector<1x1x10x16xf32> to vector<10x16xf32>
      %298 = vector.broadcast %293 : f32 to vector<10x16xf32>
      %299 = arith.mulf %297, %298 : vector<10x16xf32>
      %300 = arith.addf %290, %299 : vector<10x16xf32>
      %c400_i32 = arith.constant 400 : i32
      %301 = arith.addi %c400_i32, %arg12 : i32
      %302 = arith.index_cast %301 : i32 to index
      %303 = memref.load %arg3[%302] : memref<432xf32, #tpu.memory_space<smem>>
      %c2_i32_147 = arith.constant 2 : i32
      %304 = arith.addi %1, %c2_i32_147 : i32
      %c0_148 = arith.constant 0 : index
      %c1_149 = arith.constant 1 : index
      %305 = arith.index_cast %304 : i32 to index
      %c2_150 = arith.constant 2 : index
      %306 = vector.load %arg2[%c0_148, %c1_149, %305, %c2_150] : memref<1x3x20x18xf32, #tpu.memory_space<vmem>>, vector<1x1x10x16xf32>
      %307 = vector.shape_cast %306 : vector<1x1x10x16xf32> to vector<10x16xf32>
      %308 = vector.broadcast %303 : f32 to vector<10x16xf32>
      %309 = arith.mulf %307, %308 : vector<10x16xf32>
      %310 = arith.addf %300, %309 : vector<10x16xf32>
      %c416_i32 = arith.constant 416 : i32
      %311 = arith.addi %c416_i32, %arg12 : i32
      %312 = arith.index_cast %311 : i32 to index
      %313 = memref.load %arg3[%312] : memref<432xf32, #tpu.memory_space<smem>>
      %c2_i32_151 = arith.constant 2 : i32
      %314 = arith.addi %1, %c2_i32_151 : i32
      %c0_152 = arith.constant 0 : index
      %c2_153 = arith.constant 2 : index
      %315 = arith.index_cast %314 : i32 to index
      %c2_154 = arith.constant 2 : index
      %316 = vector.load %arg2[%c0_152, %c2_153, %315, %c2_154] : memref<1x3x20x18xf32, #tpu.memory_space<vmem>>, vector<1x1x10x16xf32>
      %317 = vector.shape_cast %316 : vector<1x1x10x16xf32> to vector<10x16xf32>
      %318 = vector.broadcast %313 : f32 to vector<10x16xf32>
      %319 = arith.mulf %317, %318 : vector<10x16xf32>
      %320 = arith.addf %310, %319 : vector<10x16xf32>
      %321 = arith.index_cast %arg12 : i32 to index
      %322 = memref.load %arg4[%321] : memref<16xf32, #tpu.memory_space<smem>>
      %323 = vector.broadcast %322 : f32 to vector<10x16xf32>
      %324 = arith.addf %320, %323 : vector<10x16xf32>
      %cst_155 = arith.constant 0.000000e+00 : f32
      %325 = vector.broadcast %cst_155 : f32 to vector<10x16xf32>
      %326 = arith.maximumf %324, %325 : vector<10x16xf32>
      %327 = arith.truncf %326 : vector<10x16xf32> to vector<10x16xbf16>
      %328 = arith.index_cast %arg12 : i32 to index
      %c0_156 = arith.constant 0 : index
      %c1_157 = arith.constant 1 : index
      %329 = vector.load %arg10[%328, %c0_156, %c1_157] : memref<16x10x18xbf16, #tpu.memory_space<vmem>>, vector<1x10x16xbf16>
      %330 = vector.shape_cast %329 : vector<1x10x16xbf16> to vector<10x16xbf16>
      %331 = vector.shape_cast %327 : vector<10x16xbf16> to vector<1x10x16xbf16>
      tpu.vector_store %arg10[%328, %c0_156, %c1_157], %331 {strides = array<i32>} : memref<16x10x18xbf16, #tpu.memory_space<vmem>>, vector<1x10x16xbf16>,
    }
    %c16_i32_2 = arith.constant 16 : i32
    %c0_i32_3 = arith.constant 0 : i32
    %6 = arith.cmpi eq, %arg1, %c0_i32_3 : i32
    %7 = arith.extui %6 : i1 to i32
    %c0_i32_4 = arith.constant 0 : i32
    %8 = arith.cmpi ne, %7, %c0_i32_4 : i32
    scf.if %8 {
      %cst_45 = arith.constant 0.000000e+00 : bf16
      %50 = vector.broadcast %cst_45 : bf16 to vector<16x1x18xbf16>
      %c0_46 = arith.constant 0 : index
      %c0_47 = arith.constant 0 : index
      %c0_48 = arith.constant 0 : index
      %51 = vector.load %arg10[%c0_46, %c0_47, %c0_48] : memref<16x10x18xbf16, #tpu.memory_space<vmem>>, vector<16x1x18xbf16>
      tpu.vector_store %arg10[%c0_46, %c0_47, %c0_48], %50 {strides = array<i32>} : memref<16x10x18xbf16, #tpu.memory_space<vmem>>, vector<16x1x18xbf16>,
    } else {
    }
    %c1_i32_5 = arith.constant 1 : i32
    %9 = arith.cmpi eq, %arg1, %c1_i32_5 : i32
    %10 = arith.extui %9 : i1 to i32
    %c0_i32_6 = arith.constant 0 : i32
    %11 = arith.cmpi ne, %10, %c0_i32_6 : i32
    scf.if %11 {
      %cst_45 = arith.constant 0.000000e+00 : bf16
      %50 = vector.broadcast %cst_45 : bf16 to vector<16x1x18xbf16>
      %c0_46 = arith.constant 0 : index
      %c9 = arith.constant 9 : index
      %c0_47 = arith.constant 0 : index
      %51 = vector.load %arg10[%c0_46, %c9, %c0_47] : memref<16x10x18xbf16, #tpu.memory_space<vmem>>, vector<16x1x18xbf16>
      tpu.vector_store %arg10[%c0_46, %c9, %c0_47], %50 {strides = array<i32>} : memref<16x10x18xbf16, #tpu.memory_space<vmem>>, vector<16x1x18xbf16>,
    } else {
    }
    %c0 = arith.constant 0 : index
    %c0_7 = arith.constant 0 : index
    %c0_8 = arith.constant 0 : index
    %12 = vector.load %arg10[%c0, %c0_7, %c0_8] : memref<16x10x18xbf16, #tpu.memory_space<vmem>>, vector<16x8x16xbf16>
    %13 = vector.shape_cast %12 : vector<16x8x16xbf16> to vector<16x128xbf16>
    %c0_9 = arith.constant 0 : index
    %c0_10 = arith.constant 0 : index
    %c1 = arith.constant 1 : index
    %14 = vector.load %arg10[%c0_9, %c0_10, %c1] : memref<16x10x18xbf16, #tpu.memory_space<vmem>>, vector<16x8x16xbf16>
    %15 = vector.shape_cast %14 : vector<16x8x16xbf16> to vector<16x128xbf16>
    %c0_11 = arith.constant 0 : index
    %c0_12 = arith.constant 0 : index
    %c2 = arith.constant 2 : index
    %16 = vector.load %arg10[%c0_11, %c0_12, %c2] : memref<16x10x18xbf16, #tpu.memory_space<vmem>>, vector<16x8x16xbf16>
    %17 = vector.shape_cast %16 : vector<16x8x16xbf16> to vector<16x128xbf16>
    %c0_13 = arith.constant 0 : index
    %c1_14 = arith.constant 1 : index
    %c0_15 = arith.constant 0 : index
    %18 = vector.load %arg10[%c0_13, %c1_14, %c0_15] : memref<16x10x18xbf16, #tpu.memory_space<vmem>>, vector<16x8x16xbf16>
    %19 = vector.shape_cast %18 : vector<16x8x16xbf16> to vector<16x128xbf16>
    %c0_16 = arith.constant 0 : index
    %c1_17 = arith.constant 1 : index
    %c1_18 = arith.constant 1 : index
    %20 = vector.load %arg10[%c0_16, %c1_17, %c1_18] : memref<16x10x18xbf16, #tpu.memory_space<vmem>>, vector<16x8x16xbf16>
    %21 = vector.shape_cast %20 : vector<16x8x16xbf16> to vector<16x128xbf16>
    %c0_19 = arith.constant 0 : index
    %c1_20 = arith.constant 1 : index
    %c2_21 = arith.constant 2 : index
    %22 = vector.load %arg10[%c0_19, %c1_20, %c2_21] : memref<16x10x18xbf16, #tpu.memory_space<vmem>>, vector<16x8x16xbf16>
    %23 = vector.shape_cast %22 : vector<16x8x16xbf16> to vector<16x128xbf16>
    %c0_22 = arith.constant 0 : index
    %c2_23 = arith.constant 2 : index
    %c0_24 = arith.constant 0 : index
    %24 = vector.load %arg10[%c0_22, %c2_23, %c0_24] : memref<16x10x18xbf16, #tpu.memory_space<vmem>>, vector<16x8x16xbf16>
    %25 = vector.shape_cast %24 : vector<16x8x16xbf16> to vector<16x128xbf16>
    %c0_25 = arith.constant 0 : index
    %c2_26 = arith.constant 2 : index
    %c1_27 = arith.constant 1 : index
    %26 = vector.load %arg10[%c0_25, %c2_26, %c1_27] : memref<16x10x18xbf16, #tpu.memory_space<vmem>>, vector<16x8x16xbf16>
    %27 = vector.shape_cast %26 : vector<16x8x16xbf16> to vector<16x128xbf16>
    %c0_28 = arith.constant 0 : index
    %c2_29 = arith.constant 2 : index
    %c2_30 = arith.constant 2 : index
    %28 = vector.load %arg10[%c0_28, %c2_29, %c2_30] : memref<16x10x18xbf16, #tpu.memory_space<vmem>>, vector<16x8x16xbf16>
    %29 = vector.shape_cast %28 : vector<16x8x16xbf16> to vector<16x128xbf16>
    %30 = tpu.concatenate %13, %15, %17, %19, %21, %23, %25, %27, %29 in 0 : vector<16x128xbf16>, vector<16x128xbf16>, vector<16x128xbf16>, vector<16x128xbf16>, vector<16x128xbf16>, vector<16x128xbf16>, vector<16x128xbf16>, vector<16x128xbf16>, vector<16x128xbf16> -> vector<144x128xbf16>
    %31 = tpu.transpose %30, [1, 0] : vector<144x128xbf16> -> vector<128x144xbf16>
    %c0_31 = arith.constant 0 : index
    %c0_32 = arith.constant 0 : index
    %32 = vector.load %arg5[%c0_31, %c0_32] : memref<144x32xbf16, #tpu.memory_space<vmem>>, vector<144x32xbf16>
    %cst = arith.constant dense<0.000000e+00> : vector<128x32xf32>
    %33 = tpu.matmul %31, %32, %cst {dimension_numbers = #tpu.dot_dimension_numbers<[1], [0], [0], [1], [0, 0, 1, 1], [], []>} : vector<128x144xbf16>, vector<144x32xbf16>, vector<128x32xf32> -> vector<128x32xf32>
    %c0_33 = arith.constant 0 : index
    %c0_34 = arith.constant 0 : index
    %34 = vector.load %arg6[%c0_33, %c0_34] : memref<1x32xf32, #tpu.memory_space<vmem>>, vector<1x32xf32>
    %35 = vector.broadcast %34 : vector<1x32xf32> to vector<128x32xf32>
    %36 = arith.addf %33, %35 : vector<128x32xf32>
    %cst_35 = arith.constant 0.000000e+00 : f32
    %37 = vector.broadcast %cst_35 : f32 to vector<128x32xf32>
    %38 = arith.maximumf %36, %37 : vector<128x32xf32>
    %c0_i32_36 = arith.constant 0 : i32
    %39 = arith.cmpi eq, %arg1, %c0_i32_36 : i32
    %40 = arith.extui %39 : i1 to i32
    %c0_i32_37 = arith.constant 0 : i32
    %41 = arith.cmpi ne, %40, %c0_i32_37 : i32
    scf.if %41 {
      %cst_45 = arith.constant 0.000000e+00 : f32
      %50 = vector.broadcast %cst_45 : f32 to vector<1x32xf32>
      %c0_46 = arith.constant 0 : index
      %c0_47 = arith.constant 0 : index
      %51 = vector.load %arg11[%c0_46, %c0_47] : memref<1x32xf32, #tpu.memory_space<vmem>>, vector<1x32xf32>
      tpu.vector_store %arg11[%c0_46, %c0_47], %50 {strides = array<i32>} : memref<1x32xf32, #tpu.memory_space<vmem>>, vector<1x32xf32>,
    } else {
    }
    %c0_38 = arith.constant 0 : index
    %c0_39 = arith.constant 0 : index
    %42 = vector.load %arg11[%c0_38, %c0_39] : memref<1x32xf32, #tpu.memory_space<vmem>>, vector<1x32xf32>
    %cst_40 = arith.constant dense<0.000000e+00> : vector<32xf32>
    %43 = vector.multi_reduction <add>, %38, %cst_40 [0] : vector<128x32xf32> to vector<32xf32>
    %44 = vector.shape_cast %43 : vector<32xf32> to vector<1x32xf32>
    %45 = arith.addf %42, %44 : vector<1x32xf32>
    %c0_41 = arith.constant 0 : index
    %c0_42 = arith.constant 0 : index
    %46 = vector.load %arg11[%c0_41, %c0_42] : memref<1x32xf32, #tpu.memory_space<vmem>>, vector<1x32xf32>
    tpu.vector_store %arg11[%c0_41, %c0_42], %45 {strides = array<i32>} : memref<1x32xf32, #tpu.memory_space<vmem>>, vector<1x32xf32>,
    %c1_i32_43 = arith.constant 1 : i32
    %47 = arith.cmpi eq, %arg1, %c1_i32_43 : i32
    %48 = arith.extui %47 : i1 to i32
    %c0_i32_44 = arith.constant 0 : i32
    %49 = arith.cmpi ne, %48, %c0_i32_44 : i32
    scf.if %49 {
      %c0_45 = arith.constant 0 : index
      %c0_46 = arith.constant 0 : index
      %50 = vector.load %arg11[%c0_45, %c0_46] : memref<1x32xf32, #tpu.memory_space<vmem>>, vector<1x32xf32>
      %cst_47 = arith.constant 3.906250e-03 : f32
      %51 = vector.broadcast %cst_47 : f32 to vector<1x32xf32>
      %52 = arith.mulf %50, %51 : vector<1x32xf32>
      %c0_48 = arith.constant 0 : index
      %c0_49 = arith.constant 0 : index
      %53 = vector.load %arg7[%c0_48, %c0_49] : memref<32x14xf32, #tpu.memory_space<vmem>>, vector<32x14xf32>
      %cst_50 = arith.constant dense<0.000000e+00> : vector<1x14xf32>
      %54 = tpu.matmul %52, %53, %cst_50 {dimension_numbers = #tpu.dot_dimension_numbers<[1], [0], [0], [1], [0, 0, 1, 1], [], []>} : vector<1x32xf32>, vector<32x14xf32>, vector<1x14xf32> -> vector<1x14xf32>
      %c0_51 = arith.constant 0 : index
      %c0_52 = arith.constant 0 : index
      %55 = vector.load %arg8[%c0_51, %c0_52] : memref<1x14xf32, #tpu.memory_space<vmem>>, vector<1x14xf32>
      %56 = arith.addf %54, %55 : vector<1x14xf32>
      %c0_53 = arith.constant 0 : index
      %c0_54 = arith.constant 0 : index
      %c0_55 = arith.constant 0 : index
      %57 = vector.load %arg9[%c0_53, %c0_54, %c0_55] : memref<1x1x14xf32, #tpu.memory_space<vmem>>, vector<1x1x14xf32>
      %58 = vector.shape_cast %57 : vector<1x1x14xf32> to vector<1x14xf32>
      %59 = vector.shape_cast %56 : vector<1x14xf32> to vector<1x1x14xf32>
      tpu.vector_store %arg9[%c0_53, %c0_54, %c0_55], %59 {strides = array<i32>} : memref<1x1x14xf32, #tpu.memory_space<vmem>>, vector<1x1x14xf32>,
    } else {
    }
    return
  }
  func.func @transform_0(%arg0: i32, %arg1: i32) -> (i32, i32, i32, i32) {
    %c0_i32 = arith.constant 0 : i32
    %c0_i32_0 = arith.constant 0 : i32
    %c0_i32_1 = arith.constant 0 : i32
    %c0_i32_2 = arith.constant 0 : i32
    return %arg0, %c0_i32, %c0_i32_0, %c0_i32_1 : i32, i32, i32, i32
  }
  func.func @transform_1(%arg0: i32, %arg1: i32) -> i32 {
    %c0_i32 = arith.constant 0 : i32
    %c0_i32_0 = arith.constant 0 : i32
    return %c0_i32 : i32
  }
  func.func @transform_2(%arg0: i32, %arg1: i32) -> i32 {
    %c0_i32 = arith.constant 0 : i32
    %c0_i32_0 = arith.constant 0 : i32
    return %c0_i32 : i32
  }
  func.func @transform_3(%arg0: i32, %arg1: i32) -> (i32, i32) {
    %c0_i32 = arith.constant 0 : i32
    %c0_i32_0 = arith.constant 0 : i32
    %c0_i32_1 = arith.constant 0 : i32
    return %c0_i32, %c0_i32_0 : i32, i32
  }
  func.func @transform_4(%arg0: i32, %arg1: i32) -> (i32, i32) {
    %c0_i32 = arith.constant 0 : i32
    %c0_i32_0 = arith.constant 0 : i32
    %c0_i32_1 = arith.constant 0 : i32
    return %c0_i32, %c0_i32_0 : i32, i32
  }
  func.func @transform_5(%arg0: i32, %arg1: i32) -> (i32, i32) {
    %c0_i32 = arith.constant 0 : i32
    %c0_i32_0 = arith.constant 0 : i32
    %c0_i32_1 = arith.constant 0 : i32
    return %c0_i32, %c0_i32_0 : i32, i32
  }
  func.func @transform_6(%arg0: i32, %arg1: i32) -> (i32, i32) {
    %c0_i32 = arith.constant 0 : i32
    %c0_i32_0 = arith.constant 0 : i32
    %c0_i32_1 = arith.constant 0 : i32
    return %c0_i32, %c0_i32_0 : i32, i32
  }
  func.func @transform_7(%arg0: i32, %arg1: i32) -> (i32, i32, i32) {
    %c0_i32 = arith.constant 0 : i32
    %c0_i32_0 = arith.constant 0 : i32
    %c0_i32_1 = arith.constant 0 : i32
    return %arg0, %c0_i32, %c0_i32_0 : i32, i32, i32
  }
}

</mosaic_0001>

<bundles_post_ra>
// kernel: tpu_custom_call.1
= control target key start
LH: loop header
LB: loop body
LE: loop exit
PB: predicated region body
PF: predicated region fallthrough
CT: control target
= control target key end

     0   :  { %s6861_s0 = inlined_call_operand.vmem [shape: f32[2,3,20,18], index: 0, kind: input, shape index: {}]   ;;  %s6862_s1 = inlined_call_operand.vmem [shape: f32[432], index: 1, kind: input, shape index: {}]   ;;  %s6863_s2 = inlined_call_operand.vmem [shape: f32[16], index: 2, kind: input, shape index: {}]   ;;  %s6864_s3 = inlined_call_operand.vmem [shape: bf16[144,32], index: 3, kind: input, shape index: {}]   ;;  %s6865_s4 = inlined_call_operand.vmem [shape: f32[1,32], index: 4, kind: input, shape index: {}]   ;;  %s6866_s5 = inlined_call_operand.vmem [shape: f32[32,14], index: 5, kind: input, shape index: {}]   ;;  %s6867_s6 = inlined_call_operand.vmem [shape: f32[1,14], index: 6, kind: input, shape index: {}]   ;;  %s6868_s7 = inlined_call_operand.hbm [shape: f32[2,1,14], index: 7, kind: output, shape index: {}]  }
   0x1   :  { %6904 = sst [smem:[#allocation40_spill]] %s6861_s0 }
   0x2   :  { %6905 = sst [smem:[#allocation41_spill]] %s6862_s1 }
   0x3   :  { %12 = vsyncpa [#allocation6], 0 }
   0x4   :  { %13 = vsyncpa [#allocation8], 0 }
   0x5   :  { %14 = vsyncpa [#allocation5], 0 }
   0x6   :  { %16 = vsyncpa [#allocation5 + $0x1], 0  ;;  %s4456_s24 = smov 0   ;;  %s4458_s25 = smov 0  }
   0x7   :  { %s4460_s26 = smov 0   ;;  %s4462_s27 = smov 0  }
   0x8   :  { %s4464_s28 = smov 0   ;;  %s4466_s29 = smov 0  }
   0x9   :  { %s4468_s30 = smov 0   ;;  %s4470_s8 = smov 0  }
   0xa LB: > { %s3999_s9 = sadd.s32 4294967295, %s4392_s8   ;;  %s4000_s10 = sadd.s32 4294967294, %s4392_s8   ;;  %s4392_s8 = sphi %s4470_s8, %s22_s8   ;;  %s4388_s30 = sphi %s4468_s30, %s6994_s30   ;;  %s4384_s29 = sphi %s4466_s29, %s6993_s29   ;;  %s4380_s28 = sphi %s4464_s28, %s6992_s28   ;;  %s4376_s27 = sphi %s4462_s27, %s6991_s27   ;;  %s4372_s26 = sphi %s4460_s26, %s6990_s26   ;;  %s4368_s25 = sphi %s4458_s25, %s6989_s25   ;;  %s4364_s24 = sphi %s4456_s24, %s6988_s24  }
   0xb   : > { %s31_s11 = sadd.s32 1, %s4384_s29  ;;  %s34_s12 = sadd.s32 1, %s4388_s30 }
   0xc   : > { %p32_p0 = scmp.ge.s32.totalorder %s31_s11, 2  ;;  %s193_s13 = sadd.s32 1, %s4372_s26 }
   0xd   : > { %p203_p1 = scmp.ne.s32.totalorder %s4372_s26, %s4368_s25  ;;  %p204_p2 = scmp.eq.s32.totalorder %s3999_s9, 3 }
   0xe   : > { %s6996_s11 = smov (%p32_p0, %s31_s11), 0  ;;  %s6998_s12 = smov (!%p32_p0, %s34_s12), %s4388_s30 }
   0xf   : > { %p4506_p3 = por %p204_p2, %p203_p1  ;;  %p209_p4 = scmp.ne.s32.totalorder %s4368_s25, %s4364_s24 }
  0x10   : > { %p36_p5 = scmp.ge.s32.totalorder %s6998_s12, 2  ;;  %p210_p6 = scmp.eq.s32.totalorder %s4000_s10, 3 }
  0x11   : > { %p4001_p7 = scmp.ge.s32.totalorder %s4392_s8, 1  ;;  %p217_p8 = scmp.lt.s32.totalorder %s4392_s8, 5 }
  0x12   : > { %s7000_s12 = smov (%p36_p5, %s6998_s12), 0  ;;  %p4516_p9 = por %p210_p6, %p209_p4 }
  0x13   : > { %6907 = sst [smem:[#allocation13_spill]] %s7000_s12  ;;  %p4520_p10 = pnand %p4001_p7, %p217_p8 }
  0x14   : > { %s190_s17 = ssub.s32 %s4388_s30, %s7000_s12  ;;  %p4528_p13 = scmp.eq.s32.totalorder %s3999_s9, 0 }
  0x15   : > { %p191_p11 = scmp.eq.s32.totalorder %s190_s17, 0  ;;  %p4134_p12 = pneg %p4520_p10 }
  0x16   : > { %s6911_s1 = sld [smem:[#allocation41_spill]]  ;;  %s239_s17 = sshll.u32 %s6863_s2, 4  ;;  %s240_s17 = int_to_ptr.vmem [resolvable:$true] %s239_s17 }
  0x17   : > { %s4536_s22 = scalar_select %p191_p11, %s4372_s26, %s193_s13  }
  0x18   : > { %p4135_p0 = pnand %p4528_p13, %p4134_p12  ;;  %s4398_s12 = smov [#allocation4]  }
  0x19   : > { %s4399_s9 = smov [#allocation7]   ;;  %272 = sbr.rel (%p4520_p10) target bundleno = 1863 (0x747), region = 48 }
  0x1a   : > { %4140 = dma.vmem_to_smem (!%p4135_p0), %s240_s17, 16, %s4399_s9, [#allocation8]  }
  0x1c   : > { %s229_s21 = sshll.u32 %s6911_s1, 4  ;;  %s230_s21 = int_to_ptr.vmem [resolvable:$true] %s229_s21 }
  0x1d   : > { %4137 = dma.vmem_to_smem (!%p4135_p0), %s230_s21, 64, %s4398_s12, [#allocation6]  }
  0x1e   : > { %4351 = dma.done.wait (%p4528_p13), [#allocation6], 64  }
  0x1f   : > { %4353 = vsyncadd (%p4528_p13), [#allocation6], 4294967232 }
  0x20   : > { %4355 = dma.done.wait (%p4528_p13), [#allocation8], 16  }
  0x21   : > { %4357 = vsyncadd (%p4528_p13), [#allocation8], 4294967280 }
  0x22   : > { %284 = sfence }
  0x23   : > { %s6870_s12 = sand.u32 1, %s4368_s25   ;;  %p310_p1 = scmp.lt.s32.totalorder %s4380_s28, 1 }
  0x24   : > { %s6912_s0 = sld [smem:[#allocation40_spill]]  ;;  %s4564_s10 = scalar_lea.vmem [#allocation9], %s6870_s12 }
  0x25   : > { %s311_s16 = scalar_select %p310_p1, %s4380_s28, 1 }
  0x26   : > { %p4010_p2 = scmp.ne.s32.totalorder %s4376_s27, 0 }
  0x27   : > { %s4123_s19 = smul.u32 72, %s311_s16 }
  0x28   : > { %320 = sbr.rel (%p4010_p2) target bundleno = 110 (0x6e), region = 60 }
  0x2a   : > { %s4560_s23 = scalar_lea.vmem %s6912_s0, %s4123_s19 }
  0x2d   : > { %vm321_vm0 = vcmask 3072   ;;  %v4400_v0 = vmov 0   ;;  %vm323_vm1 = vcmask 0   ;;  %vm355_vm2 = vcmask 142472  }
  0x2e   : > { %322 = vst.msk [vmem:[#allocation2] sm:$0xf] %vm321_vm0, %v4400_v0  ;;  %vm357_vm3 = vcmask 139400  }
  0x2f   : > { %325 = vst.msk [vmem:[#allocation2 + $0x8] sm:$0xf] %vm321_vm0, %v4400_v0 }
  0x30   : > { %327 = vst.msk [vmem:[#allocation2 + $0x10] sm:$0xf] %vm321_vm0, %v4400_v0 }
  0x31   : > { %329 = vst.msk [vmem:[#allocation2 + $0x18] sm:$0xf] %vm321_vm0, %v4400_v0 }
  0x32   : > { %331 = vst.msk [vmem:[#allocation2 + $0x20] sm:$0xf] %vm321_vm0, %v4400_v0 }
  0x33   : > { %333 = vst.msk [vmem:[#allocation2 + $0x28] sm:$0xf] %vm321_vm0, %v4400_v0 }
  0x34   : > { %335 = vst.msk [vmem:[#allocation2 + $0x30] sm:$0xf] %vm321_vm0, %v4400_v0 }
  0x35   : > { %337 = vst.msk [vmem:[#allocation2 + $0x38] sm:$0xf] %vm321_vm0, %v4400_v0 }
  0x36   : > { %339 = vst.msk [vmem:[#allocation2 + $0x40] sm:$0xf] %vm321_vm0, %v4400_v0 }
  0x37   : > { %341 = vst.msk [vmem:[#allocation2 + $0x48] sm:$0xf] %vm321_vm0, %v4400_v0 }
  0x38   : > { %343 = vst.msk [vmem:[#allocation2 + $0x50] sm:$0xf] %vm321_vm0, %v4400_v0 }
  0x39   : > { %345 = vst.msk [vmem:[#allocation2 + $0x58] sm:$0xf] %vm321_vm0, %v4400_v0 }
  0x3a   : > { %347 = vst.msk [vmem:[#allocation2 + $0x60] sm:$0xf] %vm321_vm0, %v4400_v0 }
  0x3b   : > { %349 = vst.msk [vmem:[#allocation2 + $0x68] sm:$0xf] %vm321_vm0, %v4400_v0 }
  0x3c   : > { %351 = vst.msk [vmem:[#allocation2 + $0x70] sm:$0xf] %vm321_vm0, %v4400_v0 }
  0x3d   : > { %353 = vst.msk [vmem:[#allocation2 + $0x78] sm:$0xf] %vm321_vm0, %v4400_v0 }
  0x3e   : > { %324 = vst.msk [vmem:[#allocation2 + $0x4] sm:$0x1] %vm323_vm1, %v4400_v0 }
  0x3f   : > { %326 = vst.msk [vmem:[#allocation2 + $0xc] sm:$0x1] %vm323_vm1, %v4400_v0 }
  0x40   : > { %328 = vst.msk [vmem:[#allocation2 + $0x14] sm:$0x1] %vm323_vm1, %v4400_v0 }
  0x41   : > { %330 = vst.msk [vmem:[#allocation2 + $0x1c] sm:$0x1] %vm323_vm1, %v4400_v0 }
  0x42   : > { %332 = vst.msk [vmem:[#allocation2 + $0x24] sm:$0x1] %vm323_vm1, %v4400_v0 }
  0x43   : > { %334 = vst.msk [vmem:[#allocation2 + $0x2c] sm:$0x1] %vm323_vm1, %v4400_v0 }
  0x44   : > { %336 = vst.msk [vmem:[#allocation2 + $0x34] sm:$0x1] %vm323_vm1, %v4400_v0 }
  0x45   : > { %338 = vst.msk [vmem:[#allocation2 + $0x3c] sm:$0x1] %vm323_vm1, %v4400_v0 }
  0x46   : > { %340 = vst.msk [vmem:[#allocation2 + $0x44] sm:$0x1] %vm323_vm1, %v4400_v0 }
  0x47   : > { %342 = vst.msk [vmem:[#allocation2 + $0x4c] sm:$0x1] %vm323_vm1, %v4400_v0 }
  0x48   : > { %344 = vst.msk [vmem:[#allocation2 + $0x54] sm:$0x1] %vm323_vm1, %v4400_v0 }
  0x49   : > { %346 = vst.msk [vmem:[#allocation2 + $0x5c] sm:$0x1] %vm323_vm1, %v4400_v0 }
  0x4a   : > { %348 = vst.msk [vmem:[#allocation2 + $0x64] sm:$0x1] %vm323_vm1, %v4400_v0 }
  0x4b   : > { %350 = vst.msk [vmem:[#allocation2 + $0x6c] sm:$0x1] %vm323_vm1, %v4400_v0 }
  0x4c   : > { %352 = vst.msk [vmem:[#allocation2 + $0x74] sm:$0x1] %vm323_vm1, %v4400_v0 }
  0x4d   : > { %354 = vst.msk [vmem:[#allocation2 + $0x7c] sm:$0x1] %vm323_vm1, %v4400_v0 }
  0x4e   : > { %356 = vst.msk [vmem:[#allocation2] sm:$0xf] %vm355_vm2, %v4400_v0 }
  0x4f   : > { %359 = vst.msk [vmem:[#allocation2 + $0x8] sm:$0xf] %vm355_vm2, %v4400_v0 }
  0x50   : > { %361 = vst.msk [vmem:[#allocation2 + $0x10] sm:$0xf] %vm355_vm2, %v4400_v0 }
  0x51   : > { %363 = vst.msk [vmem:[#allocation2 + $0x18] sm:$0xf] %vm355_vm2, %v4400_v0 }
  0x52   : > { %365 = vst.msk [vmem:[#allocation2 + $0x20] sm:$0xf] %vm355_vm2, %v4400_v0 }
  0x53   : > { %367 = vst.msk [vmem:[#allocation2 + $0x28] sm:$0xf] %vm355_vm2, %v4400_v0 }
  0x54   : > { %369 = vst.msk [vmem:[#allocation2 + $0x30] sm:$0xf] %vm355_vm2, %v4400_v0 }
  0x55   : > { %371 = vst.msk [vmem:[#allocation2 + $0x38] sm:$0xf] %vm355_vm2, %v4400_v0 }
  0x56   : > { %373 = vst.msk [vmem:[#allocation2 + $0x40] sm:$0xf] %vm355_vm2, %v4400_v0 }
  0x57   : > { %375 = vst.msk [vmem:[#allocation2 + $0x48] sm:$0xf] %vm355_vm2, %v4400_v0 }
  0x58   : > { %377 = vst.msk [vmem:[#allocation2 + $0x50] sm:$0xf] %vm355_vm2, %v4400_v0 }
  0x59   : > { %379 = vst.msk [vmem:[#allocation2 + $0x58] sm:$0xf] %vm355_vm2, %v4400_v0 }
  0x5a   : > { %381 = vst.msk [vmem:[#allocation2 + $0x60] sm:$0xf] %vm355_vm2, %v4400_v0 }
  0x5b   : > { %383 = vst.msk [vmem:[#allocation2 + $0x68] sm:$0xf] %vm355_vm2, %v4400_v0 }
  0x5c   : > { %385 = vst.msk [vmem:[#allocation2 + $0x70] sm:$0xf] %vm355_vm2, %v4400_v0 }
  0x5d   : > { %387 = vst.msk [vmem:[#allocation2 + $0x78] sm:$0xf] %vm355_vm2, %v4400_v0 }
  0x5e   : > { %358 = vst.msk [vmem:[#allocation2 + $0x4] sm:$0x1] %vm357_vm3, %v4400_v0 }
  0x5f   : > { %360 = vst.msk [vmem:[#allocation2 + $0xc] sm:$0x1] %vm357_vm3, %v4400_v0 }
  0x60   : > { %362 = vst.msk [vmem:[#allocation2 + $0x14] sm:$0x1] %vm357_vm3, %v4400_v0 }
  0x61   : > { %364 = vst.msk [vmem:[#allocation2 + $0x1c] sm:$0x1] %vm357_vm3, %v4400_v0 }
  0x62   : > { %366 = vst.msk [vmem:[#allocation2 + $0x24] sm:$0x1] %vm357_vm3, %v4400_v0 }
  0x63   : > { %368 = vst.msk [vmem:[#allocation2 + $0x2c] sm:$0x1] %vm357_vm3, %v4400_v0 }
  0x64   : > { %370 = vst.msk [vmem:[#allocation2 + $0x34] sm:$0x1] %vm357_vm3, %v4400_v0 }
  0x65   : > { %372 = vst.msk [vmem:[#allocation2 + $0x3c] sm:$0x1] %vm357_vm3, %v4400_v0 }
  0x66   : > { %374 = vst.msk [vmem:[#allocation2 + $0x44] sm:$0x1] %vm357_vm3, %v4400_v0 }
  0x67   : > { %376 = vst.msk [vmem:[#allocation2 + $0x4c] sm:$0x1] %vm357_vm3, %v4400_v0 }
  0x68   : > { %378 = vst.msk [vmem:[#allocation2 + $0x54] sm:$0x1] %vm357_vm3, %v4400_v0 }
  0x69   : > { %380 = vst.msk [vmem:[#allocation2 + $0x5c] sm:$0x1] %vm357_vm3, %v4400_v0 }
  0x6a   : > { %382 = vst.msk [vmem:[#allocation2 + $0x64] sm:$0x1] %vm357_vm3, %v4400_v0 }
  0x6b   : > { %384 = vst.msk [vmem:[#allocation2 + $0x6c] sm:$0x1] %vm357_vm3, %v4400_v0 }
  0x6c   : > { %386 = vst.msk [vmem:[#allocation2 + $0x74] sm:$0x1] %vm357_vm3, %v4400_v0 }
  0x6d   : > { %388 = vst.msk [vmem:[#allocation2 + $0x7c] sm:$0x1] %vm357_vm3, %v4400_v0 }
  0x6e PF: > { %s4697_s18 = smov 0  }
  0x6f LB: >> { %s441_s17 = sadd.s32 64, %s4396_s18  ;;  %s426_s16 = sadd.s32 48, %s4396_s18  ;;  %vm781_vm4 = vcmask 134152   ;;  %vm783_vm5 = vcmask 131080   ;;  %s4396_s18 = sphi %s4697_s18, %s394_s18  }
  0x70   : >> { %s442_s9 = sld [smem:[#allocation4 + %s441_s17]]  ;;  %s6913_s13 = sshll.u32 %s4376_s27, 3 }
  0x71   : >> { %s4707_s19 = scalar_lea.vmem %s4560_s23, %s6913_s13  ;;  %s427_s20 = sld [smem:[#allocation4 + %s426_s16]] }
  0x72   : >> { %v4710_v1 = vld [vmem:[%s4707_s19 + $0x18] sm:$0xff]  ;;  %s456_s21 = sadd.s32 80, %s4396_s18  ;;  %v4714_v3 = vld [vmem:[%s4707_s19] sm:$0xff]  ;;  %s471_s17 = sadd.s32 96, %s4396_s18  ;;  %v4725_v8 = vld [vmem:[%s4707_s19 + $0x8] sm:$0x3] }
  0x73   : >> { %s457_s12 = sld [smem:[#allocation4 + %s456_s21]]  ;;  %s6871_s13 = smov 127   ;;  %v4721_v7 = vld [vmem:[%s4707_s19 + $0x20] sm:$0x3]  ;;  %v4729_v10 = vld [vmem:[%s4707_s19 + $0x30] sm:$0xff]  ;;  %v4810_v50 = vld [vmem:[%s4707_s19 + $0x2] sm:$0xff] }
  0x74   : >> { %s472_s16 = sld [smem:[#allocation4 + %s471_s17]]  ;;  %v4738_v14 = vld [vmem:[%s4707_s19 + $0x38] sm:$0x3]  ;;  %s6873_s0 = smov 126   ;;  %v4756_v24 = vld [vmem:[%s4707_s19 + $0x9] sm:$0x3] }
  0x75   : >> { %v4760_v26 = vld [vmem:[%s4707_s19 + $0x1] sm:$0xff]  ;;  %v4769_v30 = vld [vmem:[%s4707_s19 + $0x19] sm:$0xff]  ;;  %v4772_v31 = vld [vmem:[%s4707_s19 + $0x31] sm:$0xff]  ;;  %s4829_s1 = sld [smem:[#allocation4 + %s4396_s18]] }
  0x76   : >> { %v443_v2 = vstv %s442_s9  ;;  %s501_s9 = sadd.s32 128, %s4396_s18  ;;  %v4776_v34 = vld [vmem:[%s4707_s19 + $0x21] sm:$0x3]  ;;  %v4786_v38 = vld [vmem:[%s4707_s19 + $0x39] sm:$0x3] }
  0x77   : >> { %v444_v4 = vmul.f32 %v4710_v1, %v443_v2  ;;  %v428_v5 = vstv %s427_s20  ;;  %v445_v9 = vmul.f32 %v4721_v7, %v443_v2  ;;  %s486_s20 = sadd.s32 112, %s4396_s18  ;;  %s502_s21 = sld [smem:[#allocation4 + %s501_s9]]  ;;  %v4804_v48 = vld [vmem:[%s4707_s19 + $0xa] sm:$0x3]  ;;  %v4822_v54 = vld [vmem:[%s4707_s19 + $0x1a] sm:$0xff]  ;;  %v4825_v55 = vld [vmem:[%s4707_s19 + $0x32] sm:$0xff] }
  0x78   : >> { %v429_v6 = vmul.f32 %v428_v5, %v4714_v3  ;;  %v430_v13 = vmul.f32 %v428_v5, %v4725_v8  ;;  %s487_s17 = sld [smem:[#allocation4 + %s486_s20]]  ;;  %s579_s9 = sadd.s32 224, %s4396_s18  ;;  %v4833_v58 = vld [vmem:[%s4707_s19 + $0x22] sm:$0x3]  ;;  %v4843_v62 = vld [vmem:[%s4707_s19 + $0x3a] sm:$0x3] }
  0x79   : >> { %448 = vrot.lane.b32.xlu1 %v444_v4, %s6871_s13  ;;  %v458_v11 = vstv %s457_s12  ;;  %s549_s12 = sadd.s32 192, %s4396_s18  ;;  %s564_s20 = sadd.s32 208, %s4396_s18 }
  0x7a   : >> { %433 = vrot.lane.b32.xlu0 %v429_v6, %s6871_s13  ;;  %v459_v12 = vmul.f32 %v4729_v10, %v458_v11  ;;  %v473_v15 = vstv %s472_s16  ;;  %v460_v16 = vmul.f32 %v4738_v14, %v458_v11  ;;  %s550_s16 = sld [smem:[#allocation4 + %s549_s12]]  ;;  %s594_s12 = sadd.s32 240, %s4396_s18 }
  0x7b   : >> { %v475_v17 = vmul.f32 %v473_v15, %v4725_v8  ;;  %v474_v18 = vmul.f32 %v473_v15, %v4714_v3  ;;  %v399_v2 = vstv %s4829_s1  ;;  %s6915_s19 = smov 126  }
  0x7c   : >> { %463 = vrot.lane.b32.xlu2 %v459_v12, %s6871_s13 }
  0x7d   : >> { %v503_v19 = vstv %s502_s21  ;;  %s580_s21 = sld [smem:[#allocation4 + %s579_s9]]  ;;  %s624_s9 = sadd.s32 272, %s4396_s18 }
  0x7e   : >> { %v488_v20 = vstv %s487_s17  ;;  %v504_v22 = vmul.f32 %v4729_v10, %v503_v19  ;;  %s565_s17 = sld [smem:[#allocation4 + %s564_s20]]  ;;  %v505_v27 = vmul.f32 %v4738_v14, %v503_v19  ;;  %s609_s20 = sadd.s32 256, %s4396_s18 }
  0x7f   : >> { %v489_v21 = vmul.f32 %v4710_v1, %v488_v20  ;;  %v490_v23 = vmul.f32 %v4721_v7, %v488_v20 }
  0x80   : >> { %v551_v25 = vstv %s550_s16  ;;  %s595_s16 = sld [smem:[#allocation4 + %s594_s12]]  ;;  %s672_s12 = sadd.s32 336, %s4396_s18 }
  0x81   : >> { %450 = vrot.lane.b32.xlu1 %v445_v9, %s6871_s13  ;;  %v553_v28 = vmul.f32 %v4756_v24, %v551_v25  ;;  %v552_v29 = vmul.f32 %v4760_v26, %v551_v25  ;;  %v400_v9 = vmul.f32 %v399_v2, %v4714_v3 }
  0x82   : >> { %435 = vrot.lane.b32.xlu0 %v430_v13, %s6871_s13 }
  0x83   : >> { %v581_v32 = vstv %s580_s21  ;;  %s625_s21 = sld [smem:[#allocation4 + %s624_s9]]  ;;  %s702_s9 = sadd.s32 368, %s4396_s18 }
  0x84   : >> { %465 = vrot.lane.b32.xlu2 %v460_v16, %s6871_s13  ;;  %v566_v33 = vstv %s565_s17  ;;  %v582_v36 = vmul.f32 %v4772_v31, %v581_v32  ;;  %s610_s17 = sld [smem:[#allocation4 + %s609_s20]]  ;;  %v583_v40 = vmul.f32 %v4786_v38, %v581_v32  ;;  %s687_s20 = sadd.s32 352, %s4396_s18 }
  0x85   : >> { %v567_v35 = vmul.f32 %v4769_v30, %v566_v33  ;;  %v568_v37 = vmul.f32 %v4776_v34, %v566_v33 }
  0x86   : >> { %v596_v39 = vstv %s595_s16  ;;  %s673_s16 = sld [smem:[#allocation4 + %s672_s12]]  ;;  %s404_s12 = sadd.s32 16, %s4396_s18 }
  0x87   : >> { %v598_v41 = vmul.f32 %v4756_v24, %v596_v39  ;;  %v597_v42 = vmul.f32 %v4760_v26, %v596_v39 }
  0x89   : >> { %480 = vrot.lane.b32.xlu1 %v475_v17, %s6873_s0  ;;  %v626_v43 = vstv %s625_s21  ;;  %s4806_s21 = sld [smem:[#allocation4 + %s702_s9]]  ;;  %s6914_s9 = smov 127  }
  0x8a   : >> { %478 = vrot.lane.b32.xlu0 %v474_v18, %s6873_s0  ;;  %v611_v44 = vstv %s610_s17  ;;  %v627_v46 = vmul.f32 %v4772_v31, %v626_v43  ;;  %s688_s17 = sld [smem:[#allocation4 + %s687_s20]]  ;;  %v628_v51 = vmul.f32 %v4786_v38, %v626_v43 }
  0x8b   : >> { %v612_v45 = vmul.f32 %v4769_v30, %v611_v44  ;;  %v613_v47 = vmul.f32 %v4776_v34, %v611_v44 }
  0x8c   : >> { %493 = vrot.lane.b32.xlu2 %v489_v21, %s6873_s0  ;;  %v674_v49 = vstv %s673_s16  ;;  %s4818_s16 = sld [smem:[#allocation4 + %s404_s12]]  ;;  %s747_s12 = sadd.s32 416, %s4396_s18 }
  0x8d   : >> { %v676_v52 = vmul.f32 %v4804_v48, %v674_v49  ;;  %v675_v53 = vmul.f32 %v4810_v50, %v674_v49 }
  0x8f   : >> { %v704_v56 = vstv %s4806_s21 }
  0x90   : >> { %v689_v57 = vstv %s688_s17  ;;  %v705_v60 = vmul.f32 %v4825_v55, %v704_v56  ;;  %v706_v4 = vmul.f32 %v4843_v62, %v704_v56  ;;  %s516_s17 = sadd.s32 144, %s4396_s18 }
  0x91   : >> { %508 = vrot.lane.b32.xlu1 %v504_v22, %s6873_s0  ;;  %v690_v59 = vmul.f32 %v4822_v54, %v689_v57  ;;  %v691_v61 = vmul.f32 %v4833_v58, %v689_v57 }
  0x92   : >> { %495 = vrot.lane.b32.xlu0 %v490_v23, %s6873_s0  ;;  %v410_v0 = vstv %s4818_s16  ;;  %s517_s16 = sld [smem:[#allocation4 + %s516_s17]]  ;;  %s661_s17 = sadd.s32 320, %s4396_s18 }
  0x93   : >> { %v411_v6 = vmul.f32 %v4710_v1, %v410_v0 }
  0x94   : >> { %510 = vrot.lane.b32.xlu2 %v505_v27, %s6873_s0  ;;  %v401_v27 = vmul.f32 %v399_v2, %v4725_v8 }
  0x95   : >> { %v413_v13 = vadd.f32 %v411_v6, %v400_v9 }
  0x99   : >> { %558 = vrot.lane.b32.xlu1 %v553_v28, %s6871_s13  ;;  %v412_v28 = vmul.f32 %v4721_v7, %v410_v0 }
  0x9a   : >> { %556 = vrot.lane.b32.xlu0 %v552_v29, %s6871_s13 }
  0x9c   : >> { %571 = vrot.lane.b32.xlu2 %v567_v35, %s6871_s13 }
  0xa1   : >> { %586 = vrot.lane.b32.xlu1 %v582_v36, %s6871_s13  ;;  %v414_v36 = vadd.f32 %v412_v28, %v401_v27 }
  0xa2   : >> { %573 = vrot.lane.b32.xlu0 %v568_v37, %s6871_s13 }
  0xa4   : >> { %588 = vrot.lane.b32.xlu2 %v583_v40, %s6871_s13  ;;  %s717_s13 = sadd.s32 384, %s4396_s18 }
  0xa5   : >> { %s718_s20 = sld [smem:[#allocation4 + %s717_s13]] }
  0xa6   : >> { %s748_s13 = sld [smem:[#allocation4 + %s747_s12]]  ;;  %s538_s12 = sadd.s32 176, %s4396_s18 }
  0xa9   : >> { %603 = vrot.lane.b32.xlu1 %v598_v41, %s6873_s0 }
  0xaa   : >> { %601 = vrot.lane.b32.xlu0 %v597_v42, %s6873_s0 }
  0xab   : >> { %v719_v63 = vstv %s718_s20 }
  0xac   : >> { %616 = vrot.lane.b32.xlu2 %v612_v45, %s6873_s0  ;;  %v721_v5 = vmul.f32 %v4804_v48, %v719_v63  ;;  %v720_v11 = vmul.f32 %v4810_v50, %v719_v63  ;;  %v749_v12 = vstv %s748_s13  ;;  %s539_s13 = sld [smem:[#allocation4 + %s538_s12]]  ;;  %s4104_s12 = sshll.u32 %s4396_s18, 3 }
  0xad   : >> { %v750_v17 = vmul.f32 %v4825_v55, %v749_v12  ;;  %v751_v3 = vmul.f32 %v4843_v62, %v749_v12 }
  0xb1   : >> { %631 = vrot.lane.b32.xlu1 %v627_v46, %s6873_s0 }
  0xb2   : >> { %618 = vrot.lane.b32.xlu0 %v613_v47, %s6873_s0  ;;  %v522_v47 = vstv %s517_s16  ;;  %v544_v2 = vstv %s539_s13  ;;  %s662_s16 = sld [smem:[#allocation4 + %s661_s17]]  ;;  %s780_s13 = scalar_lea.vmem [#allocation2], %s4104_s12 }
  0xb3   : >> { %v545_v9 = vmul.f32 %v4772_v31, %v544_v2 }
  0xb4   : >> { %633 = vrot.lane.b32.xlu2 %v628_v51, %s6873_s0  ;;  %s732_s0 = sadd.s32 400, %s4396_s18 }
  0xb5   : >> { %s733_s21 = sld [smem:[#allocation4 + %s732_s0]]  ;;  %s415_s0 = sadd.s32 32, %s4396_s18 }
  0xb6   : >> { %s416_s1 = sld [smem:[#allocation4 + %s415_s0]]  ;;  %s650_s0 = sadd.s32 304, %s4396_s18 }
  0xb9   : >> { %681 = vrot.lane.b32.xlu1 %v676_v52, %s6914_s9 }
  0xba   : >> { %679 = vrot.lane.b32.xlu0 %v675_v53, %s6914_s9  ;;  %v523_v53 = vmul.f32 %v4760_v26, %v522_v47 }
  0xbb   : >> { %v734_v15 = vstv %s733_s21  ;;  %s639_s21 = sadd.s32 288, %s4396_s18 }
  0xbc   : >> { %694 = vrot.lane.b32.xlu2 %v690_v59, %s6914_s9  ;;  %v735_v16 = vmul.f32 %v4822_v54, %v734_v15  ;;  %v736_v1 = vmul.f32 %v4833_v58, %v734_v15  ;;  %v421_v23 = vstv %s416_s1  ;;  %s651_s1 = sld [smem:[#allocation4 + %s650_s0]] }
  0xbd   : >> { %v422_v25 = vmul.f32 %v4729_v10, %v421_v23  ;;  %v423_v37 = vmul.f32 %v4738_v14, %v421_v23 }
  0xbf   : >> { %v424_v32 = vadd.f32 %v422_v25, %v413_v13  ;;  %v425_v40 = vadd.f32 %v423_v37, %v414_v36 }
  0xc1   : >> { %709 = vrot.lane.b32.xlu1 %v705_v60, %s6914_s9 }
  0xc2   : >> { %696 = vrot.lane.b32.xlu0 %v691_v61, %s6914_s9  ;;  %v656_v36 = vstv %s651_s1 }
  0xc4   : >> { %711 = vrot.lane.b32.xlu2 %v706_v4, %s6914_s9  ;;  %s527_s9 = sadd.s32 160, %s4396_s18 }
  0xc5   : >> { %s528_s20 = sld [smem:[#allocation4 + %s527_s9]] }
  0xc6   : >> { %s762_s9 = sld [smem:[#allocation7 + %s4396_s18]]  ;;  %s394_s18 = sadd.s32 1, %s4396_s18  }
  0xc7   : >> { %p391_p4 = scmp.ge.s32.totalorder %s394_s18, 16  }
  0xc9   : >> { %726 = vrot.lane.b32.xlu1 %v721_v5, %s6915_s19  ;;  %v524_v5 = vmul.f32 %v4756_v24, %v522_v47 }
  0xca   : >> { %724 = vrot.lane.b32.xlu0 %v720_v11, %s6915_s19 }
  0xcb   : >> { %v533_v57 = vstv %s528_s20  ;;  %s4403_s20 = smov 1  }
  0xcc   : >> { %739 = vrot.lane.b32.xlu2 %v735_v16, %s6915_s19  ;;  %v534_v0 = vmul.f32 %v4769_v30, %v533_v57  ;;  %v535_v26 = vmul.f32 %v4776_v34, %v533_v57 }
  0xd1   : >> { %754 = vrot.lane.b32.xlu1 %v750_v17, %s6915_s19 }
  0xd2   : >> { %741 = vrot.lane.b32.xlu0 %v736_v1, %s6915_s19  ;;  %v546_v1 = vmul.f32 %v4786_v38, %v544_v2 }
  0xd4   : >> { %756 = vrot.lane.b32.xlu2 %v751_v3, %s6915_s19  ;;  %s640_s19 = sld [smem:[#allocation4 + %s639_s21]] }
  0xd6   : >> { %v464_v18 = vpop.permute.xlu2 %463 }
  0xda   : >> { %v645_v25 = vstv %s640_s19 }
  0xde   : >> { %v466_v19 = vpop.permute.xlu2 %465 }
  0xe6   : >> { %v494_v21 = vpop.permute.xlu2 %493 }
  0xeb   : >> { %v449_v20 = vpop.permute.xlu1 %448 }
  0xec   : >> { %v434_v22 = vpop.permute.xlu0 %433 }
  0xed   : >> { %v439_v39 = vadd.f32 %v434_v22, %v424_v32 }
  0xee   : >> { %v511_v35 = vpop.permute.xlu2 %510 }
  0xef   : >> { %v454_v42 = vadd.f32 %v449_v20, %v439_v39 }
  0xf1   : >> { %v469_v44 = vadd.f32 %v464_v18, %v454_v42  ;;  %v667_v42 = vstv %s662_s16 }
  0xf3   : >> { %v451_v29 = vpop.permute.xlu1 %450 }
  0xf4   : >> { %v436_v33 = vpop.permute.xlu0 %435 }
  0xf5   : >> { %v440_v10 = vadd.f32 %v436_v33, %v425_v40  ;;  %v646_v33 = vmul.f32 %v4810_v50, %v645_v25  ;;  %v658_v50 = vmul.f32 %v4833_v58, %v656_v36 }
  0xf6   : >> { %v572_v8 = vpop.permute.xlu2 %571 }
  0xf7   : >> { %v455_v7 = vadd.f32 %v451_v29, %v440_v10  ;;  %v647_v10 = vmul.f32 %v4804_v48, %v645_v25 }
  0xf9   : >> { %v470_v14 = vadd.f32 %v466_v19, %v455_v7  ;;  %v668_v7 = vmul.f32 %v4825_v55, %v667_v42 }
  0xfb   : >> { %v481_v41 = vpop.permute.xlu1 %480 }
  0xfc   : >> { %v479_v43 = vpop.permute.xlu0 %478  ;;  %v485_v52 = vadd.f32 %v481_v41, %v470_v14  ;;  %v657_v41 = vmul.f32 %v4822_v54, %v656_v36 }
  0xfd   : >> { %v484_v45 = vadd.f32 %v479_v43, %v469_v44 }
  0xfe   : >> { %v589_v59 = vpop.permute.xlu2 %588 }
  0xff   : >> { %v499_v51 = vadd.f32 %v494_v21, %v484_v45 }
 0x103   : >> { %v509_v46 = vpop.permute.xlu1 %508 }
 0x104   : >> { %v496_v49 = vpop.permute.xlu0 %495  ;;  %v514_v56 = vadd.f32 %v509_v46, %v499_v51  ;;  %v669_v51 = vmul.f32 %v4843_v62, %v667_v42 }
 0x105   : >> { %v500_v60 = vadd.f32 %v496_v49, %v485_v52 }
 0x106   : >> { %v525_v63 = vadd.f32 %v523_v53, %v514_v56  ;;  %v617_v15 = vpop.permute.xlu2 %616 }
 0x107   : >> { %v515_v6 = vadd.f32 %v511_v35, %v500_v60 }
 0x108   : >> { %v536_v11 = vadd.f32 %v534_v0, %v525_v63 }
 0x109   : >> { %v526_v12 = vadd.f32 %v524_v5, %v515_v6 }
 0x10a   : >> { %v547_v16 = vadd.f32 %v545_v9, %v536_v11 }
 0x10b   : >> { %v559_v61 = vpop.permute.xlu1 %558  ;;  %v537_v30 = vadd.f32 %v535_v26, %v526_v12 }
 0x10c   : >> { %v557_v4 = vpop.permute.xlu0 %556 }
 0x10d   : >> { %v562_v3 = vadd.f32 %v557_v4, %v547_v16  ;;  %v548_v18 = vadd.f32 %v546_v1, %v537_v30  ;;  %v763_v4 = vstv %s762_s9 }
 0x10e   : >> { %v634_v20 = vpop.permute.xlu2 %633 }
 0x10f   : >> { %v577_v19 = vadd.f32 %v572_v8, %v562_v3  ;;  %v563_v21 = vadd.f32 %v559_v61, %v548_v18 }
 0x113   : >> { %v587_v13 = vpop.permute.xlu1 %586 }
 0x114   : >> { %v574_v17 = vpop.permute.xlu0 %573  ;;  %v592_v22 = vadd.f32 %v587_v13, %v577_v19 }
 0x115   : >> { %v578_v34 = vadd.f32 %v574_v17, %v563_v21 }
 0x116   : >> { %v695_v37 = vpop.permute.xlu2 %694 }
 0x117   : >> { %v593_v38 = vadd.f32 %v589_v59, %v578_v34 }
 0x11b   : >> { %v604_v24 = vpop.permute.xlu1 %603 }
 0x11c   : >> { %v602_v31 = vpop.permute.xlu0 %601  ;;  %v608_v32 = vadd.f32 %v604_v24, %v593_v38 }
 0x11d   : >> { %v607_v23 = vadd.f32 %v602_v31, %v592_v22 }
 0x11e   : >> { %v712_v47 = vpop.permute.xlu2 %711 }
 0x11f   : >> { %v622_v28 = vadd.f32 %v617_v15, %v607_v23 }
 0x123   : >> { %v632_v27 = vpop.permute.xlu1 %631 }
 0x124   : >> { %v619_v29 = vpop.permute.xlu0 %618  ;;  %v637_v35 = vadd.f32 %v632_v27, %v622_v28 }
 0x125   : >> { %v623_v39 = vadd.f32 %v619_v29, %v608_v32 }
 0x126   : >> { %v648_v40 = vadd.f32 %v646_v33, %v637_v35  ;;  %v740_v59 = vpop.permute.xlu2 %739 }
 0x127   : >> { %v638_v8 = vadd.f32 %v634_v20, %v623_v39 }
 0x128   : >> { %v659_v45 = vadd.f32 %v657_v41, %v648_v40 }
 0x129   : >> { %v649_v46 = vadd.f32 %v647_v10, %v638_v8 }
 0x12a   : >> { %v670_v49 = vadd.f32 %v668_v7, %v659_v45 }
 0x12b   : >> { %v682_v43 = vpop.permute.xlu1 %681  ;;  %v660_v52 = vadd.f32 %v658_v50, %v649_v46 }
 0x12c   : >> { %v680_v44 = vpop.permute.xlu0 %679 }
 0x12d   : >> { %v685_v53 = vadd.f32 %v680_v44, %v670_v49  ;;  %v671_v56 = vadd.f32 %v669_v51, %v660_v52 }
 0x12e   : >> { %v757_v11 = vpop.permute.xlu2 %756 }
 0x12f   : >> { %v700_v57 = vadd.f32 %v695_v37, %v685_v53  ;;  %v686_v60 = vadd.f32 %v682_v43, %v671_v56 }
 0x133   : >> { %v710_v14 = vpop.permute.xlu1 %709 }
 0x134   : >> { %v697_v54 = vpop.permute.xlu0 %696  ;;  %v715_v61 = vadd.f32 %v710_v14, %v700_v57 }
 0x135   : >> { %v701_v63 = vadd.f32 %v697_v54, %v686_v60 }
 0x137   : >> { %v716_v2 = vadd.f32 %v712_v47, %v701_v63 }
 0x13b   : >> { %v727_v48 = vpop.permute.xlu1 %726 }
 0x13c   : >> { %v725_v55 = vpop.permute.xlu0 %724  ;;  %v731_v6 = vadd.f32 %v727_v48, %v716_v2 }
 0x13d   : >> { %v730_v0 = vadd.f32 %v725_v55, %v715_v61 }
 0x13f   : >> { %v745_v58 = vadd.f32 %v740_v59, %v730_v0 }
 0x143   : >> { %v755_v5 = vpop.permute.xlu1 %754 }
 0x144   : >> { %v760_v62 = vadd.f32 %v755_v5, %v745_v58  ;;  %v742_v9 = vpop.permute.xlu0 %741 }
 0x145   : >> { %v746_v26 = vadd.f32 %v742_v9, %v731_v6 }
 0x146   : >> { %v764_v12 = vadd.f32 %v763_v4, %v760_v62 }
 0x147   : >> { %v761_v15 = vadd.f32 %v757_v11, %v746_v26 }
 0x148   : >> { %v766_v13 = vmax.f32 %v764_v12, 0.0 }
 0x149   : >> { %v765_v17 = vadd.f32 %v763_v4, %v761_v15 }
 0x14a   : >> { %v768_v16 = vpack.c.bf16 %v766_v13, %v766_v13 }
 0x14b   : >> { %v767_v1 = vmax.f32 %v765_v17, 0.0 }
 0x14c   : >> { %772 = vrot.lane.b32.xlu0 %v768_v16, %s4403_s20 }
 0x14d   : >> { %v769_v30 = vpack.c.bf16 %v767_v1, %v767_v1 }
 0x14f   : >> { %774 = vrot.lane.b32.xlu1 %v769_v30, %s4403_s20 }
 0x1be   : >> { %v773_v3 = vpop.permute.xlu0 %772  ;;  %393 = sbr.rel (!%p391_p4) target bundleno = 111 (0x6f), region = 129 }
 0x1bf   : >> { %782 = vst.msk [vmem:[%s780_s13] sm:$0xf] %vm781_vm4, %v773_v3 }
 0x1c1   : >> { %v775_v18 = vpop.permute.xlu1 %774 }
 0x1c2   : >> { %784 = vst.msk [vmem:[%s780_s13 + $0x4] sm:$0x1] %vm783_vm5, %v775_v18 }
 0x1c3   : > { %787 = sbr.rel (%p4010_p2) target bundleno = 475 (0x1db), region = 71 }
 0x1c8   : > { %vm788_vm6 = vcmask 139264   ;;  %vm789_vm7 = vsmask.f32 256 }
 0x1c9   : > { %v791_v24 = vld [vmem:[#allocation2] sm:$0x1]  ;;  %vm4894_vm8 = vmand %vm788_vm6, %vm789_vm7  ;;  %v794_v31 = vld [vmem:[#allocation2 + $0x8] sm:$0x1] }
 0x1ca   : > { %v797_v20 = vld [vmem:[#allocation2 + $0x10] sm:$0x1]  ;;  %v792_v21 = vsel %vm4894_vm8, 0, %v791_v24  ;;  %v795_v22 = vsel %vm4894_vm8, 0, %v794_v31  ;;  %v800_v23 = vld [vmem:[#allocation2 + $0x18] sm:$0x1] }
 0x1cb   : > { %v798_v34 = vsel %vm4894_vm8, 0, %v797_v20  ;;  %793 = vst [vmem:[#allocation2] sm:$0x1] %v792_v21  ;;  %v801_v25 = vsel %vm4894_vm8, 0, %v800_v23  ;;  %v803_v27 = vld [vmem:[#allocation2 + $0x20] sm:$0x1] }
 0x1cc   : > { %796 = vst [vmem:[#allocation2 + $0x8] sm:$0x1] %v795_v22  ;;  %v804_v38 = vsel %vm4894_vm8, 0, %v803_v27  ;;  %v806_v28 = vld [vmem:[#allocation2 + $0x28] sm:$0x1] }
 0x1cd   : > { %799 = vst [vmem:[#allocation2 + $0x10] sm:$0x1] %v798_v34  ;;  %v807_v29 = vsel %vm4894_vm8, 0, %v806_v28  ;;  %v809_v32 = vld [vmem:[#allocation2 + $0x30] sm:$0x1] }
 0x1ce   : > { %802 = vst [vmem:[#allocation2 + $0x18] sm:$0x1] %v801_v25  ;;  %v810_v33 = vsel %vm4894_vm8, 0, %v809_v32  ;;  %v812_v35 = vld [vmem:[#allocation2 + $0x38] sm:$0x1] }
 0x1cf   : > { %805 = vst [vmem:[#allocation2 + $0x20] sm:$0x1] %v804_v38  ;;  %v813_v36 = vsel %vm4894_vm8, 0, %v812_v35  ;;  %v815_v37 = vld [vmem:[#allocation2 + $0x40] sm:$0x1] }
 0x1d0   : > { %808 = vst [vmem:[#allocation2 + $0x28] sm:$0x1] %v807_v29  ;;  %v816_v39 = vsel %vm4894_vm8, 0, %v815_v37  ;;  %v818_v40 = vld [vmem:[#allocation2 + $0x48] sm:$0x1] }
 0x1d1   : > { %811 = vst [vmem:[#allocation2 + $0x30] sm:$0x1] %v810_v33  ;;  %v819_v41 = vsel %vm4894_vm8, 0, %v818_v40  ;;  %v821_v42 = vld [vmem:[#allocation2 + $0x50] sm:$0x1] }
 0x1d2   : > { %814 = vst [vmem:[#allocation2 + $0x38] sm:$0x1] %v813_v36  ;;  %v822_v43 = vsel %vm4894_vm8, 0, %v821_v42  ;;  %v824_v10 = vld [vmem:[#allocation2 + $0x58] sm:$0x1] }
 0x1d3   : > { %817 = vst [vmem:[#allocation2 + $0x40] sm:$0x1] %v816_v39  ;;  %v825_v8 = vsel %vm4894_vm8, 0, %v824_v10  ;;  %v827_v44 = vld [vmem:[#allocation2 + $0x60] sm:$0x1] }
 0x1d4   : > { %820 = vst [vmem:[#allocation2 + $0x48] sm:$0x1] %v819_v41  ;;  %v828_v7 = vsel %vm4894_vm8, 0, %v827_v44  ;;  %v830_v45 = vld [vmem:[#allocation2 + $0x68] sm:$0x1] }
 0x1d5   : > { %823 = vst [vmem:[#allocation2 + $0x50] sm:$0x1] %v822_v43  ;;  %v831_v46 = vsel %vm4894_vm8, 0, %v830_v45  ;;  %v833_v50 = vld [vmem:[#allocation2 + $0x70] sm:$0x1] }
 0x1d6   : > { %826 = vst [vmem:[#allocation2 + $0x58] sm:$0x1] %v825_v8  ;;  %v834_v47 = vsel %vm4894_vm8, 0, %v833_v50  ;;  %v836_v49 = vld [vmem:[#allocation2 + $0x78] sm:$0x1] }
 0x1d7   : > { %829 = vst [vmem:[#allocation2 + $0x60] sm:$0x1] %v828_v7  ;;  %v837_v14 = vsel %vm4894_vm8, 0, %v836_v49 }
 0x1d8   : > { %832 = vst [vmem:[#allocation2 + $0x68] sm:$0x1] %v831_v46 }
 0x1d9   : > { %835 = vst [vmem:[#allocation2 + $0x70] sm:$0x1] %v834_v47 }
 0x1da   : > { %838 = vst [vmem:[#allocation2 + $0x78] sm:$0x1] %v837_v14 }
 0x1db PF: > { %p4038_p5 = scmp.ne.s32.totalorder %s4376_s27, 1 }
 0x1dd   : > { %842 = sbr.rel (%p4038_p5) target bundleno = 501 (0x1f5), region = 75 }
 0x1e2   : > { %vm843_vm9 = vcmask 139264   ;;  %vm844_vm10 = vsmask.f32 7938  ;;  %v846_v51 = vld [vmem:[#allocation2 + $0x4] sm:$0x1] }
 0x1e3   : > { %vm4933_vm11 = vmand %vm843_vm9, %vm844_vm10  ;;  %v849_v54 = vld [vmem:[#allocation2 + $0xc] sm:$0x1]  ;;  %v852_v53 = vld [vmem:[#allocation2 + $0x14] sm:$0x1] }
 0x1e4   : > { %v847_v56 = vsel %vm4933_vm11, 0, %v846_v51  ;;  %v850_v57 = vsel %vm4933_vm11, 0, %v849_v54  ;;  %v853_v48 = vsel %vm4933_vm11, 0, %v852_v53  ;;  %v855_v59 = vld [vmem:[#allocation2 + $0x1c] sm:$0x1] }
 0x1e5   : > { %848 = vst [vmem:[#allocation2 + $0x4] sm:$0x1] %v847_v56  ;;  %v856_v60 = vsel %vm4933_vm11, 0, %v855_v59  ;;  %v858_v61 = vld [vmem:[#allocation2 + $0x24] sm:$0x1] }
 0x1e6   : > { %851 = vst [vmem:[#allocation2 + $0xc] sm:$0x1] %v850_v57  ;;  %v859_v55 = vsel %vm4933_vm11, 0, %v858_v61  ;;  %v861_v63 = vld [vmem:[#allocation2 + $0x2c] sm:$0x1] }
 0x1e7   : > { %854 = vst [vmem:[#allocation2 + $0x14] sm:$0x1] %v853_v48  ;;  %v862_v0 = vsel %vm4933_vm11, 0, %v861_v63  ;;  %v864_v2 = vld [vmem:[#allocation2 + $0x34] sm:$0x1] }
 0x1e8   : > { %857 = vst [vmem:[#allocation2 + $0x1c] sm:$0x1] %v856_v60  ;;  %v865_v58 = vsel %vm4933_vm11, 0, %v864_v2  ;;  %v867_v4 = vld [vmem:[#allocation2 + $0x3c] sm:$0x1] }
 0x1e9   : > { %860 = vst [vmem:[#allocation2 + $0x24] sm:$0x1] %v859_v55  ;;  %v868_v5 = vsel %vm4933_vm11, 0, %v867_v4  ;;  %v870_v6 = vld [vmem:[#allocation2 + $0x44] sm:$0x1] }
 0x1ea   : > { %863 = vst [vmem:[#allocation2 + $0x2c] sm:$0x1] %v862_v0  ;;  %v871_v62 = vsel %vm4933_vm11, 0, %v870_v6  ;;  %v873_v9 = vld [vmem:[#allocation2 + $0x4c] sm:$0x1] }
 0x1eb   : > { %866 = vst [vmem:[#allocation2 + $0x34] sm:$0x1] %v865_v58  ;;  %v874_v11 = vsel %vm4933_vm11, 0, %v873_v9  ;;  %v876_v12 = vld [vmem:[#allocation2 + $0x54] sm:$0x1] }
 0x1ec   : > { %869 = vst [vmem:[#allocation2 + $0x3c] sm:$0x1] %v868_v5  ;;  %v877_v26 = vsel %vm4933_vm11, 0, %v876_v12  ;;  %v879_v13 = vld [vmem:[#allocation2 + $0x5c] sm:$0x1] }
 0x1ed   : > { %872 = vst [vmem:[#allocation2 + $0x44] sm:$0x1] %v871_v62  ;;  %v880_v15 = vsel %vm4933_vm11, 0, %v879_v13  ;;  %v882_v16 = vld [vmem:[#allocation2 + $0x64] sm:$0x1] }
 0x1ee   : > { %875 = vst [vmem:[#allocation2 + $0x4c] sm:$0x1] %v874_v11  ;;  %v883_v17 = vsel %vm4933_vm11, 0, %v882_v16  ;;  %v885_v1 = vld [vmem:[#allocation2 + $0x6c] sm:$0x1] }
 0x1ef   : > { %878 = vst [vmem:[#allocation2 + $0x54] sm:$0x1] %v877_v26  ;;  %v886_v30 = vsel %vm4933_vm11, 0, %v885_v1  ;;  %v888_v3 = vld [vmem:[#allocation2 + $0x74] sm:$0x1] }
 0x1f0   : > { %881 = vst [vmem:[#allocation2 + $0x5c] sm:$0x1] %v880_v15  ;;  %v889_v18 = vsel %vm4933_vm11, 0, %v888_v3  ;;  %v891_v24 = vld [vmem:[#allocation2 + $0x7c] sm:$0x1] }
 0x1f1   : > { %884 = vst [vmem:[#allocation2 + $0x64] sm:$0x1] %v883_v17  ;;  %v892_v19 = vsel %vm4933_vm11, 0, %v891_v24 }
 0x1f2   : > { %887 = vst [vmem:[#allocation2 + $0x6c] sm:$0x1] %v886_v30 }
 0x1f3   : > { %890 = vst [vmem:[#allocation2 + $0x74] sm:$0x1] %v889_v18 }
 0x1f4   : > { %893 = vst [vmem:[#allocation2 + $0x7c] sm:$0x1] %v892_v19 }
 0x1f5 PF: > { %v4969_v31 = vld [vmem:[#allocation2] sm:$0xf]  ;;  %vm911_vm12 = vcmask 1047556   ;;  %s4404_s23 = smov 127   ;;  %v4405_v22 = vmov 1983009808  }
 0x1f6   : > { %v4971_v20 = vld [vmem:[#allocation2 + $0x20] sm:$0xf]  ;;  %1148 = vrot.lane.b32.xlu1 %v4969_v31, %s4404_s23  ;;  %v914_v34 = vunpack.c.l.s4 %v4405_v22  ;;  %v4978_v25 = vld [vmem:[#allocation2 + $0x8] sm:$0xf]  ;;  %v4984_v38 = vld [vmem:[#allocation2 + $0x10] sm:$0xf] }
 0x1f7   : > { %v910_v21 = vrot.slane %v4971_v20, 4  ;;  %1150 = vrot.lane.b32.xlu2 %v4978_v25, %s4404_s23  ;;  %v4986_v28 = vld [vmem:[#allocation2 + $0x28] sm:$0xf]  ;;  %v4988_v29 = vld [vmem:[#allocation2 + $0x30] sm:$0xf]  ;;  %s4407_s18 = smov 64  }
 0x1f8   : > { %v4980_v27 = vunpack.c.0.s8 %v914_v34  ;;  %v917_v33 = vrot.slane %v4988_v29, 4  ;;  %v4992_v35 = vld [vmem:[#allocation2 + $0x18] sm:$0xf]  ;;  %v4996_v39 = vld [vmem:[#allocation2 + $0x40] sm:$0xf]  ;;  %v939_v42 = vrot.slane %v4986_v28, 4 }
 0x1f9   : > { %v912_v23 = vsel %vm911_vm12, %v910_v21, %v4969_v31  ;;  %v4994_v36 = vld [vmem:[#allocation2 + $0x38] sm:$0xf]  ;;  %v4998_v40 = vld [vmem:[#allocation2 + $0x60] sm:$0xf]  ;;  %v5003_v43 = vld [vmem:[#allocation2 + $0x68] sm:$0xf] }
 0x1fa   : > { %6920 = vst [vmem:[#allocation14_spill] sm:$0xff] %v4980_v27  ;;  %v916_v32 = vperm.slane %v912_v23, %v4980_v27  ;;  %v918_v41 = vsel %vm911_vm12, %v917_v33, %v4984_v38  ;;  %v5005_v10 = vld [vmem:[#allocation2 + $0x70] sm:$0xf]  ;;  %v4406_v7 = vmov 1934713408   ;;  %v940_v46 = vsel %vm911_vm12, %v939_v42, %v4978_v25  ;;  %s4408_s21 = smov 16  }
 0x1fb   : > { %v5007_v8 = vld [vmem:[#allocation2 + $0x50] sm:$0xf]  ;;  %v922_v44 = vperm.slane %v918_v41, %v4980_v27  ;;  %v928_v45 = vunpack.c.l.s4 %v4406_v7  ;;  %v945_v50 = vrot.slane %v4994_v36, 4  ;;  %v5013_v47 = vld [vmem:[#allocation2 + $0x48] sm:$0xf]  ;;  %v944_v49 = vperm.slane %v940_v46, %v4980_v27  ;;  %s4409_s19 = smov 80  }
 0x1fc   : > { %v925_v37 = vrot.slane %v916_v32, 4  ;;  %v967_v14 = vrot.slane %v4998_v40, 4  ;;  %v973_v51 = vrot.slane %v5005_v10, 4  ;;  %v5018_v52 = vld [vmem:[#allocation2 + $0x78] sm:$0xf]  ;;  %v995_v57 = vrot.slane %v5003_v43, 4 }
 0x1fd   : > { %v5021_v53 = vunpack.c.0.s8 %v928_v45  ;;  %v946_v56 = vsel %vm911_vm12, %v945_v50, %v4992_v35  ;;  %v953_v59 = vrot.slane %v944_v49, 4  ;;  %v5031_v55 = vld [vmem:[#allocation2 + $0x58] sm:$0xf]  ;;  %v1001_v5 = vrot.slane %v5018_v52, 4  ;;  %s4410_s0 = smov 48   ;;  %s4411_s1 = smov 32  }
 0x1fe   : > { %v926_v54 = vsel %vm911_vm12, %v922_v44, %v925_v37  ;;  %v950_v48 = vperm.slane %v946_v56, %v4980_v27  ;;  %v968_v60 = vsel %vm911_vm12, %v967_v14, %v4996_v39  ;;  %v974_v61 = vsel %vm911_vm12, %v973_v51, %v5007_v8  ;;  %s4412_s17 = smov 96   ;;  %s4413_s16 = smov 112  }
 0x1ff   : > { %v972_v63 = vperm.slane %v968_v60, %v4980_v27  ;;  %v996_v0 = vsel %vm911_vm12, %v995_v57, %v5013_v47  ;;  %v5037_v2 = vperm.slane %v926_v54, %v5021_v53  ;;  %v978_v62 = vperm.slane %v974_v61, %v4980_v27  ;;  %s4414_s9 = smov 126  }
 0x200   : > { %v954_v58 = vsel %vm911_vm12, %v950_v48, %v953_v59  ;;  %v1000_v4 = vperm.slane %v996_v0, %v4980_v27  ;;  %v1002_v11 = vsel %vm911_vm12, %v1001_v5, %v5031_v55  ;;  %v923_v24 = vrot.slane %v922_v44, 4 }
 0x201   : > { %v5043_v6 = vperm.slane %v954_v58, %v5021_v53  ;;  %v981_v9 = vrot.slane %v972_v63, 4  ;;  %v1006_v13 = vperm.slane %v1002_v11, %v4980_v27  ;;  %v951_v19 = vrot.slane %v950_v48, 4 }
 0x202   : > { %v1009_v12 = vrot.slane %v1000_v4, 4  ;;  %v979_v22 = vrot.slane %v978_v62, 4  ;;  %v924_v34 = vsel %vm911_vm12, %v923_v24, %v916_v32  ;;  %v1038_v37 = vshrl.u32 %v5037_v2, 16 }
 0x203   : > { %v982_v26 = vsel %vm911_vm12, %v978_v62, %v981_v9  ;;  %v1037_v16 = vpack.i.b16 %v5043_v6, %v5037_v2  ;;  %v952_v23 = vsel %vm911_vm12, %v951_v19, %v944_v49  ;;  %v1007_v33 = vrot.slane %v1006_v13, 4 }
 0x204   : > { %v5051_v15 = vperm.slane %v982_v26, %v5021_v53  ;;  %v1010_v17 = vsel %vm911_vm12, %v1006_v13, %v1009_v12  ;;  %v5066_v41 = vperm.slane %v924_v34, %v5021_v53  ;;  %v5069_v42 = vperm.slane %v952_v23, %v5021_v53 }
 0x205   : > { %v5057_v1 = vperm.slane %v1010_v17, %v5021_v53  ;;  %v1089_v3 = vunpack.c.l.b16 %v1037_v16  ;;  %v980_v44 = vsel %vm911_vm12, %v979_v22, %v972_v63  ;;  %v1039_v7 = vshrl.u32 %v5043_v6, 16 }
 0x206   : > { %6921 = vst [vmem:[#allocation15_spill] sm:$0xff] %v5066_v41  ;;  %v5074_v32 = vperm.slane %v980_v44, %v5021_v53  ;;  %v1008_v45 = vsel %vm911_vm12, %v1007_v33, %v1000_v4  ;;  %v1062_v46 = vshrl.u32 %v5051_v15, 16  ;;  %v1026_v14 = vshrl.u32 %v5066_v41, 16 }
 0x207   : > { %v1061_v30 = vpack.i.b16 %v5057_v1, %v5051_v15  ;;  %6922 = vst [vmem:[#allocation16_spill] sm:$0xff] %v5069_v42  ;;  %v1063_v50 = vshrl.u32 %v5057_v1, 16  ;;  %v5080_v49 = vperm.slane %v1008_v45, %v5021_v53  ;;  %v1027_v51 = vshrl.u32 %v5069_v42, 16 }
 0x208   : > { %6923 = vst [vmem:[#allocation17_spill] sm:$0xff] %v5074_v32  ;;  %v935_v54 = vrot.slane %v5066_v41, 4  ;;  %v1050_v56 = vshrl.u32 %v5074_v32, 16  ;;  %v963_v57 = vrot.slane %v5069_v42, 4  ;;  %v991_v48 = vrot.slane %v5074_v32, 4 }
 0x209   : > { %v1090_v18 = vunpack.c.l.b16 %v1061_v30  ;;  %6924 = vst [vmem:[#allocation18_spill] sm:$0xff] %v5080_v49  ;;  %v1040_v59 = vpack.i.b16 %v1039_v7, %v1038_v37  ;;  %v1028_v60 = vpack.i.b16 %v1027_v51, %v1026_v14  ;;  %v1051_v61 = vshrl.u32 %v5080_v49, 16 }
 0x20a   : > { %v936_v63 = vsel %vm911_vm12, 0, %v935_v54  ;;  %v1019_v0 = vrot.slane %v5080_v49, 4  ;;  %v964_v58 = vsel %vm911_vm12, 0, %v963_v57  ;;  %v992_v4 = vsel %vm911_vm12, 0, %v991_v48 }
 0x20b   : > { %v1091_v21 = vpack.c.b16 %v1090_v18, %v1089_v3  ;;  %v1032_v5 = vshrl.u32 %v936_v63, 16  ;;  %v1064_v62 = vpack.i.b16 %v1063_v50, %v1062_v46  ;;  %v1052_v9 = vpack.i.b16 %v1051_v61, %v1050_v56 }
 0x20c   : > { %v1074_v11 = vunpack.c.l.b16 %v1028_v60  ;;  %v1020_v12 = vsel %vm911_vm12, 0, %v1019_v0  ;;  %v1033_v26 = vshrl.u32 %v964_v58, 16  ;;  %v1056_v13 = vshrl.u32 %v992_v4, 16 }
 0x20d   : > { %1092 = vrot.lane.b32.xlu1 %v1091_v21, %s4407_s18  ;;  %v1057_v16 = vshrl.u32 %v1020_v12, 16  ;;  %v1031_v17 = vpack.i.b16 %v964_v58, %v936_v63  ;;  %v1055_v30 = vpack.i.b16 %v1020_v12, %v992_v4  ;;  %v1075_v3 = vunpack.c.l.b16 %v1052_v9 }
 0x20e   : > { %v1034_v18 = vpack.i.b16 %v1033_v26, %v1032_v5  ;;  %v1094_v24 = vunpack.c.l.b16 %v1040_v59  ;;  %v1095_v19 = vunpack.c.l.b16 %v1064_v62  ;;  %v937_v34 = vrot.slane %v5037_v2, 4 }
 0x20f   : > { %v1058_v21 = vpack.i.b16 %v1057_v16, %v1056_v13  ;;  %v1079_v22 = vunpack.c.l.b16 %v1031_v17  ;;  %v1076_v23 = vpack.c.b16 %v1075_v3, %v1074_v11  ;;  %v965_v44 = vrot.slane %v5043_v6, 4 }
 0x210   : > { %v1084_v33 = vunpack.c.l.b16 %v1034_v18  ;;  %v1096_v37 = vpack.c.b16 %v1095_v19, %v1094_v24  ;;  %v1080_v45 = vunpack.c.l.b16 %v1055_v30  ;;  %v938_v46 = vsel %vm911_vm12, 0, %v937_v34  ;;  %v1672_v18 = vld [vmem:[#allocation2 + $0x4] sm:$0x1] }
 0x211   : > { %v1085_v7 = vunpack.c.l.b16 %v1058_v21  ;;  %v993_v50 = vrot.slane %v5051_v15, 4  ;;  %1077 = vrot.lane.b32.xlu0 %v1076_v23, %s4408_s21  ;;  %v966_v14 = vsel %vm911_vm12, 0, %v965_v44  ;;  %v1021_v2 = vrot.slane %v5057_v1, 4 }
 0x212   : > { %1097 = vrot.lane.b32.xlu2 %v1096_v37, %s4409_s19  ;;  %v1044_v51 = vshrl.u32 %v938_v46, 16  ;;  %v1045_v56 = vshrl.u32 %v966_v14, 16  ;;  %v1043_v57 = vpack.i.b16 %v966_v14, %v938_v46  ;;  %v1081_v63 = vpack.c.b16 %v1080_v45, %v1079_v22 }
 0x213   : > { %v1086_v54 = vpack.c.b16 %v1085_v7, %v1084_v33  ;;  %v994_v6 = vsel %vm911_vm12, 0, %v993_v50  ;;  %v1022_v48 = vsel %vm911_vm12, 0, %v1021_v2  ;;  %v1692_v16 = vshrl.u32 %v4969_v31, 16 }
 0x214   : > { %v1068_v59 = vshrl.u32 %v994_v6, 16  ;;  %v1069_v15 = vshrl.u32 %v1022_v48, 16  ;;  %v1067_v60 = vpack.i.b16 %v1022_v48, %v994_v6  ;;  %v1099_v61 = vunpack.c.l.b16 %v1043_v57 }
 0x215   : > { %1087 = vrot.lane.b32.xlu1 %v1086_v54, %s4410_s0  ;;  %v1046_v0 = vpack.i.b16 %v1045_v56, %v1044_v51  ;;  %v1695_v17 = vshll.u32 %v4969_v31, 16  ;;  %v1694_v24 = vrot.slane %v1692_v16, 4  ;;  %v1701_v21 = vshll.u32 %v1672_v18, 16 }
 0x216   : > { %v1070_v58 = vpack.i.b16 %v1069_v15, %v1068_v59  ;;  %v1100_v4 = vunpack.c.l.b16 %v1067_v60  ;;  %v1748_v22 = vshrl.u32 %v4971_v20, 16  ;;  %v1751_v23 = vshll.u32 %v4971_v20, 16 }
 0x217   : > { %v1104_v5 = vunpack.c.l.b16 %v1046_v0  ;;  %v1697_v19 = vrot.slane %v1695_v17, 5  ;;  %v1720_v37 = vshrl.u32 %v4984_v38, 16  ;;  %v1723_v44 = vshll.u32 %v4984_v38, 16 }
 0x218   : > { %v1101_v1 = vpack.c.b16 %v1100_v4, %v1099_v61  ;;  %v1105_v62 = vunpack.c.l.b16 %v1070_v58  ;;  %v1734_v7 = vshrl.u32 %v4992_v35, 16  ;;  %v1737_v45 = vshll.u32 %v4992_v35, 16 }
 0x219   : > { %1082 = vrot.lane.b32.xlu0 %v1081_v63, %s4411_s1  ;;  %v1698_v33 = vor.u32 %v1697_v19, %v1694_v24  ;;  %v1776_v46 = vshrl.u32 %v4988_v29, 16  ;;  %vm1688_vm13 = vsmask.f32 3328  ;;  %vm1689_vm14 = vsmask.f32 7440 }
 0x21a   : > { %1102 = vrot.lane.b32.xlu2 %v1101_v1, %s4412_s17  ;;  %v1106_v9 = vpack.c.b16 %v1105_v62, %v1104_v5  ;;  %v1703_v14 = vrot.slane %v1701_v21, 5  ;;  %v5195_v2 = vrot.slane %v1748_v22, 4  ;;  %v1790_v51 = vshrl.u32 %v4994_v36, 16  ;;  %vm5235_vm15 = vmor %vm1688_vm13, %vm1689_vm14  ;;  %v1674_v22 = vld [vmem:[#allocation2 + $0x14] sm:$0x1] }
 0x21b   : > { %v1699_v54 = vrot.slane %v1698_v33, 4  ;;  %v5201_v6 = vrot.slane %v1720_v37, 4  ;;  %v5203_v56 = vrot.slane %v1723_v44, 5  ;;  %v5207_v57 = vrot.slane %v1737_v45, 5 }
 0x21c   : > { %v5209_v48 = vrot.slane %v1776_v46, 4  ;;  %v1793_v59 = vshll.u32 %v4994_v36, 16  ;;  %v1832_v15 = vshrl.u32 %v5007_v8, 16  ;;  %v1846_v60 = vshrl.u32 %v5031_v55, 16 }
 0x21d   : > { %1154 = vrot.lane.b32.xlu1 %v4992_v35, %s4404_s23  ;;  %v1849_v61 = vshll.u32 %v5031_v55, 16  ;;  %v5218_v0 = vrot.slane %v1790_v51, 4  ;;  %v1706_v4 = vshrl.u32 %v4978_v25, 16  ;;  %v1709_v1 = vshll.u32 %v4978_v25, 16 }
 0x21e   : > { %v1891_v5 = vshll.u32 %v5005_v10, 16  ;;  %v1765_v62 = vshll.u32 %v4986_v28, 16  ;;  %v1905_v16 = vshll.u32 %v5018_v52, 16  ;;  %v5239_v18 = vrot.slane %v1832_v15, 4 }
 0x21f   : > { %v5243_v24 = vrot.slane %v1846_v60, 4  ;;  %v1711_v33 = vrot.slane %v1709_v1, 5  ;;  %v1726_v15 = vor.u32 %v5203_v56, %v5201_v6  ;;  %v1860_v60 = vshrl.u32 %v4998_v40, 16 }
 0x220   : > { %v5257_v44 = vrot.slane %v1891_v5, 5  ;;  %v1767_v45 = vrot.slane %v1765_v62, 5  ;;  %v1863_v5 = vshll.u32 %v4998_v40, 16  ;;  %vm1109_vm0 = vcmask 130048  }
 0x221   : > { %1107 = vrot.lane.b32.xlu0 %v1106_v9, %s4413_s16  ;;  %v5228_v9 = vrot.slane %v1793_v59, 5  ;;  %vm1113_vm1 = vcmask 261120   ;;  %vm2717_vm2 = vcmask 1042432   ;;  %vm2718_vm3 = vcmask 1046532  }
 0x222   : > { %1156 = vrot.lane.b32.xlu2 %v4971_v20, %s4404_s23  ;;  %vm5849_vm4 = vmor %vm2717_vm2, %vm2718_vm3  ;;  %vm1116_vm5 = vcmask 392192   ;;  %vm1119_vm6 = vcmask 523264   ;;  %vm1122_vm7 = vcmask 654336   ;;  %vm1125_vm8 = vcmask 785408  }
 0x223   : > { %vm1128_vm9 = vcmask 916480  }
 0x225   : > { %1160 = vrot.lane.b32.xlu1 %v4988_v29, %s4404_s23 }
 0x229   : > { %1152 = vrot.lane.b32.xlu0 %v4984_v38, %s4404_s23 }
 0x22a   : > { %1162 = vrot.lane.b32.xlu2 %v4994_v36, %s4404_s23 }
 0x22d   : > { %1166 = vrot.lane.b32.xlu1 %v5013_v47, %s4404_s23 }
 0x231   : > { %1158 = vrot.lane.b32.xlu0 %v4986_v28, %s4404_s23 }
 0x232   : > { %1168 = vrot.lane.b32.xlu2 %v5007_v8, %s4404_s23 }
 0x235   : > { %1172 = vrot.lane.b32.xlu1 %v4998_v40, %s4404_s23 }
 0x239   : > { %1164 = vrot.lane.b32.xlu0 %v4996_v39, %s4404_s23 }
 0x23a   : > { %1174 = vrot.lane.b32.xlu2 %v5003_v43, %s4404_s23 }
 0x23d   : > { %1178 = vrot.lane.b32.xlu1 %v5018_v52, %s4404_s23 }
 0x241   : > { %1170 = vrot.lane.b32.xlu0 %v5031_v55, %s4404_s23 }
 0x242   : > { %1414 = vrot.lane.b32.xlu2 %v4984_v38, %s4414_s9  ;;  %v5199_v38 = vrot.slane %v1751_v23, 5  ;;  %v1708_v23 = vrot.slane %v1706_v4, 4  ;;  %v1676_v4 = vld [vmem:[#allocation2 + $0x24] sm:$0x1] }
 0x244   : > { %v1712_v1 = vor.u32 %v1711_v33, %v1708_v23  ;;  %v1754_v6 = vor.u32 %v5199_v38, %v5195_v2  ;;  %v1727_v2 = vrot.slane %v1726_v15, 4  ;;  %v1804_v23 = vshrl.u32 %v4996_v39, 16 }
 0x245   : > { %1412 = vrot.lane.b32.xlu1 %v4978_v25, %s4414_s9  ;;  %v1807_v33 = vshll.u32 %v4996_v39, 16  ;;  %v1818_v15 = vshrl.u32 %v5013_v47, 16 }
 0x249   : > { %1176 = vrot.lane.b32.xlu0 %v5005_v10, %s4404_s23 }
 0x24a   : > { %1420 = vrot.lane.b32.xlu2 %v4986_v28, %s4414_s9 }
 0x24d   : > { %1418 = vrot.lane.b32.xlu1 %v4971_v20, %s4414_s9  ;;  %v1779_v20 = vshll.u32 %v4988_v29, 16 }
 0x24f   : > { %v5216_v63 = vrot.slane %v1779_v20, 5  ;;  %v5261_v20 = vrot.slane %v1905_v16, 5  ;;  %v1678_v16 = vld [vmem:[#allocation2 + $0x34] sm:$0x1] }
 0x251   : > { %1410 = vrot.lane.b32.xlu0 %v4969_v31, %s4414_s9  ;;  %v5158_v11 = vpop.permute.xlu2 %1150 }
 0x252   : > { %1426 = vrot.lane.b32.xlu2 %v4996_v39, %s4414_s9 }
 0x255   : > { %1424 = vrot.lane.b32.xlu1 %v4994_v36, %s4414_s9  ;;  %v1888_v36 = vshrl.u32 %v5005_v10, 16 }
 0x257   : > { %v5255_v37 = vrot.slane %v1888_v36, 4  ;;  %v1782_v36 = vor.u32 %v5216_v63, %v5209_v48  ;;  %v1682_v63 = vld [vmem:[#allocation2 + $0x54] sm:$0x1] }
 0x259   : > { %1416 = vrot.lane.b32.xlu0 %v4992_v35, %s4414_s9  ;;  %v5205_v35 = vrot.slane %v1734_v7, 4 }
 0x25a   : > { %1432 = vrot.lane.b32.xlu2 %v5031_v55, %s4414_s9  ;;  %v1902_v55 = vshrl.u32 %v5018_v52, 16 }
 0x25b   : > { %v1740_v62 = vor.u32 %v5207_v57, %v5205_v35 }
 0x25c   : > { %v5259_v46 = vrot.slane %v1902_v55, 4 }
 0x25d   : > { %1430 = vrot.lane.b32.xlu1 %v5007_v8, %s4414_s9 }
 0x261   : > { %1422 = vrot.lane.b32.xlu0 %v4988_v29, %s4414_s9  ;;  %v1835_v29 = vshll.u32 %v5007_v8, 16  ;;  %v1762_v8 = vshrl.u32 %v4986_v28, 16  ;;  %v5245_v28 = vrot.slane %v1849_v61, 5 }
 0x262   : > { %1438 = vrot.lane.b32.xlu2 %v5005_v10, %s4414_s9 }
 0x263   : > { %v5241_v10 = vrot.slane %v1835_v29, 5  ;;  %v1764_v7 = vrot.slane %v1762_v8, 4  ;;  %v1729_v29 = vshll.u32 %v1674_v22, 16  ;;  %v1677_v8 = vld [vmem:[#allocation2 + $0x2c] sm:$0x1] }
 0x264   : > { %v1771_v22 = vshll.u32 %v1677_v8, 16  ;;  %v1821_v8 = vshll.u32 %v5013_v47, 16 }
 0x265   : > { %1436 = vrot.lane.b32.xlu1 %v5003_v43, %s4414_s9  ;;  %v1768_v56 = vor.u32 %v1767_v45, %v1764_v7  ;;  %v1838_v48 = vor.u32 %v5241_v10, %v5239_v18  ;;  %v1731_v38 = vrot.slane %v1729_v29, 5  ;;  %v1741_v18 = vrot.slane %v1740_v62, 4  ;;  %v1681_v29 = vld [vmem:[#allocation2 + $0x4c] sm:$0x1] }
 0x266   : > { %v1755_v10 = vrot.slane %v1754_v6, 4  ;;  %v1785_v45 = vshll.u32 %v1678_v16, 16  ;;  %v1684_v16 = vld [vmem:[#allocation2 + $0x64] sm:$0x1]  ;;  %v1841_v6 = vshll.u32 %v1682_v63, 16 }
 0x267   : > { %v1769_v39 = vrot.slane %v1768_v56, 4  ;;  %v1820_v56 = vrot.slane %v1818_v15, 4 }
 0x268   : > { %v5170_v26 = vpop.permute.xlu1 %1148  ;;  %v1843_v15 = vrot.slane %v1841_v6, 5 }
 0x269   : > { %1428 = vrot.lane.b32.xlu0 %v5013_v47, %s4414_s9  ;;  %v1862_v47 = vrot.slane %v1860_v60, 4  ;;  %v1874_v60 = vshrl.u32 %v5003_v43, 16 }
 0x26c   : > { %v5166_v12 = vpop.permute.xlu2 %1097 }
 0x26d   : > { %6925 = vst [vmem:[#allocation19_spill] sm:$0xff] %v5166_v12  ;;  %v1827_v12 = vshll.u32 %v1681_v29, 16  ;;  %v6940_v29 = vor.u32 %v5245_v28, %v5243_v24  ;;  %v6943_v28 = vor.u32 %v5261_v20, %v5259_v46 }
 0x271   : > { %1434 = vrot.lane.b32.xlu0 %v4998_v40, %s4414_s9  ;;  %v1806_v40 = vrot.slane %v1804_v23, 4  ;;  %v1783_v23 = vrot.slane %v1782_v36, 4 }
 0x274   : > { %v5172_v13 = vpop.permute.xlu2 %1102 }
 0x275   : > { %6926 = vst [vmem:[#allocation20_spill] sm:$0xff] %v5172_v13 }
 0x279   : > { %1440 = vrot.lane.b32.xlu0 %v5018_v52, %s4414_s9  ;;  %v5253_v52 = vsel %vm5235_vm15, %v1699_v54, %v1703_v14  ;;  %v1675_v54 = vld [vmem:[#allocation2 + $0x1c] sm:$0x1]  ;;  %v1680_v14 = vld [vmem:[#allocation2 + $0x44] sm:$0x1] }
 0x27a   : > { %6933 = vst [vmem:[#allocation25_spill] sm:$0xff] %v5253_v52 }
 0x27c   : > { %v5180_v3 = vpop.permute.xlu2 %1156 }
 0x27d   : > { %v1196_v17 = vrot.slane %v5180_v3, 4  ;;  %v1673_v3 = vld [vmem:[#allocation2 + $0xc] sm:$0x1] }
 0x27e   : > { %v1715_v59 = vshll.u32 %v1673_v3, 16  ;;  %v1743_v3 = vshll.u32 %v1675_v54, 16 }
 0x27f   : > { %v5178_v30 = vpop.permute.xlu1 %1092  ;;  %v5265_v51 = vsel %vm911_vm12, %v1196_v17, %v5170_v26  ;;  %v1796_v26 = vor.u32 %v5228_v9, %v5218_v0  ;;  %v1679_v17 = vld [vmem:[#allocation2 + $0x3c] sm:$0x1]  ;;  %v1757_v0 = vshll.u32 %v1676_v4, 16  ;;  %v1713_v9 = vrot.slane %v1712_v1, 4 }
 0x280   : > { %6927 = vst [vmem:[#allocation21_spill] sm:$0xff] %v5178_v30  ;;  %v1717_v57 = vrot.slane %v1715_v59, 5  ;;  %v1799_v54 = vshll.u32 %v1679_v17, 16  ;;  %v1745_v55 = vrot.slane %v1743_v3, 5  ;;  %v1809_v59 = vrot.slane %v1807_v33, 5 }
 0x281   : > { %v5299_v4 = vsel %vm5235_vm15, %v1727_v2, %v1731_v38  ;;  %v1759_v1 = vrot.slane %v1757_v0, 5  ;;  %v1773_v3 = vrot.slane %v1771_v22, 5  ;;  %v1787_v33 = vrot.slane %v1785_v45, 5  ;;  %v1683_v38 = vld [vmem:[#allocation2 + $0x5c] sm:$0x1] }
 0x282   : > { %6935 = vst [vmem:[#allocation27_spill] sm:$0xff] %v5299_v4  ;;  %v5307_v17 = vsel %vm5235_vm15, %v1713_v9, %v1717_v57  ;;  %v1801_v13 = vrot.slane %v1799_v54, 5  ;;  %v1813_v2 = vshll.u32 %v1680_v14, 16  ;;  %v1810_v0 = vor.u32 %v1809_v59, %v1806_v40  ;;  %v5324_v40 = vld [vmem:[#allocation2 + $0x74] sm:$0x1] }
 0x283   : > { %v5183_v34 = vpop.permute.xlu0 %1077  ;;  %6936 = vst [vmem:[#allocation28_spill] sm:$0xff] %v5307_v17  ;;  %v5313_v57 = vsel %vm5235_vm15, %v1741_v18, %v1745_v55  ;;  %v5317_v36 = vsel %vm5235_vm15, %v1755_v10, %v1759_v1  ;;  %v5321_v14 = vsel %vm5235_vm15, %v1769_v39, %v1773_v3  ;;  %v1855_v9 = vshll.u32 %v1683_v38, 16  ;;  %v5334_v22 = vld [vmem:[#allocation2 + $0x7c] sm:$0x1] }
 0x284   : > { %6928 = vst [vmem:[#allocation22_spill] sm:$0xff] %v5183_v34  ;;  %v5188_v31 = vpop.permute.xlu2 %1162  ;;  %v1869_v34 = vshll.u32 %v1684_v16, 16  ;;  %v1815_v63 = vrot.slane %v1813_v2, 5  ;;  %v1811_v18 = vrot.slane %v1810_v0, 4  ;;  %v1829_v10 = vrot.slane %v1827_v12, 5 }
 0x285   : > { %6937 = vst [vmem:[#allocation29_spill] sm:$0xff] %v5321_v14  ;;  %v1839_v45 = vrot.slane %v1838_v48, 4  ;;  %v1853_v1 = vrot.slane %v6940_v29, 4  ;;  %v1876_v3 = vrot.slane %v1874_v60, 4  ;;  %v1909_v48 = vrot.slane %v6943_v28, 4 }
 0x286   : > { %6938 = vst [vmem:[#allocation30_spill] sm:$0xff] %v5324_v40  ;;  %v1871_v39 = vrot.slane %v1869_v34, 5  ;;  %v5347_v24 = vsel %vm5235_vm15, %v1811_v18, %v1815_v63 }
 0x287   : > { %v5193_v50 = vpop.permute.xlu1 %1087  ;;  %6939 = vst [vmem:[#allocation31_spill] sm:$0xff] %v5334_v22  ;;  %v5364_v20 = vsel %vm5235_vm15, %v1839_v45, %v1843_v15  ;;  %v1959_v15 = vrot.slane %v5321_v14, 4 }
 0x288   : > { %6929 = vst [vmem:[#allocation23_spill] sm:$0xff] %v5193_v50  ;;  %v1823_v50 = vrot.slane %v1821_v8, 5 }
 0x289   : > { %6942 = vst [vmem:[#allocation32_spill] sm:$0xff] %v5347_v24 }
 0x28a   : > { %v1824_v59 = vor.u32 %v1823_v50, %v1820_v56  ;;  %v1911_v50 = vshll.u32 %v5334_v22, 16 }
 0x28b   : > { %v5220_v58 = vpop.permute.xlu0 %1082 }
 0x28c   : > { %6930 = vst [vmem:[#allocation24_spill] sm:$0xff] %v5220_v58  ;;  %v5249_v21 = vpop.permute.xlu2 %1168  ;;  %v1865_v58 = vrot.slane %v1863_v5, 5  ;;  %v5328_v5 = vsel %vm5235_vm15, %v1783_v23, %v1787_v33  ;;  %v1857_v23 = vrot.slane %v1855_v9, 5  ;;  %v6941_v33 = vor.u32 %v5257_v44, %v5255_v37 }
 0x28d   : > { %v1825_v2 = vrot.slane %v1824_v59, 4  ;;  %v1913_v44 = vrot.slane %v1911_v50, 5  ;;  %v1937_v38 = vrot.slane %v5328_v5, 4 }
 0x28e   : > { %v1866_v54 = vor.u32 %v1865_v58, %v1862_v47  ;;  %v1895_v12 = vrot.slane %v6941_v33, 4  ;;  %v1897_v58 = vshll.u32 %v5324_v40, 16  ;;  %v5384_v45 = vsel %vm5235_vm15, %v1853_v1, %v1857_v23 }
 0x28f   : > { %v5247_v19 = vpop.permute.xlu1 %1154  ;;  %v1938_v63 = vsel %vm911_vm12, %v1937_v38, %v5299_v4  ;;  %v5374_v18 = vsel %vm5235_vm15, %v1909_v48, %v1913_v44  ;;  %6945 = vst [vmem:[#allocation34_spill] sm:$0xff] %v5384_v45 }
 0x290   : > { %v1867_v16 = vrot.slane %v1866_v54, 4  ;;  %v1899_v37 = vrot.slane %v1897_v58, 5  ;;  %v5380_v59 = vperm.slane %v1938_v63, %v4980_v27 }
 0x292   : > { %v5358_v0 = vsel %vm5235_vm15, %v1867_v16, %v1871_v39  ;;  %v5391_v16 = vsel %vm5235_vm15, %v1825_v2, %v1829_v10  ;;  %v2021_v10 = vrot.slane %v5374_v18, 4  ;;  %v6949_v2 = vrot.slane %v5188_v31, 4 }
 0x293   : > { %v5271_v61 = vpop.permute.xlu0 %1107  ;;  %6944 = vst [vmem:[#allocation33_spill] sm:$0xff] %v5358_v0  ;;  %v1987_v39 = vrot.slane %v5358_v0, 4 }
 0x294   : > { %6934 = vst [vmem:[#allocation26_spill] sm:$0xff] %v5271_v61  ;;  %v5294_v7 = vpop.permute.xlu2 %1174  ;;  %v1797_v61 = vrot.slane %v1796_v26, 4  ;;  %v1685_v26 = vld [vmem:[#allocation2 + $0x6c] sm:$0x1] }
 0x295   : > { %6946 = vst [vmem:[#allocation35_spill] sm:$0xff] %v5391_v16  ;;  %v1988_v33 = vsel %vm911_vm12, %v1987_v39, %v5347_v24  ;;  %v6950_v39 = vrot.slane %v5294_v7, 4 }
 0x296   : > { %v5332_v55 = vsel %vm5235_vm15, %v1797_v61, %v1801_v13  ;;  %v1877_v13 = vshll.u32 %v5003_v43, 16  ;;  %v1883_v61 = vshll.u32 %v1685_v26, 16  ;;  %v1931_v43 = vrot.slane %v5317_v36, 4 }
 0x297   : > { %v5290_v35 = vpop.permute.xlu1 %1160  ;;  %v5368_v26 = vsel %vm5235_vm15, %v1895_v12, %v1899_v37  ;;  %v1965_v29 = vrot.slane %v5332_v55, 4  ;;  %v1231_v37 = vsel %vm911_vm12, %v6949_v2, %v5247_v19  ;;  %v5429_v38 = vperm.slane %v1988_v33, %v4980_v27 }
 0x298   : > { %v1879_v34 = vrot.slane %v1877_v13, 5  ;;  %v1885_v47 = vrot.slane %v1883_v61, 5  ;;  %v1932_v60 = vsel %vm911_vm12, %v1931_v43, %v5253_v52  ;;  %v1943_v13 = vrot.slane %v5380_v59, 4 }
 0x299   : > { %v5377_v54 = vperm.slane %v1932_v60, %v4980_v27  ;;  %v1993_v1 = vrot.slane %v5368_v26, 4  ;;  %v1960_v61 = vsel %vm911_vm12, %v1959_v15, %v5307_v17  ;;  %v1966_v23 = vsel %vm911_vm12, %v1965_v29, %v5313_v57 }
 0x29a   : > { %v1880_v56 = vor.u32 %v1879_v34, %v1876_v3  ;;  %v5411_v58 = vperm.slane %v1960_v61, %v4980_v27  ;;  %v5414_v50 = vperm.slane %v1966_v23, %v4980_v27  ;;  %v1202_v34 = vrot.slane %v5290_v35, 4 }
 0x29b   : > { %v5302_v62 = vpop.permute.xlu0 %1152  ;;  %v1944_v12 = vsel %vm911_vm12, %v1943_v13, %v5377_v54  ;;  %v1994_v43 = vsel %vm911_vm12, %v1993_v1, %v5364_v20  ;;  %v1201_v23 = vperm.slane %v5265_v51, %v4980_v27  ;;  %v1235_v51 = vperm.slane %v1231_v37, %v4980_v27 }
 0x29c   : > { %v1881_v9 = vrot.slane %v1880_v56, 4  ;;  %v5418_v48 = vperm.slane %v1944_v12, %v5021_v53  ;;  %v1971_v44 = vrot.slane %v5414_v50, 4  ;;  %v5432_v35 = vperm.slane %v1994_v43, %v4980_v27  ;;  %v5439_v31 = vpop.permute.xlu2 %1414 }
 0x29d   : > { %v1203_v29 = vsel %vm911_vm12, %v1202_v34, %v5302_v62 }
 0x29e   : > { %v5395_v3 = vsel %vm5235_vm15, %v1881_v9, %v1885_v47  ;;  %6948 = vst [vmem:[#allocation37_spill] sm:$0xff] %v5418_v48  ;;  %v1972_v19 = vsel %vm911_vm12, %v1971_v44, %v5411_v58  ;;  %v1999_v63 = vrot.slane %v5432_v35, 4  ;;  %v2046_v61 = vshrl.u32 %v5418_v48, 16 }
 0x29f   : > { %v5309_v30 = vpop.permute.xlu1 %1166  ;;  %6947 = vst [vmem:[#allocation36_spill] sm:$0xff] %v5395_v3  ;;  %v5457_v1 = vperm.slane %v1972_v19, %v5021_v53 }
 0x2a0   : > { %v1281_v13 = vsel %vm911_vm12, %v6950_v39, %v5309_v30 }
 0x2a1   : > { %6951 = vst [vmem:[#allocation38_spill] sm:$0xff] %v5457_v1  ;;  %v2047_v34 = vshrl.u32 %v5457_v1, 16 }
 0x2a3   : > { %v1159_v8 = vpop.permute.xlu0 %1158 }
 0x2a4   : > { %v1224_v46 = vrot.slane %v1159_v8, 4 }
 0x2a6   : > { %v1225_v25 = vsel %vm911_vm12, %v1224_v46, %v5158_v11  ;;  %v2015_v11 = vrot.slane %v5395_v3, 4  ;;  %v2022_v46 = vsel %vm911_vm12, %v2021_v10, %v5384_v45 }
 0x2a7   : > { %v5353_v6 = vpop.permute.xlu1 %1172  ;;  %v1229_v56 = vperm.slane %v1225_v25, %v4980_v27  ;;  %v5448_v15 = vperm.slane %v2022_v46, %v4980_v27  ;;  %v2000_v25 = vsel %vm911_vm12, %v1999_v63, %v5429_v38  ;;  %v1210_v46 = vrot.slane %v1201_v23, 4 }
 0x2a8   : > { %v2016_v60 = vsel %vm911_vm12, %v2015_v11, %v5391_v16  ;;  %v1252_v33 = vrot.slane %v5353_v6, 4  ;;  %v5468_v30 = vperm.slane %v2000_v25, %v5021_v53  ;;  %v1285_v6 = vperm.slane %v1281_v13, %v4980_v27 }
 0x2a9   : > { %v5445_v9 = vperm.slane %v2016_v60, %v4980_v27  ;;  %v2027_v62 = vrot.slane %v5448_v15, 4  ;;  %v1238_v12 = vrot.slane %v1229_v56, 4 }
 0x2aa   : > { %6952 = vst [vmem:[#allocation39_spill] sm:$0xff] %v5468_v30  ;;  %v2070_v60 = vshrl.u32 %v5468_v30, 16  ;;  %v1294_v13 = vrot.slane %v1285_v6, 4 }
 0x2ab   : > { %v1165_v8 = vpop.permute.xlu0 %1164  ;;  %v2028_v43 = vsel %vm911_vm12, %v2027_v62, %v5445_v9  ;;  %v1239_v63 = vsel %vm911_vm12, %v1235_v51, %v1238_v12 }
 0x2ac   : > { %v5480_v44 = vperm.slane %v2028_v43, %v5021_v53  ;;  %v1253_v19 = vsel %vm911_vm12, %v1252_v33, %v1165_v8  ;;  %v5491_v42 = vperm.slane %v1239_v63, %v5021_v53 }
 0x2ad   : > { %v1257_v43 = vperm.slane %v1253_v19, %v4980_v27 }
 0x2ae   : > { %v2071_v37 = vshrl.u32 %v5480_v44, 16 }
 0x2af   : > { %v1179_v28 = vpop.permute.xlu1 %1178  ;;  %v1266_v63 = vrot.slane %v1257_v43, 4 }
 0x2b0   : > { %v1286_v47 = vrot.slane %v1179_v28, 4  ;;  %v1207_v28 = vperm.slane %v1203_v29, %v4980_v27  ;;  %v2072_v62 = vpack.i.b16 %v2071_v37, %v2070_v60 }
 0x2b2   : > { %v1208_v29 = vrot.slane %v1207_v28, 4  ;;  %v1211_v39 = vsel %vm911_vm12, %v1207_v28, %v1210_v46  ;;  %v2095_v28 = vunpack.c.l.b16 %v2072_v62 }
 0x2b3   : > { %v1171_v10 = vpop.permute.xlu0 %1170  ;;  %v5494_v8 = vperm.slane %v1211_v39, %v5021_v53 }
 0x2b4   : > { %v1287_v7 = vsel %vm911_vm12, %v1286_v47, %v1171_v10  ;;  %v2048_v47 = vpack.i.b16 %v2047_v34, %v2046_v61  ;;  %v1236_v10 = vrot.slane %v1235_v51, 4  ;;  %v5488_v34 = vpop.permute.xlu2 %1420  ;;  %v1209_v51 = vsel %vm911_vm12, %v1208_v29, %v1201_v23 }
 0x2b5   : > { %v1291_v11 = vperm.slane %v1287_v7, %v4980_v27 }
 0x2b6   : > { %v2094_v7 = vunpack.c.l.b16 %v2048_v47  ;;  %v1237_v33 = vsel %vm911_vm12, %v1236_v10, %v1229_v56  ;;  %v1324_v56 = vshrl.u32 %v5491_v42, 16  ;;  %v1215_v10 = vperm.slane %v1209_v51, %v5021_v53 }
 0x2b7   : > { %v5477_v2 = vpop.permute.xlu1 %1412  ;;  %v1292_v25 = vrot.slane %v1291_v11, 4  ;;  %v1295_v60 = vsel %vm911_vm12, %v1291_v11, %v1294_v13  ;;  %v1243_v37 = vperm.slane %v1237_v33, %v5021_v53  ;;  %v1322_v13 = vpack.i.b16 %v5491_v42, %v5494_v8 }
 0x2b8   : > { %v2096_v19 = vpack.c.b16 %v2095_v28, %v2094_v7  ;;  %v5509_v23 = vperm.slane %v1295_v60, %v5021_v53  ;;  %v1311_v32 = vshrl.u32 %v1215_v10, 16  ;;  %v1220_v40 = vrot.slane %v1215_v10, 4 }
 0x2b9   : > { %v1293_v47 = vsel %vm911_vm12, %v1292_v25, %v1285_v6  ;;  %v1323_v6 = vshrl.u32 %v5494_v8, 16  ;;  %v1312_v33 = vshrl.u32 %v1243_v37, 16 }
 0x2ba   : > { %2097 = vrot.lane.b32.xlu2 %v2096_v19, %s4408_s21  ;;  %v1348_v60 = vshrl.u32 %v5509_v23, 16 }
 0x2bb   : > { %v1177_v61 = vpop.permute.xlu0 %1176 }
 0x2bc   : > { %v1258_v12 = vrot.slane %v1177_v61, 4  ;;  %v1325_v61 = vpack.i.b16 %v1324_v56, %v1323_v6  ;;  %v5526_v19 = vpop.permute.xlu2 %1426 }
 0x2be   : > { %v1259_v46 = vsel %vm911_vm12, %v1258_v12, %v5249_v21  ;;  %v1299_v21 = vperm.slane %v1293_v47, %v5021_v53  ;;  %v1310_v12 = vpack.i.b16 %v1243_v37, %v1215_v10  ;;  %v1379_v49 = vunpack.c.l.b16 %v1325_v61 }
 0x2bf   : > { %v1263_v39 = vperm.slane %v1259_v46, %v4980_v27  ;;  %v5504_v41 = vpop.permute.xlu1 %1418  ;;  %v1374_v46 = vunpack.c.l.b16 %v1322_v13 }
 0x2c1   : > { %v1264_v11 = vrot.slane %v1263_v39, 4  ;;  %v1267_v29 = vsel %vm911_vm12, %v1263_v39, %v1266_v63  ;;  %v1336_v63 = vshrl.u32 %v1299_v21, 16  ;;  %v1248_v39 = vrot.slane %v1243_v37, 4 }
 0x2c2   : > { %v5518_v25 = vperm.slane %v1267_v29, %v5021_v53  ;;  %v1304_v29 = vrot.slane %v1299_v21, 4 }
 0x2c3   : > { %v1265_v62 = vsel %vm911_vm12, %v1264_v11, %v1257_v43  ;;  %v1411_v7 = vpop.permute.xlu0 %1410  ;;  %v5532_v13 = vsel %vm911_vm12, 0, %v1248_v39 }
 0x2c4   : > { %v1346_v28 = vpack.i.b16 %v5509_v23, %v5518_v25  ;;  %v1347_v51 = vshrl.u32 %v5518_v25, 16  ;;  %v1271_v47 = vperm.slane %v1265_v62, %v5021_v53  ;;  %v5535_v37 = vsel %vm911_vm12, 0, %v1304_v29 }
 0x2c6   : > { %v1375_v43 = vunpack.c.l.b16 %v1346_v28  ;;  %v1349_v11 = vpack.i.b16 %v1348_v60, %v1347_v51  ;;  %v1335_v56 = vshrl.u32 %v1271_v47, 16  ;;  %v1276_v6 = vrot.slane %v1271_v47, 4 }
 0x2c7   : > { %v1425_v62 = vpop.permute.xlu1 %1424  ;;  %v1313_v51 = vpack.i.b16 %v1312_v33, %v1311_v32  ;;  %v5541_v60 = vsel %vm911_vm12, 0, %v1220_v40  ;;  %v1334_v29 = vpack.i.b16 %v1299_v21, %v1271_v47 }
 0x2c8   : > { %v1376_v22 = vpack.c.b16 %v1375_v43, %v1374_v46  ;;  %v1380_v17 = vunpack.c.l.b16 %v1349_v11  ;;  %v1337_v0 = vpack.i.b16 %v1336_v63, %v1335_v56  ;;  %v5529_v16 = vsel %vm911_vm12, 0, %v1276_v6 }
 0x2c9   : > { %v1340_v10 = vpack.i.b16 %v5535_v37, %v5529_v16  ;;  %v1492_v46 = vrot.slane %v1425_v62, 4  ;;  %v1316_v39 = vpack.i.b16 %v5532_v13, %v5541_v60  ;;  %v1359_v43 = vunpack.c.l.b16 %v1313_v51 }
 0x2ca   : > { %1377 = vrot.lane.b32.xlu2 %v1376_v22, %s4407_s18  ;;  %v1381_v28 = vpack.c.b16 %v1380_v17, %v1379_v49  ;;  %v1360_v63 = vunpack.c.l.b16 %v1337_v0  ;;  %v5546_v22 = vunpack.c.l.b16 %v1310_v12  ;;  %v5548_v32 = vunpack.c.l.b16 %v1334_v29  ;;  %v5551_v17 = vpop.permute.xlu2 %1432 }
 0x2cb   : > { %v1417_v61 = vpop.permute.xlu0 %1416  ;;  %v1365_v11 = vunpack.c.l.b16 %v1340_v10  ;;  %v1486_v49 = vrot.slane %v5488_v34, 4  ;;  %v1364_v56 = vunpack.c.l.b16 %v1316_v39  ;;  %v1458_v6 = vrot.slane %v5504_v41, 4 }
 0x2cc   : > { %1382 = vrot.lane.b32.xlu0 %v1381_v28, %s4409_s19  ;;  %v1493_v40 = vsel %vm911_vm12, %v1492_v46, %v1417_v61  ;;  %v1361_v33 = vpack.c.b16 %v1360_v63, %v1359_v43 }
 0x2cd   : > { %v1366_v21 = vpack.c.b16 %v1365_v11, %v1364_v56  ;;  %v1497_v12 = vperm.slane %v1493_v40, %v4980_v27  ;;  %v1487_v34 = vsel %vm911_vm12, %v1486_v49, %v5477_v2  ;;  %v1459_v28 = vsel %vm911_vm12, %v1458_v6, %v1411_v7 }
 0x2ce   : > { %v1491_v10 = vperm.slane %v1487_v34, %v4980_v27  ;;  %v1463_v63 = vperm.slane %v1459_v28, %v4980_v27  ;;  %v1250_v34 = vrot.slane %v5491_v42, 4 }
 0x2cf   : > { %v1498_v41 = vrot.slane %v1497_v12, 4  ;;  %v1431_v61 = vpop.permute.xlu1 %1430 }
 0x2d0   : > { %v1500_v43 = vrot.slane %v1491_v10, 4  ;;  %v1472_v7 = vrot.slane %v1463_v63, 4 }
 0x2d1   : > { %v1499_v2 = vsel %vm911_vm12, %v1498_v41, %v1491_v10  ;;  %v1306_v10 = vrot.slane %v5509_v23, 4 }
 0x2d2   : > { %1362 = vrot.lane.b32.xlu2 %v1361_v33, %s4408_s21  ;;  %v1439_v29 = vpop.permute.xlu2 %1438  ;;  %v5574_v33 = vperm.slane %v1499_v2, %v5021_v53  ;;  %v1501_v6 = vsel %vm911_vm12, %v1497_v12, %v1500_v43 }
 0x2d3   : > { %v1423_v47 = vpop.permute.xlu0 %1422  ;;  %v1520_v40 = vrot.slane %v1439_v29, 4  ;;  %v1509_v41 = vperm.slane %v1501_v6, %v5021_v53  ;;  %v5590_v29 = vsel %vm911_vm12, 0, %v1306_v10 }
 0x2d4   : > { %v1464_v62 = vrot.slane %v1423_v47, 4  ;;  %1367 = vrot.lane.b32.xlu0 %v1366_v21, %s4411_s1  ;;  %v1222_v47 = vrot.slane %v5494_v8, 4  ;;  %v1251_v8 = vsel %vm911_vm12, 0, %v1250_v34 }
 0x2d5   : > { %v1521_v21 = vsel %vm911_vm12, %v1520_v40, %v1431_v61  ;;  %v1512_v2 = vrot.slane %v1509_v41, 4  ;;  %v1330_v34 = vshrl.u32 %v1251_v8, 16  ;;  %v1586_v0 = vshrl.u32 %v1509_v41, 16 }
 0x2d6   : > { %v1465_v51 = vsel %vm911_vm12, %v1464_v62, %v5439_v31  ;;  %v1223_v61 = vsel %vm911_vm12, 0, %v1222_v47 }
 0x2d7   : > { %v1469_v46 = vperm.slane %v1465_v51, %v4980_v27  ;;  %v1437_v28 = vpop.permute.xlu1 %1436  ;;  %v1329_v6 = vshrl.u32 %v1223_v61, 16  ;;  %v5605_v62 = vsel %vm911_vm12, 0, %v1512_v2 }
 0x2d8   : > { %v1542_v12 = vrot.slane %v1437_v28, 4 }
 0x2d9   : > { %v1470_v39 = vrot.slane %v1469_v46, 4  ;;  %v1473_v56 = vsel %vm911_vm12, %v1469_v46, %v1472_v7  ;;  %v1525_v46 = vperm.slane %v1521_v21, %v4980_v27 }
 0x2da   : > { %v1481_v51 = vperm.slane %v1473_v56, %v5021_v53  ;;  %v1328_v56 = vpack.i.b16 %v1251_v8, %v1223_v61 }
 0x2db   : > { %v1471_v11 = vsel %vm911_vm12, %v1470_v39, %v1463_v63  ;;  %v1429_v49 = vpop.permute.xlu0 %1428  ;;  %v1526_v7 = vrot.slane %v1525_v46, 4 }
 0x2dc   : > { %v5571_v31 = vperm.slane %v1471_v11, %v5021_v53  ;;  %v1484_v42 = vrot.slane %v1481_v51, 4  ;;  %v1510_v11 = vrot.slane %v5574_v33, 4  ;;  %v1543_v21 = vsel %vm911_vm12, %v1542_v12, %v1429_v49 }
 0x2dd   : > { %v1585_v47 = vshrl.u32 %v1481_v51, 16  ;;  %v1547_v12 = vperm.slane %v1543_v21, %v4980_v27  ;;  %v5623_v24 = vunpack.c.l.b16 %v1328_v56  ;;  %v5625_v21 = vpack.i.b16 %v1330_v34, %v1329_v6 }
 0x2de   : > { %v1482_v23 = vrot.slane %v5571_v31, 4  ;;  %v5611_v49 = vsel %vm911_vm12, 0, %v1510_v11 }
 0x2e0   : > { %v5608_v61 = vsel %vm911_vm12, 0, %v1482_v23  ;;  %v1573_v23 = vshrl.u32 %v5571_v31, 16 }
 0x2e1   : > { %v1579_v11 = vshrl.u32 %v5608_v61, 16 }
 0x2e3   : > { %v1435_v63 = vpop.permute.xlu0 %1434 }
 0x2e4   : > { %v1514_v39 = vrot.slane %v1435_v63, 4 }
 0x2e6   : > { %v1515_v43 = vsel %vm911_vm12, %v1514_v39, %v5526_v19  ;;  %v5601_v19 = vsel %vm911_vm12, 0, %v1484_v42  ;;  %v1278_v39 = vrot.slane %v5518_v25, 4 }
 0x2e7   : > { %v1519_v40 = vperm.slane %v1515_v43, %v4980_v27  ;;  %v1590_v2 = vpack.i.b16 %v5605_v62, %v5601_v19 }
 0x2e9   : > { %v1527_v10 = vsel %vm911_vm12, %v1526_v7, %v1519_v40  ;;  %v1528_v63 = vrot.slane %v1519_v40, 4  ;;  %v1584_v7 = vpack.i.b16 %v1509_v41, %v1481_v51  ;;  %v1587_v40 = vpack.i.b16 %v1586_v0, %v1585_v47 }
 0x2ea   : > { %v5615_v8 = vperm.slane %v1527_v10, %v5021_v53  ;;  %v1574_v51 = vshrl.u32 %v5574_v33, 16  ;;  %v1580_v0 = vshrl.u32 %v5611_v49, 16  ;;  %v5632_v41 = vsel %vm911_vm12, 0, %v1278_v39 }
 0x2eb   : > { %v1441_v43 = vpop.permute.xlu0 %1440  ;;  %v1529_v42 = vsel %vm911_vm12, %v1525_v46, %v1528_v63  ;;  %v1556_v46 = vrot.slane %v1547_v12, 4  ;;  %v1636_v63 = vunpack.c.l.b16 %v1584_v7  ;;  %v1641_v56 = vunpack.c.l.b16 %v1587_v40 }
 0x2ec   : > { %v1548_v25 = vrot.slane %v1441_v43, 4  ;;  %v1537_v28 = vperm.slane %v1529_v42, %v5021_v53  ;;  %v1538_v43 = vrot.slane %v5615_v8, 4  ;;  %v1646_v42 = vunpack.c.l.b16 %v1590_v2 }
 0x2ed   : > { %v5636_v6 = vpack.i.b16 %v1574_v51, %v1573_v23  ;;  %v5641_v52 = vpack.i.b16 %v1580_v0, %v1579_v11  ;;  %v1955_v7 = vrot.slane %v5418_v48, 4  ;;  %v1983_v40 = vrot.slane %v5457_v1, 4 }
 0x2ee   : > { %v1549_v10 = vsel %vm911_vm12, %v1548_v25, %v5551_v17  ;;  %v1540_v14 = vrot.slane %v1537_v28, 4  ;;  %v1609_v23 = vshrl.u32 %v1537_v28, 16  ;;  %v1539_v51 = vsel %vm911_vm12, 0, %v1538_v43 }
 0x2ef   : > { %v1553_v47 = vperm.slane %v1549_v10, %v4980_v27  ;;  %v1597_v10 = vshrl.u32 %v5615_v8, 16  ;;  %v2001_v17 = vrot.slane %v5429_v38, 4 }
 0x2f0   : > { %v5654_v0 = vsel %vm911_vm12, 0, %v1540_v14 }
 0x2f1   : > { %v1554_v34 = vrot.slane %v1553_v47, 4  ;;  %v1557_v25 = vsel %vm911_vm12, %v1553_v47, %v1556_v46  ;;  %v2002_v1 = vsel %vm911_vm12, %v5432_v35, %v2001_v17 }
 0x2f2   : > { %v1565_v39 = vperm.slane %v1557_v25, %v5021_v53  ;;  %v2011_v25 = vrot.slane %v5468_v30, 4  ;;  %v2039_v30 = vrot.slane %v5480_v44, 4 }
 0x2f3   : > { %v1555_v2 = vsel %vm911_vm12, %v1554_v34, %v1547_v12  ;;  %v2029_v12 = vrot.slane %v5445_v9, 4  ;;  %v5669_v9 = vperm.slane %v2002_v1, %v5021_v53 }
 0x2f4   : > { %v1608_v27 = vpack.i.b16 %v1565_v39, %v1537_v28  ;;  %v1610_v46 = vshrl.u32 %v1565_v39, 16  ;;  %v1568_v47 = vrot.slane %v1565_v39, 4  ;;  %v5651_v11 = vperm.slane %v1555_v2, %v5021_v53 }
 0x2f5   : > { %v1603_v2 = vshrl.u32 %v1539_v51, 16 }
 0x2f6   : > { %v1637_v34 = vunpack.c.l.b16 %v1608_v27  ;;  %v1611_v43 = vpack.i.b16 %v1610_v46, %v1609_v23  ;;  %v5661_v38 = vsel %vm911_vm12, 0, %v1568_v47  ;;  %v1598_v28 = vshrl.u32 %v5651_v11, 16 }
 0x2f7   : > { %v1614_v39 = vpack.i.b16 %v5661_v38, %v5654_v0  ;;  %v1566_v14 = vrot.slane %v5651_v11, 4  ;;  %v1945_v23 = vrot.slane %v5377_v54, 4  ;;  %v2030_v46 = vsel %vm911_vm12, %v5448_v15, %v2029_v12 }
 0x2f8   : > { %v1638_v48 = vpack.c.b16 %v1637_v34, %v1636_v63  ;;  %v1642_v3 = vunpack.c.l.b16 %v1611_v43  ;;  %v1599_v35 = vpack.i.b16 %v1598_v28, %v1597_v10  ;;  %v1973_v63 = vrot.slane %v5411_v58, 4 }
 0x2f9   : > { %v1647_v27 = vunpack.c.l.b16 %v1614_v39  ;;  %v1567_v17 = vsel %vm911_vm12, 0, %v1566_v14  ;;  %v5678_v10 = vsel %vm911_vm12, 0, %v1955_v7  ;;  %v5681_v1 = vperm.slane %v2030_v46, %v5021_v53 }
 0x2fa   : > { %1639 = vrot.lane.b32.xlu1 %v1638_v48, %s4407_s18  ;;  %v1643_v47 = vpack.c.b16 %v1642_v3, %v1641_v56  ;;  %v1602_v4 = vpack.i.b16 %v1567_v17, %v1539_v51  ;;  %v1604_v45 = vshrl.u32 %v1567_v17, 16  ;;  %v2082_v43 = vshrl.u32 %v5669_v9, 16 }
 0x2fb   : > { %v1648_v34 = vpack.c.b16 %v1647_v27, %v1646_v42  ;;  %v1622_v54 = vunpack.c.l.b16 %v1599_v35  ;;  %v5686_v48 = vsel %vm911_vm12, 0, %v1983_v40  ;;  %v5689_v3 = vsel %vm911_vm12, 0, %v2011_v25 }
 0x2fc   : > { %1644 = vrot.lane.b32.xlu2 %v1643_v47, %s4409_s19  ;;  %v1605_v15 = vpack.i.b16 %v1604_v45, %v1603_v2  ;;  %v5693_v58 = vsel %vm911_vm12, 0, %v2039_v30  ;;  %v1946_v56 = vsel %vm911_vm12, %v5380_v59, %v1945_v23  ;;  %v2083_v42 = vshrl.u32 %v5681_v1, 16 }
 0x2fd   : > { %1649 = vrot.lane.b32.xlu0 %v1648_v34, %s4412_s17  ;;  %v2081_v7 = vpack.i.b16 %v5681_v1, %v5669_v9  ;;  %v1621_v45 = vunpack.c.l.b16 %v5636_v6  ;;  %v1627_v40 = vunpack.c.l.b16 %v1602_v4  ;;  %v1353_v51 = vshrl.u32 %v5632_v41, 16 }
 0x2fe   : > { %v1974_v25 = vsel %vm911_vm12, %v5414_v50, %v1973_v63  ;;  %v1632_v12 = vunpack.c.l.b16 %v1605_v15  ;;  %v1352_v30 = vpack.i.b16 %v5590_v29, %v5632_v41  ;;  %v2051_v59 = vpack.i.b16 %v5686_v48, %v5678_v10 }
 0x2ff   : > { %v5708_v28 = vpack.i.b16 %v2083_v42, %v2082_v43  ;;  %v1623_v39 = vpack.c.b16 %v1622_v54, %v1621_v45  ;;  %v6953_v14 = vpack.i.b16 %v5611_v49, %v5608_v61  ;;  %v2075_v4 = vpack.i.b16 %v5693_v58, %v5689_v3 }
 0x300   : > { %v1954_v2 = vperm.slane %v1946_v56, %v5021_v53  ;;  %v1631_v50 = vunpack.c.l.b16 %v5641_v52  ;;  %v1317_v35 = vshrl.u32 %v5541_v60, 16  ;;  %v1318_v41 = vshrl.u32 %v5532_v13, 16 }
 0x301   : > { %v1626_v6 = vunpack.c.l.b16 %v6953_v14  ;;  %v1982_v27 = vperm.slane %v1974_v25, %v5021_v53  ;;  %v6954_v23 = vshrl.u32 %v5590_v29, 16  ;;  %v1341_v49 = vshrl.u32 %v5529_v16, 16 }
 0x302   : > { %1624 = vrot.lane.b32.xlu1 %v1623_v39, %s4408_s21  ;;  %v1342_v46 = vshrl.u32 %v5535_v37, 16  ;;  %v1633_v47 = vpack.c.b16 %v1632_v12, %v1631_v50  ;;  %v1385_v63 = vunpack.c.l.b16 %v1352_v30  ;;  %v1389_v52 = vunpack.c.l.b16 %v5625_v21 }
 0x303   : > { %v1628_v17 = vpack.c.b16 %v1627_v40, %v1626_v6  ;;  %v1355_v61 = vpack.i.b16 %v6954_v23, %v1353_v51  ;;  %v2099_v34 = vunpack.c.l.b16 %v2051_v59  ;;  %v2100_v13 = vunpack.c.l.b16 %v2075_v4 }
 0x304   : > { %v2058_v60 = vshrl.u32 %v1954_v2, 16  ;;  %v2013_v43 = vrot.slane %v5669_v9, 4  ;;  %v2041_v54 = vrot.slane %v5681_v1, 4  ;;  %v2059_v29 = vshrl.u32 %v1982_v27, 16 }
 0x305   : > { %1629 = vrot.lane.b32.xlu2 %v1628_v17, %s4411_s1  ;;  %1634 = vrot.lane.b32.xlu0 %v1633_v47, %s4410_s0  ;;  %v1957_v15 = vrot.slane %v1954_v2, 4  ;;  %v1985_v16 = vrot.slane %v1982_v27, 4  ;;  %v1596_v37 = vpack.i.b16 %v5651_v11, %v5615_v8  ;;  %v1390_v56 = vunpack.c.l.b16 %v1355_v61 }
 0x306   : > { %v1343_v42 = vpack.i.b16 %v1342_v46, %v1341_v49  ;;  %v5733_v21 = vsel %vm911_vm12, 0, %v2013_v43  ;;  %v2042_v45 = vsel %vm911_vm12, 0, %v2041_v54  ;;  %v1386_v40 = vpack.c.b16 %v1385_v63, %v5623_v24 }
 0x307   : > { %v2088_v9 = vshrl.u32 %v5733_v21, 16  ;;  %v2089_v1 = vshrl.u32 %v2042_v45, 16  ;;  %v6955_v51 = vpack.i.b16 %v5574_v33, %v5571_v31  ;;  %v2101_v12 = vpack.c.b16 %v2100_v13, %v2099_v34 }
 0x308   : > { %v2057_v30 = vpack.i.b16 %v1982_v27, %v1954_v2  ;;  %v2087_v8 = vpack.i.b16 %v2042_v45, %v5733_v21  ;;  %v5744_v11 = vunpack.c.l.b16 %v1596_v37  ;;  %v2060_v59 = vpack.i.b16 %v2059_v29, %v2058_v60 }
 0x309   : > { %v5741_v25 = vunpack.c.l.b16 %v6955_v51  ;;  %v1958_v39 = vsel %vm911_vm12, 0, %v1957_v15  ;;  %v1986_v14 = vsel %vm911_vm12, 0, %v1985_v16  ;;  %v2090_v24 = vpack.i.b16 %v2089_v1, %v2088_v9 }
 0x30a   : > { %1387 = vrot.lane.b32.xlu1 %v1386_v40, %s4412_s17  ;;  %v1391_v6 = vpack.c.b16 %v1390_v56, %v1389_v52  ;;  %v1319_v4 = vpack.i.b16 %v1318_v41, %v1317_v35  ;;  %v1370_v33 = vunpack.c.l.b16 %v1343_v42  ;;  %v1616_v2 = vshrl.u32 %v5661_v38, 16 }
 0x30b   : > { %v1620_v31 = vpack.c.b16 %v5744_v11, %v5741_v25  ;;  %v2109_v50 = vunpack.c.l.b16 %v2057_v30  ;;  %v2110_v27 = vunpack.c.l.b16 %v2081_v7  ;;  %v2064_v17 = vshrl.u32 %v1958_v39, 16  ;;  %v6957_v30 = vld [vmem:[#allocation34_spill] sm:$0xff] }
 0x30c   : > { %v2065_v23 = vshrl.u32 %v1986_v14, 16  ;;  %v2114_v61 = vunpack.c.l.b16 %v2060_v59  ;;  %v2115_v49 = vunpack.c.l.b16 %v5708_v28  ;;  %v1591_v46 = vshrl.u32 %v5601_v19, 16  ;;  %v6959_v59 = vld [vmem:[#allocation36_spill] sm:$0xff] }
 0x30d   : > { %1392 = vrot.lane.b32.xlu2 %v1391_v6, %s4413_s16  ;;  %2102 = vrot.lane.b32.xlu0 %v2101_v12, %s4411_s1  ;;  %v1369_v35 = vunpack.c.l.b16 %v1319_v4  ;;  %v1615_v41 = vshrl.u32 %v5654_v0, 16  ;;  %v1592_v47 = vshrl.u32 %v5605_v62, 16  ;;  %v2111_v52 = vpack.c.b16 %v2110_v27, %v2109_v50  ;;  %v2676_v27 = vld [vmem:[#allocation2 + $0x38] sm:$0xe] }
 0x30e   : > { %v2066_v34 = vpack.i.b16 %v2065_v23, %v2064_v17  ;;  %v2116_v13 = vpack.c.b16 %v2115_v49, %v2114_v61  ;;  %v2052_v60 = vshrl.u32 %v5678_v10, 16  ;;  %v2053_v43 = vshrl.u32 %v5686_v48, 16  ;;  %v2671_v61 = vld [vmem:[#allocation2 + $0x10] sm:$0xe] }
 0x30f   : > { %v1371_v63 = vpack.c.b16 %v1370_v33, %v1369_v35  ;;  %v1617_v38 = vpack.i.b16 %v1616_v2, %v1615_v41  ;;  %v1593_v7 = vpack.i.b16 %v1592_v47, %v1591_v46  ;;  %v2076_v28 = vshrl.u32 %v5689_v3, 16  ;;  %v6964_v33 = vld [vmem:[#allocation33_spill] sm:$0xff]  ;;  %v6965_v2 = vld [vmem:[#allocation28_spill] sm:$0xff]  ;;  %v6966_v46 = vld [vmem:[#allocation31_spill] sm:$0xff] }
 0x310   : > { %v2077_v19 = vshrl.u32 %v5693_v58, 16  ;;  %v2124_v62 = vunpack.c.l.b16 %v2066_v34  ;;  %v2125_v0 = vunpack.c.l.b16 %v2090_v24  ;;  %v2054_v15 = vpack.i.b16 %v2053_v43, %v2052_v60  ;;  %v6963_v24 = vld [vmem:[#allocation35_spill] sm:$0xff]  ;;  %v4243_v47 = vld [vmem:[#allocation2 + $0x3c] sm:$0x1] }
 0x311   : > { %v1652_v54 = vunpack.c.l.b16 %v1617_v38  ;;  %v1651_v29 = vunpack.c.l.b16 %v1593_v7  ;;  %v2063_v42 = vpack.i.b16 %v1986_v14, %v1958_v39  ;;  %v2120_v45 = vunpack.c.l.b16 %v2087_v8  ;;  %v6958_v8 = vld [vmem:[#allocation27_spill] sm:$0xff]  ;;  %v6961_v39 = vld [vmem:[#allocation29_spill] sm:$0xff]  ;;  %v6962_v14 = vld [vmem:[#allocation32_spill] sm:$0xff] }
 0x312   : > { %1372 = vrot.lane.b32.xlu1 %v1371_v63, %s4410_s0  ;;  %v2078_v16 = vpack.i.b16 %v2077_v19, %v2076_v28  ;;  %v2126_v56 = vpack.c.b16 %v2125_v0, %v2124_v62  ;;  %v2104_v48 = vunpack.c.l.b16 %v2054_v15  ;;  %v6956_v51 = vpack.c.b16 %v5548_v32, %v5546_v22  ;;  %v6960_v22 = vld [vmem:[#allocation25_spill] sm:$0xff]  ;;  %v4244_v7 = vld [vmem:[#allocation2 + $0x14] sm:$0x1]  ;;  %v2683_v43 = vld [vmem:[#allocation2 + $0x70] sm:$0xe] }
 0x313   : > { %v1653_v37 = vpack.c.b16 %v1652_v54, %v1651_v29  ;;  %v2119_v21 = vunpack.c.l.b16 %v2063_v42  ;;  %v2782_v35 = vrot.slane %v6966_v46, 5  ;;  %v2750_v63 = vrot.slane %v4243_v47, 5  ;;  %v6969_v54 = vld [vmem:[#allocation37_spill] sm:$0xff]  ;;  %v6970_v62 = vld [vmem:[#allocation38_spill] sm:$0xff] }
 0x314   : > { %v5766_v10 = vpop.permute.xlu2 %2097  ;;  %v2105_v3 = vunpack.c.l.b16 %v2078_v16  ;;  %v2730_v60 = vrot.slane %v4244_v7, 5  ;;  %v2045_v0 = vpack.i.b16 %v6970_v62, %v6969_v54  ;;  %v2673_v16 = vld [vmem:[#allocation2 + $0x20] sm:$0xe]  ;;  %v4053_v42 = vrot.slane %v2683_v43, 9  ;;  %v4248_v47 = vld [vmem:[#allocation2 + $0x4] sm:$0x1] }
 0x315   : > { %2112 = vrot.lane.b32.xlu2 %v2111_v52, %s4407_s18  ;;  %2117 = vrot.lane.b32.xlu0 %v2116_v13, %s4409_s19  ;;  %v2121_v9 = vpack.c.b16 %v2120_v45, %v2119_v21  ;;  %v4041_v13 = vrot.slane %v2671_v61, 9  ;;  %v6972_v21 = vld [vmem:[#allocation30_spill] sm:$0xff] }
 0x316   : > { %v2106_v58 = vpack.c.b16 %v2105_v3, %v2104_v48  ;;  %v6971_v3 = vld [vmem:[#allocation39_spill] sm:$0xff]  ;;  %v2778_v45 = vrot.slane %v6972_v21, 5  ;;  %v2091_v11 = vunpack.c.l.b16 %v2045_v0 }
 0x317   : > { %v2674_v7 = vld [vmem:[#allocation2 + $0x28] sm:$0xe] }
 0x318   : > { %v4044_v0 = vrot.slane %v2674_v7, 9  ;;  %v2670_v7 = vld [vmem:[#allocation2 + $0x8] sm:$0xe] }
 0x31a   : > { %1654 = vrot.lane.b32.xlu1 %v1653_v37, %s4413_s16  ;;  %v2680_v37 = vld [vmem:[#allocation2 + $0x58] sm:$0xe] }
 0x31d   : > { %2127 = vrot.lane.b32.xlu2 %v2126_v56, %s4413_s16  ;;  %2157 = vrot.lane.b32.xlu0 %v5328_v5, %s4404_s23  ;;  %v4245_v56 = vld [vmem:[#allocation2 + $0x5c] sm:$0x1] }
 0x31e   : > { %v2766_v48 = vrot.slane %v4245_v56, 5 }
 0x322   : > { %2107 = vrot.lane.b32.xlu1 %v2106_v58, %s4410_s0  ;;  %v2069_v58 = vpack.i.b16 %v5480_v44, %v6971_v3  ;;  %v4043_v44 = vrot.slane %v2673_v16, 9 }
 0x324   : > { %v5772_v40 = vpop.permute.xlu2 %1377 }
 0x325   : > { %2173 = vrot.lane.b32.xlu2 %v5368_v26, %s4404_s23  ;;  %2175 = vrot.lane.b32.xlu0 %v5374_v18, %s4404_s23 }
 0x32a   : > { %2122 = vrot.lane.b32.xlu1 %v2121_v9, %s4412_s17  ;;  %v4050_v9 = vrot.slane %v2680_v37, 9 }
 0x32c   : > { %v1363_v1 = vpop.permute.xlu2 %1362 }
 0x32d   : > { %2151 = vrot.lane.b32.xlu2 %v5313_v57, %s4404_s23  ;;  %v1396_v12 = vsel %vm1109_vm0, %v6956_v51, %v1363_v1  ;;  %2153 = vrot.lane.b32.xlu0 %v5317_v36, %s4404_s23  ;;  %v5878_v51 = vsel %vm5849_vm4, %v4041_v13, %v2730_v60 }
 0x332   : > { %2159 = vrot.lane.b32.xlu1 %v5332_v55, %s4404_s23 }
 0x335   : > { %2165 = vrot.lane.b32.xlu2 %v5364_v20, %s4404_s23  ;;  %2167 = vrot.lane.b32.xlu0 %v6957_v30, %s4404_s23 }
 0x33a   : > { %2149 = vrot.lane.b32.xlu1 %v6958_v8, %s4404_s23 }
 0x33d   : > { %2171 = vrot.lane.b32.xlu2 %v6959_v59, %s4404_s23  ;;  %2145 = vrot.lane.b32.xlu0 %v6960_v22, %s4404_s23 }
 0x33e   : > { %v5799_v32 = vpop.permute.xlu0 %1382 }
 0x342   : > { %2155 = vrot.lane.b32.xlu1 %v6961_v39, %s4404_s23 }
 0x345   : > { %2161 = vrot.lane.b32.xlu2 %v6962_v14, %s4404_s23  ;;  %2163 = vrot.lane.b32.xlu0 %v6963_v24, %s4404_s23 }
 0x346   : > { %v1368_v6 = vpop.permute.xlu0 %1367 }
 0x347   : > { %v5808_v4 = vsel %vm1113_vm1, %v1396_v12, %v1368_v6 }
 0x34a   : > { %2169 = vrot.lane.b32.xlu1 %v6964_v33, %s4404_s23 }
 0x34d   : > { %2421 = vrot.lane.b32.xlu2 %v5332_v55, %s4414_s9  ;;  %2435 = vrot.lane.b32.xlu0 %v5368_v26, %s4414_s9  ;;  %v2675_v26 = vld [vmem:[#allocation2 + $0x30] sm:$0xe] }
 0x352   : > { %2147 = vrot.lane.b32.xlu1 %v6965_v2, %s4404_s23 }
 0x355   : > { %2411 = vrot.lane.b32.xlu2 %v6958_v8, %s4414_s9  ;;  %2413 = vrot.lane.b32.xlu0 %v5313_v57, %s4414_s9 }
 0x356   : > { %v5822_v50 = vpop.permute.xlu2 %1644 }
 0x35a   : > { %2419 = vrot.lane.b32.xlu1 %v5328_v5, %s4414_s9  ;;  %v2684_v5 = vld [vmem:[#allocation2 + $0x78] sm:$0xe] }
 0x35b   : > { %v4054_v49 = vrot.slane %v2684_v5, 9  ;;  %v2679_v5 = vld [vmem:[#allocation2 + $0x50] sm:$0xe] }
 0x35c   : > { %v4049_v46 = vrot.slane %v2679_v5, 9 }
 0x35d   : > { %2417 = vrot.lane.b32.xlu2 %v6961_v39, %s4414_s9  ;;  %2427 = vrot.lane.b32.xlu0 %v5364_v20, %s4414_s9  ;;  %v4045_v20 = vrot.slane %v2675_v26, 9  ;;  %v5860_v19 = vsel %vm5849_vm4, %v4054_v49, %v2782_v35 }
 0x35e   : > { %v2890_v15 = vrot.slane %v5860_v19, 4 }
 0x35f   : > { %v1630_v55 = vpop.permute.xlu2 %1629 }
 0x362   : > { %2437 = vrot.lane.b32.xlu1 %v5374_v18, %s4414_s9  ;;  %v4242_v18 = vld [vmem:[#allocation2 + $0x34] sm:$0x1] }
 0x363   : > { %v2746_v23 = vrot.slane %v4242_v18, 5 }
 0x365   : > { %2431 = vrot.lane.b32.xlu2 %v6964_v33, %s4414_s9  ;;  %2433 = vrot.lane.b32.xlu0 %v6959_v59, %s4414_s9  ;;  %v5855_v34 = vsel %vm5849_vm4, %v4045_v20, %v2746_v23  ;;  %v5888_v59 = vsel %vm5849_vm4, %v4050_v9, %v2766_v48  ;;  %v6973_v23 = vld [vmem:[#allocation14_spill] sm:$0xff] }
 0x366   : > { %v2806_v28 = vrot.slane %v5855_v34, 4  ;;  %v5897_v25 = vsel %vm911_vm12, %v2890_v15, %v5888_v59  ;;  %v4249_v15 = vld [vmem:[#allocation2 + $0x2c] sm:$0x1] }
 0x367   : > { %v5836_v57 = vpop.permute.xlu2 %1392  ;;  %v2742_v16 = vrot.slane %v4249_v15, 5 }
 0x368   : > { %v2807_v6 = vsel %vm911_vm12, %v2806_v28, %v5878_v51 }
 0x369   : > { %v2811_v61 = vperm.slane %v2807_v6, %v6973_v23  ;;  %v5949_v9 = vsel %vm5849_vm4, %v4044_v0, %v2742_v16  ;;  %v4251_v6 = vld [vmem:[#allocation2 + $0x6c] sm:$0x1]  ;;  %v4254_v0 = vld [vmem:[#allocation2 + $0x44] sm:$0x1] }
 0x36a   : > { %2415 = vrot.lane.b32.xlu1 %v5317_v36, %s4414_s9  ;;  %v4046_v36 = vrot.slane %v2676_v27, 9  ;;  %v4247_v27 = vld [vmem:[#allocation2 + $0x54] sm:$0x1] }
 0x36b   : > { %v2762_v20 = vrot.slane %v4247_v27, 5  ;;  %v2812_v28 = vrot.slane %v2811_v61, 4  ;;  %v4252_v27 = vld [vmem:[#allocation2 + $0x1c] sm:$0x1] }
 0x36c   : > { %v1640_v17 = vpop.permute.xlu1 %1639  ;;  %v5868_v29 = vsel %vm5849_vm4, %v4046_v36, %v2750_v63  ;;  %v2669_v36 = vld [vmem:[#allocation2] sm:$0xe]  ;;  %v2722_v63 = vrot.slane %v4248_v47, 5  ;;  %v2678_v47 = vld [vmem:[#allocation2 + $0x48] sm:$0xe] }
 0x36d   : > { %2409 = vrot.lane.b32.xlu2 %v6965_v2, %s4414_s9  ;;  %2423 = vrot.lane.b32.xlu0 %v6962_v14, %s4414_s9  ;;  %v5901_v2 = vsel %vm5849_vm4, %v4053_v42, %v2778_v45  ;;  %v4039_v60 = vrot.slane %v2669_v36, 9  ;;  %v2681_v42 = vld [vmem:[#allocation2 + $0x60] sm:$0xe] }
 0x36e   : > { %v2862_v26 = vrot.slane %v5901_v2, 4 }
 0x36f   : > { %v5845_v41 = vpop.permute.xlu2 %2112  ;;  %v5847_v38 = vpop.permute.xlu0 %1649  ;;  %v5930_v54 = vsel %vm5849_vm4, %v4039_v60, %v2722_v63  ;;  %v4253_v63 = vld [vmem:[#allocation2 + $0x4c] sm:$0x1]  ;;  %v4048_v60 = vrot.slane %v2678_v47, 9 }
 0x372   : > { %2429 = vrot.lane.b32.xlu1 %v6957_v30, %s4414_s9  ;;  %v4246_v30 = vld [vmem:[#allocation2 + $0x24] sm:$0x1] }
 0x373   : > { %v2738_v8 = vrot.slane %v4246_v30, 5  ;;  %v4250_v30 = vld [vmem:[#allocation2 + $0x64] sm:$0x1] }
 0x374   : > { %v1625_v1 = vpop.permute.xlu1 %1624 }
 0x375   : > { %3026 = vrot.lane.b32.xlu2 %v5855_v34, %s4404_s23  ;;  %v1658_v12 = vsel %vm1109_vm0, %v1620_v31, %v1625_v1  ;;  %3028 = vrot.lane.b32.xlu0 %v5868_v29, %s4404_s23  ;;  %v2092_v31 = vunpack.c.l.b16 %v2069_v58  ;;  %v5911_v49 = vsel %vm5849_vm4, %v4043_v44, %v2738_v8  ;;  %v2682_v1 = vld [vmem:[#allocation2 + $0x68] sm:$0xe]  ;;  %v4051_v44 = vrot.slane %v2681_v42, 9 }
 0x376   : > { %v1660_v39 = vsel %vm1113_vm1, %v1658_v12, %v1630_v55  ;;  %v2800_v35 = vrot.slane %v5911_v49, 4  ;;  %v2770_v8 = vrot.slane %v4250_v30, 5  ;;  %v4040_v42 = vrot.slane %v2670_v7, 9 }
 0x377   : > { %v5891_v14 = vpop.permute.xlu2 %2127  ;;  %v1635_v33 = vpop.permute.xlu0 %1634  ;;  %v2093_v13 = vpack.c.b16 %v2092_v31, %v2091_v11  ;;  %v2774_v11 = vrot.slane %v4251_v6, 5 }
 0x378   : > { %v1662_v55 = vsel %vm1116_vm5, %v1660_v39, %v1635_v33  ;;  %v2801_v37 = vsel %vm911_vm12, %v2800_v35, %v5930_v54 }
 0x379   : > { %v5906_v18 = vsel %vm1119_vm6, %v1662_v55, %v1640_v17  ;;  %v5918_v17 = vsel %vm5849_vm4, %v4049_v46, %v2762_v20  ;;  %v2131_v56 = vsel %vm1109_vm0, %v2093_v13, %v5766_v10  ;;  %v2805_v3 = vperm.slane %v2801_v37, %v6973_v23  ;;  %v2672_v55 = vld [vmem:[#allocation2 + $0x18] sm:$0xe] }
 0x37a   : > { %2407 = vrot.lane.b32.xlu1 %v6960_v22, %s4414_s9  ;;  %v2863_v22 = vsel %vm911_vm12, %v2862_v26, %v5918_v17  ;;  %v5966_v26 = vsel %vm5849_vm4, %v4051_v44, %v2770_v8  ;;  %v2734_v20 = vrot.slane %v4252_v27, 5  ;;  %v4042_v46 = vrot.slane %v2672_v55, 9 }
 0x37b   : > { %v5943_v21 = vsel %vm911_vm12, %v2812_v28, %v2805_v3  ;;  %v2814_v45 = vrot.slane %v2805_v3, 4  ;;  %v2856_v5 = vrot.slane %v5966_v26, 4  ;;  %v2867_v35 = vperm.slane %v2863_v22, %v6973_v23  ;;  %v2677_v28 = vld [vmem:[#allocation2 + $0x40] sm:$0xe]  ;;  %v4255_v22 = vld [vmem:[#allocation2 + $0xc] sm:$0x1] }
 0x37c   : > { %v5920_v43 = vpop.permute.xlu1 %1387  ;;  %v2758_v13 = vrot.slane %v4253_v63, 5  ;;  %v4047_v16 = vrot.slane %v2677_v28, 9  ;;  %v5997_v30 = vsel %vm5849_vm4, %v4042_v46, %v2734_v20 }
 0x37d   : > { %3044 = vrot.lane.b32.xlu2 %v5860_v19, %s4404_s23  ;;  %3018 = vrot.lane.b32.xlu0 %v5878_v51, %s4404_s23  ;;  %v5952_v10 = vsel %vm911_vm12, %v2811_v61, %v2814_v45  ;;  %v2868_v45 = vrot.slane %v2867_v35, 4 }
 0x37f   : > { %v5932_v62 = vpop.permute.xlu2 %2173  ;;  %v2103_v48 = vpop.permute.xlu0 %2102 }
 0x380   : > { %v5940_v58 = vsel %vm1113_vm1, %v2131_v56, %v2103_v48  ;;  %v2726_v56 = vrot.slane %v4255_v22, 5  ;;  %v5985_v48 = vsel %vm5849_vm4, %v4048_v60, %v2758_v13 }
 0x382   : > { %2425 = vrot.lane.b32.xlu1 %v6963_v24, %s4414_s9  ;;  %v4052_v24 = vrot.slane %v2682_v1, 9  ;;  %v6010_v27 = vsel %vm5849_vm4, %v4040_v42, %v2726_v56 }
 0x384   : > { %v1373_v12 = vpop.permute.xlu1 %1372  ;;  %v5973_v61 = vsel %vm5849_vm4, %v4052_v24, %v2774_v11 }
 0x385   : > { %3022 = vrot.lane.b32.xlu2 %v5911_v49, %s4404_s23  ;;  %v5958_v39 = vsel %vm1116_vm5, %v5808_v4, %v1373_v12  ;;  %3024 = vrot.lane.b32.xlu0 %v5949_v9, %s4404_s23  ;;  %v2895_v4 = vperm.slane %v5897_v25, %v6973_v23  ;;  %v2884_v36 = vrot.slane %v5973_v61, 4  ;;  %v2754_v25 = vrot.slane %v4254_v0, 5 }
 0x387   : > { %v5962_v31 = vpop.permute.xlu2 %2151  ;;  %v2118_v33 = vpop.permute.xlu0 %2117  ;;  %v2896_v37 = vrot.slane %v2895_v4, 4  ;;  %v2885_v1 = vsel %vm911_vm12, %v2884_v36, %v5985_v48  ;;  %v5993_v12 = vsel %vm5849_vm4, %v4047_v16, %v2754_v25 }
 0x388   : > { %v2889_v8 = vperm.slane %v2885_v1, %v6973_v23  ;;  %v2857_v24 = vsel %vm911_vm12, %v2856_v5, %v5993_v12 }
 0x389   : > { %v2861_v6 = vperm.slane %v2857_v24, %v6973_v23 }
 0x38a   : > { %3042 = vrot.lane.b32.xlu1 %v5901_v2, %s4404_s23  ;;  %v6004_v11 = vsel %vm911_vm12, %v2896_v37, %v2889_v8  ;;  %v2898_v55 = vrot.slane %v2889_v8, 4 }
 0x38b   : > { %v6013_v20 = vsel %vm911_vm12, %v2868_v45, %v2861_v6  ;;  %v2870_v46 = vrot.slane %v2861_v6, 4 }
 0x38c   : > { %v1655_v15 = vpop.permute.xlu1 %1654  ;;  %v6016_v36 = vsel %vm911_vm12, %v2895_v4, %v2898_v55 }
 0x38d   : > { %3036 = vrot.lane.b32.xlu2 %v5888_v59, %s4404_s23  ;;  %3038 = vrot.lane.b32.xlu0 %v5966_v26, %s4404_s23  ;;  %v6021_v47 = vsel %vm911_vm12, %v2867_v35, %v2870_v46  ;;  %v1666_v35 = vsel %vm1122_vm7, %v5906_v18, %v5822_v50  ;;  %v1402_v50 = vsel %vm1119_vm6, %v5958_v39, %v5772_v40 }
 0x38f   : > { %v5987_v3 = vpop.permute.xlu2 %2165  ;;  %v2158_v44 = vpop.permute.xlu0 %2157 }
 0x390   : > { %v2199_v16 = vrot.slane %v2158_v44, 4 }
 0x392   : > { %3020 = vrot.lane.b32.xlu1 %v5997_v30, %s4404_s23 }
 0x394   : > { %v2108_v5 = vpop.permute.xlu1 %2107 }
 0x395   : > { %3014 = vrot.lane.b32.xlu2 %v5930_v54, %s4404_s23  ;;  %v2135_v63 = vsel %vm1116_vm5, %v5940_v58, %v2108_v5  ;;  %3016 = vrot.lane.b32.xlu0 %v6010_v27, %s4404_s23  ;;  %v1668_v58 = vsel %vm1125_vm8, %v1666_v35, %v5847_v38 }
 0x396   : > { %v2137_v52 = vsel %vm1119_vm6, %v2135_v63, %v5845_v41 }
 0x397   : > { %v2172_v13 = vpop.permute.xlu2 %2171  ;;  %v2176_v4 = vpop.permute.xlu0 %2175  ;;  %v2139_v7 = vsel %vm1122_vm7, %v2137_v52, %v2118_v33 }
 0x398   : > { %v2283_v39 = vrot.slane %v2176_v4, 4 }
 0x39a   : > { %3034 = vrot.lane.b32.xlu1 %v5918_v17, %s4404_s23 }
 0x39c   : > { %v2123_v60 = vpop.permute.xlu1 %2122 }
 0x39d   : > { %3032 = vrot.lane.b32.xlu2 %v5985_v48, %s4404_s23  ;;  %v2141_v41 = vsel %vm1125_vm8, %v2139_v7, %v2123_v60  ;;  %3288 = vrot.lane.b32.xlu0 %v5855_v34, %s4414_s9  ;;  %v1404_v34 = vsel %vm1122_vm7, %v1402_v50, %v5799_v32  ;;  %v6068_v32 = vsel %vm1128_vm9, %v1668_v58, %v1655_v15 }
 0x39e   : > { %v1406_v25 = vsel %vm1125_vm8, %v1404_v34, %v5920_v43 }
 0x39f   : > { %v2162_v33 = vpop.permute.xlu2 %2161  ;;  %v2154_v28 = vpop.permute.xlu0 %2153  ;;  %v6059_v40 = vsel %vm1128_vm9, %v1406_v25, %v5836_v57  ;;  %v2277_v57 = vrot.slane %v2172_v13, 4 }
 0x3a0   : > { %v2193_v37 = vrot.slane %v2154_v28, 4 }
 0x3a2   : > { %3040 = vrot.lane.b32.xlu1 %v5973_v61, %s4404_s23 }
 0x3a4   : > { %v2160_v18 = vpop.permute.xlu1 %2159 }
 0x3a5   : > { %3304 = vrot.lane.b32.xlu2 %v5901_v2, %s4414_s9  ;;  %3306 = vrot.lane.b32.xlu0 %v5860_v19, %s4414_s9 }
 0x3a7   : > { %v6051_v38 = vpop.permute.xlu2 %2421  ;;  %v2168_v0 = vpop.permute.xlu0 %2167 }
 0x3a8   : > { %v2284_v22 = vsel %vm911_vm12, %v2283_v39, %v2168_v0 }
 0x3a9   : > { %v2288_v45 = vperm.slane %v2284_v22, %v6973_v23 }
 0x3aa   : > { %3030 = vrot.lane.b32.xlu1 %v5993_v12, %s4404_s23 }
 0x3ac   : > { %v2150_v2 = vpop.permute.xlu1 %2149 }
 0x3ad   : > { %3282 = vrot.lane.b32.xlu2 %v5997_v30, %s4414_s9  ;;  %3284 = vrot.lane.b32.xlu0 %v5911_v49, %s4414_s9  ;;  %v2200_v56 = vsel %vm911_vm12, %v2199_v16, %v2150_v2  ;;  %v2255_v49 = vrot.slane %v5932_v62, 4  ;;  %v2289_v62 = vrot.slane %v2288_v45, 4 }
 0x3ae   : > { %v2204_v1 = vperm.slane %v2200_v56, %v6973_v23 }
 0x3af   : > { %v6070_v19 = vpop.permute.xlu2 %2411  ;;  %v2146_v43 = vpop.permute.xlu0 %2145  ;;  %v2256_v6 = vsel %vm911_vm12, %v2255_v49, %v5987_v3 }
 0x3b0   : > { %v2194_v8 = vsel %vm911_vm12, %v2193_v37, %v2146_v43  ;;  %v2205_v55 = vrot.slane %v2204_v1, 4  ;;  %v2260_v5 = vperm.slane %v2256_v6, %v6973_v23 }
 0x3b1   : > { %v2198_v46 = vperm.slane %v2194_v8, %v6973_v23 }
 0x3b2   : > { %3290 = vrot.lane.b32.xlu1 %v5868_v29, %s4414_s9  ;;  %v2261_v58 = vrot.slane %v2260_v5, 4 }
 0x3b3   : > { %v2206_v7 = vsel %vm911_vm12, %v2205_v55, %v2198_v46 }
 0x3b4   : > { %v2156_v42 = vpop.permute.xlu1 %2155 }
 0x3b5   : > { %3296 = vrot.lane.b32.xlu2 %v5918_v17, %s4414_s9  ;;  %3298 = vrot.lane.b32.xlu0 %v5888_v59, %s4414_s9  ;;  %v2227_v59 = vrot.slane %v2160_v18, 4 }
 0x3b7   : > { %v6081_v15 = vpop.permute.xlu2 %2417  ;;  %v2164_v44 = vpop.permute.xlu0 %2163  ;;  %v2228_v4 = vsel %vm911_vm12, %v2227_v59, %v5962_v31  ;;  %v2207_v31 = vrot.slane %v2198_v46, 4 }
 0x3b8   : > { %v2278_v24 = vsel %vm911_vm12, %v2277_v57, %v2164_v44  ;;  %v2232_v28 = vperm.slane %v2228_v4, %v6973_v23 }
 0x3b9   : > { %v2282_v17 = vperm.slane %v2278_v24, %v6973_v23  ;;  %v2208_v22 = vsel %vm911_vm12, %v2204_v1, %v2207_v31 }
 0x3ba   : > { %3280 = vrot.lane.b32.xlu1 %v5878_v51, %s4414_s9  ;;  %v6103_v51 = vsel %vm1128_vm9, %v2141_v41, %v5891_v14  ;;  %v6117_v14 = vperm.slane %v2206_v7, %v5021_v53  ;;  %v2233_v39 = vrot.slane %v2232_v28, 4 }
 0x3bb   : > { %v2290_v52 = vsel %vm911_vm12, %v2289_v62, %v2282_v17  ;;  %v2291_v50 = vrot.slane %v2282_v17, 4  ;;  %v6148_v17 = vperm.slane %v2208_v22, %v5021_v53 }
 0x3bc   : > { %v2170_v63 = vpop.permute.xlu1 %2169  ;;  %v6112_v60 = vperm.slane %v2290_v52, %v5021_v53  ;;  %v2217_v37 = vrot.slane %v6117_v14, 4 }
 0x3bd   : > { %3302 = vrot.lane.b32.xlu2 %v5973_v61, %s4414_s9  ;;  %v2249_v13 = vrot.slane %v2170_v63, 4  ;;  %3276 = vrot.lane.b32.xlu0 %v5930_v54, %s4414_s9  ;;  %v2320_v31 = vshrl.u32 %v6148_v17, 16 }
 0x3be   : > { %v2301_v25 = vrot.slane %v6112_v60, 4  ;;  %v2218_v59 = vsel %vm911_vm12, 0, %v2217_v37 }
 0x3bf   : > { %v6099_v3 = vpop.permute.xlu2 %2431  ;;  %v2250_v35 = vsel %vm911_vm12, %v2249_v13, %v2162_v33  ;;  %v6109_v61 = vpop.permute.xlu0 %2435  ;;  %v2221_v33 = vrot.slane %v2156_v42, 4  ;;  %v2308_v13 = vshrl.u32 %v6117_v14, 16  ;;  %v2314_v7 = vshrl.u32 %v2218_v59, 16 }
 0x3c0   : > { %v2254_v54 = vperm.slane %v2250_v35, %v6973_v23  ;;  %v2302_v8 = vsel %vm911_vm12, 0, %v2301_v25 }
 0x3c1   : > { %v2339_v46 = vshrl.u32 %v2302_v8, 16 }
 0x3c2   : > { %v2262_v41 = vsel %vm911_vm12, %v2261_v58, %v2254_v54  ;;  %3286 = vrot.lane.b32.xlu1 %v5949_v9, %s4414_s9  ;;  %v2263_v0 = vrot.slane %v2254_v54, 4 }
 0x3c3   : > { %v6123_v18 = vperm.slane %v2262_v41, %v5021_v53 }
 0x3c4   : > { %v2148_v34 = vpop.permute.xlu1 %2147  ;;  %v2264_v49 = vsel %vm911_vm12, %v2260_v5, %v2263_v0  ;;  %v2333_v0 = vshrl.u32 %v6112_v60, 16 }
 0x3c5   : > { %3292 = vrot.lane.b32.xlu2 %v5993_v12, %s4414_s9  ;;  %v2222_v2 = vsel %vm911_vm12, %v2221_v33, %v2148_v34  ;;  %3294 = vrot.lane.b32.xlu0 %v5985_v48, %s4414_s9  ;;  %v2273_v43 = vrot.slane %v6123_v18, 4  ;;  %v2292_v12 = vsel %vm911_vm12, %v2288_v45, %v2291_v50  ;;  %v6162_v5 = vperm.slane %v2264_v49, %v5021_v53 }
 0x3c6   : > { %v2226_v16 = vperm.slane %v2222_v2, %v6973_v23  ;;  %v6151_v45 = vperm.slane %v2292_v12, %v5021_v53  ;;  %v2332_v58 = vshrl.u32 %v6123_v18, 16  ;;  %v2219_v33 = vrot.slane %v6148_v17, 4 }
 0x3c7   : > { %v6133_v57 = vpop.permute.xlu2 %2409  ;;  %v6138_v56 = vpop.permute.xlu0 %2413  ;;  %v2274_v42 = vsel %vm911_vm12, 0, %v2273_v43  ;;  %v2344_v25 = vshrl.u32 %v6162_v5, 16 }
 0x3c8   : > { %v2234_v48 = vsel %vm911_vm12, %v2233_v39, %v2226_v16  ;;  %v2235_v44 = vrot.slane %v2226_v16, 4  ;;  %v2338_v6 = vshrl.u32 %v2274_v42, 16  ;;  %v2337_v52 = vpack.i.b16 %v2302_v8, %v2274_v42 }
 0x3c9   : > { %v6145_v24 = vperm.slane %v2234_v48, %v5021_v53  ;;  %v2345_v2 = vshrl.u32 %v6151_v45, 16  ;;  %v2334_v12 = vpack.i.b16 %v2333_v0, %v2332_v58  ;;  %v2303_v49 = vrot.slane %v6151_v45, 4 }
 0x3ca   : > { %v2236_v1 = vsel %vm911_vm12, %v2232_v28, %v2235_v44  ;;  %3300 = vrot.lane.b32.xlu1 %v5966_v26, %s4414_s9  ;;  %v2340_v35 = vpack.i.b16 %v2339_v46, %v2338_v6  ;;  %v2362_v39 = vunpack.c.l.b16 %v2337_v52  ;;  %v2275_v6 = vrot.slane %v6162_v5, 4 }
 0x3cb   : > { %v6158_v62 = vperm.slane %v2236_v1, %v5021_v53  ;;  %v2245_v55 = vrot.slane %v6145_v24, 4  ;;  %v2309_v4 = vshrl.u32 %v6145_v24, 16  ;;  %v2346_v1 = vpack.i.b16 %v2345_v2, %v2344_v25 }
 0x3cc   : > { %v6164_v63 = vpop.permute.xlu1 %2419  ;;  %v2367_v22 = vunpack.c.l.b16 %v2340_v35  ;;  %v2357_v35 = vunpack.c.l.b16 %v2334_v12  ;;  %v2517_v12 = vrot.slane %v6109_v61, 4 }
 0x3cd   : > { %v2246_v26 = vsel %vm911_vm12, 0, %v2245_v55  ;;  %v2321_v34 = vshrl.u32 %v6158_v62, 16  ;;  %v2310_v37 = vpack.i.b16 %v2309_v4, %v2308_v13  ;;  %v2247_v42 = vrot.slane %v6158_v62, 4 }
 0x3ce   : > { %v2313_v28 = vpack.i.b16 %v2246_v26, %v2218_v59  ;;  %v2315_v41 = vshrl.u32 %v2246_v26, 16  ;;  %v2220_v59 = vsel %vm911_vm12, 0, %v2219_v33  ;;  %v2276_v4 = vsel %vm911_vm12, 0, %v2275_v6 }
 0x3cf   : > { %v6170_v54 = vpop.permute.xlu2 %3026  ;;  %v6174_v50 = vpop.permute.xlu0 %2427  ;;  %v2322_v8 = vpack.i.b16 %v2321_v34, %v2320_v31  ;;  %v2248_v55 = vsel %vm911_vm12, 0, %v2247_v42  ;;  %v2356_v13 = vunpack.c.l.b16 %v2310_v37  ;;  %v2834_v31 = vrot.slane %v5868_v29, 4 }
 0x3d0   : > { %v2361_v43 = vunpack.c.l.b16 %v2313_v28  ;;  %v2316_v16 = vpack.i.b16 %v2315_v41, %v2314_v7  ;;  %v2325_v26 = vpack.i.b16 %v2248_v55, %v2220_v59  ;;  %v2304_v7 = vsel %vm911_vm12, 0, %v2303_v49 }
 0x3d1   : > { %v2376_v28 = vunpack.c.l.b16 %v2322_v8  ;;  %v2349_v41 = vpack.i.b16 %v2304_v7, %v2276_v4  ;;  %v2358_v0 = vpack.c.b16 %v2357_v35, %v2356_v13  ;;  %v2377_v34 = vunpack.c.l.b16 %v2346_v1 }
 0x3d2   : > { %3278 = vrot.lane.b32.xlu1 %v6010_v27, %s4414_s9  ;;  %v2363_v48 = vpack.c.b16 %v2362_v39, %v2361_v43  ;;  %v2366_v44 = vunpack.c.l.b16 %v2316_v16  ;;  %v2381_v25 = vunpack.c.l.b16 %v2325_v26  ;;  %v2319_v2 = vpack.i.b16 %v6158_v62, %v6148_v17 }
 0x3d3   : > { %v2489_v43 = vrot.slane %v6051_v38, 4  ;;  %v2483_v39 = vrot.slane %v6081_v15, 4  ;;  %v2378_v16 = vpack.c.b16 %v2377_v34, %v2376_v28  ;;  %v2382_v37 = vunpack.c.l.b16 %v2349_v41 }
 0x3d4   : > { %v6187_v46 = vpop.permute.xlu1 %2437  ;;  %2364 = vrot.lane.b32.xlu2 %v2363_v48, %s4411_s1  ;;  %v2368_v52 = vpack.c.b16 %v2367_v22, %v2366_v44  ;;  %v2343_v22 = vpack.i.b16 %v6151_v45, %v6162_v5  ;;  %v2331_v29 = vpack.i.b16 %v6112_v60, %v6123_v18  ;;  %v2835_v42 = vsel %vm911_vm12, %v2834_v31, %v5997_v30 }
 0x3d5   : > { %v2383_v38 = vpack.c.b16 %v2382_v37, %v2381_v25  ;;  %v2371_v15 = vunpack.c.l.b16 %v2319_v2  ;;  %v2327_v62 = vshrl.u32 %v2248_v55, 16  ;;  %v2828_v49 = vrot.slane %v5949_v9, 4 }
 0x3d6   : > { %2369 = vrot.lane.b32.xlu0 %v2368_v52, %s4410_s0  ;;  %v2511_v48 = vrot.slane %v6099_v3, 4  ;;  %v2484_v45 = vsel %vm911_vm12, %v2483_v39, %v6133_v57  ;;  %v2490_v61 = vsel %vm911_vm12, %v2489_v43, %v6138_v56  ;;  %v2372_v30 = vunpack.c.l.b16 %v2343_v22 }
 0x3d7   : > { %v6193_v58 = vpop.permute.xlu2 %3044  ;;  %v6196_v33 = vpop.permute.xlu0 %2433  ;;  %v2326_v18 = vshrl.u32 %v2220_v59, 16  ;;  %v2350_v5 = vshrl.u32 %v2276_v4, 16  ;;  %v2839_v44 = vperm.slane %v2835_v42, %v6973_v23  ;;  %v2518_v9 = vsel %vm911_vm12, %v2517_v12, %v6174_v50 }
 0x3d8   : > { %v2373_v3 = vpack.c.b16 %v2372_v30, %v2371_v15  ;;  %v2351_v1 = vshrl.u32 %v2304_v7, 16  ;;  %v2307_v57 = vpack.i.b16 %v6145_v24, %v6117_v14  ;;  %v2829_v56 = vsel %vm911_vm12, %v2828_v49, %v6010_v27 }
 0x3d9   : > { %v2328_v6 = vpack.i.b16 %v2327_v62, %v2326_v18  ;;  %v2494_v55 = vperm.slane %v2490_v61, %v6973_v23  ;;  %v2488_v59 = vperm.slane %v2484_v45, %v6973_v23  ;;  %v6235_v4 = vunpack.c.l.b16 %v2331_v29 }
 0x3da   : > { %2359 = vrot.lane.b32.xlu1 %v2358_v0, %s4408_s21  ;;  %v2352_v13 = vpack.i.b16 %v2351_v1, %v2350_v5  ;;  %v6233_v50 = vunpack.c.l.b16 %v2307_v57  ;;  %v2461_v26 = vrot.slane %v6164_v63, 4  ;;  %v2522_v14 = vperm.slane %v2518_v9, %v6973_v23 }
 0x3db   : > { %v2840_v24 = vrot.slane %v2839_v44, 4  ;;  %v2833_v27 = vperm.slane %v2829_v56, %v6973_v23  ;;  %v2386_v35 = vunpack.c.l.b16 %v2328_v6  ;;  %v2495_v41 = vrot.slane %v2494_v55, 4 }
 0x3dc   : > { %v6210_v17 = vpop.permute.xlu1 %2415  ;;  %2379 = vrot.lane.b32.xlu2 %v2378_v16, %s4409_s19  ;;  %v2497_v0 = vrot.slane %v2488_v59, 4  ;;  %v2387_v34 = vunpack.c.l.b16 %v2352_v13  ;;  %v2462_v2 = vsel %vm911_vm12, %v2461_v26, %v6070_v19  ;;  %v2523_v63 = vrot.slane %v2522_v14, 4 }
 0x3dd   : > { %v2841_v39 = vsel %vm911_vm12, %v2840_v24, %v2833_v27  ;;  %v2842_v37 = vrot.slane %v2833_v27, 4  ;;  %v2496_v22 = vsel %vm911_vm12, %v2495_v41, %v2488_v59  ;;  %v2466_v12 = vperm.slane %v2462_v2, %v6973_v23 }
 0x3de   : > { %2384 = vrot.lane.b32.xlu0 %v2383_v38, %s4412_s17  ;;  %v2388_v16 = vpack.c.b16 %v2387_v34, %v2386_v35  ;;  %v2498_v42 = vsel %vm911_vm12, %v2494_v55, %v2497_v0  ;;  %v2545_v38 = vrot.slane %v6187_v46, 4  ;;  %v6255_v19 = vperm.slane %v2841_v39, %v5021_v53 }
 0x3df   : > { %v6220_v60 = vpop.permute.xlu2 %3022  ;;  %v2424_v8 = vpop.permute.xlu0 %2423  ;;  %v2455_v15 = vrot.slane %v6210_v17, 4  ;;  %v6259_v49 = vperm.slane %v2496_v22, %v5021_v53  ;;  %v6267_v46 = vsel %vm911_vm12, %v2839_v44, %v2842_v37  ;;  %v6270_v18 = vperm.slane %v2498_v42, %v5021_v53 }
 0x3e0   : > { %v2512_v52 = vsel %vm911_vm12, %v2511_v48, %v2424_v8  ;;  %v3152_v48 = vrot.slane %v6193_v58, 4  ;;  %v3068_v17 = vrot.slane %v6170_v54, 4  ;;  %v6276_v9 = vperm.slane %v5943_v21, %v5021_v53 }
 0x3e1   : > { %v2516_v31 = vperm.slane %v2512_v52, %v6973_v23  ;;  %v2467_v58 = vrot.slane %v2466_v12, 4  ;;  %v3062_v8 = vrot.slane %v6220_v60, 4  ;;  %v6282_v44 = vperm.slane %v6004_v11, %v5021_v53 }
 0x3e2   : > { %2374 = vrot.lane.b32.xlu1 %v2373_v3, %s4407_s18  ;;  %v6286_v6 = vperm.slane %v6013_v20, %v5021_v53  ;;  %v2507_v55 = vrot.slane %v6259_v49, 4  ;;  %v2509_v13 = vrot.slane %v6270_v18, 4  ;;  %v2539_v26 = vrot.slane %v6196_v33, 4 }
 0x3e3   : > { %v2524_v29 = vsel %vm911_vm12, %v2523_v63, %v2516_v31  ;;  %v2525_v62 = vrot.slane %v2516_v31, 4  ;;  %v2571_v27 = vshrl.u32 %v6259_v49, 16 }
 0x3e4   : > { %v2430_v7 = vpop.permute.xlu1 %2429  ;;  %v6263_v45 = vperm.slane %v2524_v29, %v5021_v53  ;;  %v6322_v37 = vsel %vm911_vm12, 0, %v2509_v13 }
 0x3e5   : > { %v2546_v61 = vsel %vm911_vm12, %v2545_v38, %v2430_v7  ;;  %v2526_v54 = vsel %vm911_vm12, %v2522_v14, %v2525_v62 }
 0x3e6   : > { %v2550_v1 = vperm.slane %v2546_v61, %v6973_v23  ;;  %v2535_v59 = vrot.slane %v6263_v45, 4  ;;  %v6301_v14 = vperm.slane %v2526_v54, %v5021_v53  ;;  %v2594_v41 = vshrl.u32 %v6263_v45, 16 }
 0x3e7   : > { %v3037_v25 = vpop.permute.xlu2 %3036  ;;  %v6245_v43 = vpop.permute.xlu0 %3028  ;;  %v2583_v61 = vshrl.u32 %v6270_v18, 16 }
 0x3e8   : > { %v3153_v60 = vsel %vm911_vm12, %v3152_v48, %v3037_v25  ;;  %v2551_v7 = vrot.slane %v2550_v1, 4  ;;  %v3096_v0 = vrot.slane %v6245_v43, 4  ;;  %v2508_v25 = vsel %vm911_vm12, 0, %v2507_v55 }
 0x3e9   : > { %v6306_v35 = vperm.slane %v3153_v60, %v6973_v23  ;;  %v2536_v2 = vsel %vm911_vm12, 0, %v2535_v59  ;;  %v2537_v38 = vrot.slane %v6301_v14, 4  ;;  %v2606_v54 = vshrl.u32 %v6301_v14, 16 }
 0x3ea   : > { %2389 = vrot.lane.b32.xlu1 %v2388_v16, %s4413_s16  ;;  %v2600_v48 = vshrl.u32 %v2536_v2, 16 }
 0x3eb   : > { %v2538_v55 = vsel %vm911_vm12, 0, %v2537_v38 }
 0x3ec   : > { %v2408_v30 = vpop.permute.xlu1 %2407 }
 0x3ed   : > { %v2456_v5 = vsel %vm911_vm12, %v2455_v15, %v2408_v30  ;;  %v3158_v15 = vrot.slane %v6306_v35, 4 }
 0x3ee   : > { %v2460_v3 = vperm.slane %v2456_v5, %v6973_v23 }
 0x3ef   : > { %v3019_v57 = vpop.permute.xlu0 %3018  ;;  %v3015_v21 = vpop.permute.xlu2 %3014 }
 0x3f0   : > { %v2468_v56 = vsel %vm911_vm12, %v2467_v58, %v2460_v3  ;;  %v2469_v11 = vrot.slane %v2460_v3, 4  ;;  %v3069_v20 = vsel %vm911_vm12, %v3068_v17, %v3019_v57  ;;  %v3063_v24 = vsel %vm911_vm12, %v3062_v8, %v3015_v21 }
 0x3f1   : > { %v6295_v52 = vperm.slane %v2468_v56, %v5021_v53  ;;  %v6312_v34 = vperm.slane %v3069_v20, %v6973_v23  ;;  %v6319_v16 = vperm.slane %v3063_v24, %v6973_v23  ;;  %v2589_v57 = vshrl.u32 %v6322_v37, 16 }
 0x3f2   : > { %v2470_v63 = vsel %vm911_vm12, %v2466_v12, %v2469_v11  ;;  %v2577_v12 = vshrl.u32 %v2508_v25, 16 }
 0x3f3   : > { %v2479_v31 = vrot.slane %v6295_v52, 4  ;;  %v2570_v29 = vshrl.u32 %v6295_v52, 16  ;;  %v2478_v30 = vperm.slane %v2470_v63, %v5021_v53  ;;  %v3074_v17 = vrot.slane %v6312_v34, 4 }
 0x3f4   : > { %v2426_v33 = vpop.permute.xlu1 %2425  ;;  %v3076_v56 = vrot.slane %v6319_v16, 4 }
 0x3f5   : > { %v2540_v39 = vsel %vm911_vm12, %v2539_v26, %v2426_v33  ;;  %v2480_v42 = vsel %vm911_vm12, 0, %v2479_v31  ;;  %v2572_v60 = vpack.i.b16 %v2571_v27, %v2570_v29  ;;  %v6348_v26 = vsel %vm911_vm12, %v3074_v17, %v6319_v16 }
 0x3f6   : > { %v2544_v22 = vperm.slane %v2540_v39, %v6973_v23  ;;  %v2576_v3 = vshrl.u32 %v2480_v42, 16  ;;  %v2575_v13 = vpack.i.b16 %v2508_v25, %v2480_v42  ;;  %v2481_v31 = vrot.slane %v2478_v30, 4 }
 0x3f7   : > { %v6329_v62 = vpop.permute.xlu0 %3024 }
 0x3f8   : > { %v2552_v5 = vsel %vm911_vm12, %v2551_v7, %v2544_v22  ;;  %v2553_v58 = vrot.slane %v2544_v22, 4  ;;  %v2582_v7 = vshrl.u32 %v2478_v30, 16  ;;  %v2578_v63 = vpack.i.b16 %v2577_v12, %v2576_v3 }
 0x3f9   : > { %v6336_v8 = vperm.slane %v2552_v5, %v5021_v53  ;;  %v3090_v42 = vrot.slane %v6329_v62, 4  ;;  %v2618_v5 = vunpack.c.l.b16 %v2572_v60 }
 0x3fa   : > { %v2554_v21 = vsel %vm911_vm12, %v2550_v1, %v2553_v58  ;;  %v2581_v1 = vpack.i.b16 %v6270_v18, %v2478_v30  ;;  %v2628_v12 = vunpack.c.l.b16 %v2578_v63  ;;  %v2584_v3 = vpack.i.b16 %v2583_v61, %v2582_v7 }
 0x3fb   : > { %v2562_v59 = vperm.slane %v2554_v21, %v5021_v53  ;;  %v2595_v11 = vshrl.u32 %v6336_v8, 16  ;;  %v2563_v20 = vrot.slane %v6336_v8, 4  ;;  %v2623_v21 = vunpack.c.l.b16 %v2575_v13 }
 0x3fc   : > { %v6350_v24 = vpop.permute.xlu1 %3042  ;;  %v2915_v13 = vshrl.u32 %v6276_v9, 16  ;;  %v2633_v61 = vunpack.c.l.b16 %v2581_v1  ;;  %v2638_v63 = vunpack.c.l.b16 %v2584_v3 }
 0x3fd   : > { %v2596_v27 = vpack.i.b16 %v2595_v11, %v2594_v41  ;;  %v2564_v33 = vsel %vm911_vm12, 0, %v2563_v20  ;;  %v2605_v39 = vpack.i.b16 %v2562_v59, %v6301_v14  ;;  %v2607_v38 = vshrl.u32 %v2562_v59, 16 }
 0x3fe   : > { %v2599_v22 = vpack.i.b16 %v2564_v33, %v2536_v2  ;;  %v2601_v29 = vshrl.u32 %v2564_v33, 16  ;;  %v2565_v25 = vrot.slane %v2562_v59, 4  ;;  %v2482_v41 = vsel %vm911_vm12, 0, %v2481_v31 }
 0x3ff   : > { %v6356_v17 = vpop.permute.xlu0 %3038  ;;  %v2619_v58 = vunpack.c.l.b16 %v2596_v27  ;;  %v2608_v30 = vpack.i.b16 %v2607_v38, %v2606_v54  ;;  %v2634_v59 = vunpack.c.l.b16 %v2605_v39  ;;  %v2587_v62 = vpack.i.b16 %v6322_v37, %v2482_v41 }
 0x400   : > { %v2624_v18 = vunpack.c.l.b16 %v2599_v22  ;;  %v2602_v28 = vpack.i.b16 %v2601_v29, %v2600_v48  ;;  %v2566_v14 = vsel %vm911_vm12, 0, %v2565_v25  ;;  %v2916_v48 = vshrl.u32 %v6255_v19, 16 }
 0x401   : > { %v2620_v11 = vpack.c.b16 %v2619_v58, %v2618_v5  ;;  %v2611_v33 = vpack.i.b16 %v2566_v14, %v2538_v55  ;;  %v2613_v60 = vshrl.u32 %v2566_v14, 16  ;;  %v2639_v7 = vunpack.c.l.b16 %v2608_v30 }
 0x402   : > { %v2625_v2 = vpack.c.b16 %v2624_v18, %v2623_v21  ;;  %v2629_v20 = vunpack.c.l.b16 %v2602_v28  ;;  %v2939_v27 = vshrl.u32 %v6286_v6, 16  ;;  %v2588_v39 = vshrl.u32 %v2482_v41, 16 }
 0x403   : > { %2621 = vrot.lane.b32.xlu2 %v2620_v11, %s4408_s21  ;;  %v2612_v22 = vshrl.u32 %v2538_v55, 16  ;;  %v2635_v29 = vpack.c.b16 %v2634_v59, %v2633_v61  ;;  %v2644_v38 = vunpack.c.l.b16 %v2611_v33  ;;  %v2940_v25 = vshrl.u32 %v6282_v44, 16 }
 0x404   : > { %v3021_v54 = vpop.permute.xlu1 %3020  ;;  %2626 = vrot.lane.b32.xlu0 %v2625_v2, %s4411_s1  ;;  %v2630_v31 = vpack.c.b16 %v2629_v20, %v2628_v12  ;;  %v2824_v5 = vrot.slane %v6276_v9, 4  ;;  %v2643_v1 = vunpack.c.l.b16 %v2587_v62  ;;  %v2917_v18 = vpack.i.b16 %v2916_v48, %v2915_v13  ;;  %v3033_v62 = vpop.permute.xlu2 %3032 }
 0x405   : > { %v3097_v28 = vsel %vm911_vm12, %v3096_v0, %v3021_v54  ;;  %v2614_v21 = vpack.i.b16 %v2613_v60, %v2612_v22  ;;  %v2852_v30 = vrot.slane %v6255_v19, 4  ;;  %v2640_v0 = vpack.c.b16 %v2639_v7, %v2638_v63 }
 0x406   : > { %2631 = vrot.lane.b32.xlu1 %v2630_v31, %s4410_s0  ;;  %v6374_v43 = vperm.slane %v3097_v28, %v6973_v23  ;;  %v2941_v41 = vpack.i.b16 %v2940_v25, %v2939_v27  ;;  %v2825_v55 = vsel %vm911_vm12, 0, %v2824_v5  ;;  %v2590_v12 = vpack.i.b16 %v2589_v57, %v2588_v39 }
 0x407   : > { %v3017_v58 = vpop.permute.xlu0 %3016  ;;  %v2853_v3 = vsel %vm911_vm12, 0, %v2852_v30  ;;  %v2880_v14 = vrot.slane %v6286_v6, 4  ;;  %v2645_v2 = vpack.c.b16 %v2644_v38, %v2643_v1  ;;  %v2908_v20 = vrot.slane %v6282_v44, 4 }
 0x408   : > { %v3091_v11 = vsel %vm911_vm12, %v3090_v42, %v3017_v58  ;;  %v2920_v59 = vpack.i.b16 %v2853_v3, %v2825_v55  ;;  %v2921_v33 = vshrl.u32 %v2825_v55, 16  ;;  %v2649_v60 = vunpack.c.l.b16 %v2614_v21 }
 0x409   : > { %v2963_v13 = vunpack.c.l.b16 %v2917_v18  ;;  %v2881_v48 = vsel %vm911_vm12, 0, %v2880_v14  ;;  %v2922_v42 = vshrl.u32 %v2853_v3, 16  ;;  %v3102_v37 = vrot.slane %v6374_v43, 4 }
 0x40a   : > { %v6387_v57 = vperm.slane %v3091_v11, %v6973_v23  ;;  %v2964_v31 = vunpack.c.l.b16 %v2941_v41  ;;  %v2909_v61 = vsel %vm911_vm12, 0, %v2908_v20  ;;  %v6393_v7 = vperm.slane %v6348_v26, %v5021_v53 }
 0x40b   : > { %2636 = vrot.lane.b32.xlu2 %v2635_v29, %s4407_s18  ;;  %v2648_v27 = vunpack.c.l.b16 %v2590_v12  ;;  %v2944_v28 = vpack.i.b16 %v2909_v61, %v2881_v48  ;;  %v2923_v63 = vpack.i.b16 %v2922_v42, %v2921_v33  ;;  %v3124_v39 = vrot.slane %v6350_v24, 4 }
 0x40c   : > { %v3035_v54 = vpop.permute.xlu1 %3034  ;;  %2641 = vrot.lane.b32.xlu0 %v2640_v0, %s4409_s19  ;;  %v2968_v22 = vunpack.c.l.b16 %v2920_v59  ;;  %v2945_v29 = vshrl.u32 %v2881_v48, 16  ;;  %v2946_v38 = vshrl.u32 %v2909_v61, 16  ;;  %v3118_v25 = vrot.slane %v6356_v17, 4 }
 0x40d   : > { %v2650_v58 = vpack.c.b16 %v2649_v60, %v2648_v27  ;;  %v2969_v1 = vunpack.c.l.b16 %v2944_v28  ;;  %v2823_v26 = vperm.slane %v5952_v10, %v5021_v53  ;;  %v3103_v21 = vsel %vm911_vm12, %v3102_v37, %v6387_v57 }
 0x40e   : > { %2646 = vrot.lane.b32.xlu1 %v2645_v2, %s4412_s17  ;;  %v3104_v18 = vrot.slane %v6387_v57, 4  ;;  %v2965_v24 = vpack.c.b16 %v2964_v31, %v2963_v13  ;;  %v2947_v30 = vpack.i.b16 %v2946_v38, %v2945_v29  ;;  %v2973_v0 = vunpack.c.l.b16 %v2923_v63 }
 0x40f   : > { %v6398_v5 = vpop.permute.xlu0 %3288  ;;  %v2851_v41 = vperm.slane %v6267_v46, %v5021_v53  ;;  %v2879_v55 = vperm.slane %v6021_v47, %v5021_v53  ;;  %v2907_v11 = vperm.slane %v6016_v36, %v5021_v53  ;;  %v2970_v12 = vpack.c.b16 %v2969_v1, %v2968_v22  ;;  %v6415_v36 = vpop.permute.xlu2 %3304 }
 0x410   : > { %v2974_v3 = vunpack.c.l.b16 %v2947_v30  ;;  %v2927_v10 = vshrl.u32 %v2823_v26, 16  ;;  %v2826_v14 = vrot.slane %v2823_v26, 4  ;;  %v3125_v60 = vsel %vm911_vm12, %v3124_v39, %v3035_v54 }
 0x411   : > { %v2926_v2 = vpack.i.b16 %v2851_v41, %v2823_v26  ;;  %v2950_v20 = vpack.i.b16 %v2907_v11, %v2879_v55  ;;  %v2928_v59 = vshrl.u32 %v2851_v41, 16  ;;  %v2951_v33 = vshrl.u32 %v2879_v55, 16 }
 0x412   : > { %v2952_v46 = vshrl.u32 %v2907_v11, 16  ;;  %v2827_v47 = vsel %vm911_vm12, 0, %v2826_v14  ;;  %v2854_v48 = vrot.slane %v2851_v41, 4  ;;  %v2882_v63 = vrot.slane %v2879_v55, 4 }
 0x413   : > { %2651 = vrot.lane.b32.xlu2 %v2650_v58, %s4413_s16  ;;  %v2978_v37 = vunpack.c.l.b16 %v2926_v2  ;;  %v2979_v31 = vunpack.c.l.b16 %v2950_v20  ;;  %v2929_v61 = vpack.i.b16 %v2928_v59, %v2927_v10  ;;  %v2910_v54 = vrot.slane %v2907_v11, 4 }
 0x414   : > { %v3041_v13 = vpop.permute.xlu1 %3040  ;;  %2966 = vrot.lane.b32.xlu0 %v2965_v24, %s4408_s21  ;;  %v2953_v27 = vpack.i.b16 %v2952_v46, %v2951_v33  ;;  %v2855_v28 = vsel %vm911_vm12, 0, %v2854_v48  ;;  %v2975_v29 = vpack.c.b16 %v2974_v3, %v2973_v0  ;;  %v3129_v1 = vperm.slane %v3125_v60, %v6973_v23 }
 0x415   : > { %v3146_v42 = vrot.slane %v3041_v13, 4  ;;  %v2980_v38 = vpack.c.b16 %v2979_v31, %v2978_v37  ;;  %v2983_v58 = vunpack.c.l.b16 %v2929_v61  ;;  %v2883_v30 = vsel %vm911_vm12, 0, %v2882_v63 }
 0x416   : > { %2971 = vrot.lane.b32.xlu1 %v2970_v12, %s4411_s1  ;;  %v2984_v24 = vunpack.c.l.b16 %v2953_v27  ;;  %v2911_v41 = vsel %vm911_vm12, 0, %v2910_v54  ;;  %v2932_v12 = vpack.i.b16 %v2855_v28, %v2827_v47  ;;  %v2933_v10 = vshrl.u32 %v2827_v47, 16 }
 0x417   : > { %v3147_v39 = vsel %vm911_vm12, %v3146_v42, %v3033_v62  ;;  %v6420_v22 = vpop.permute.xlu0 %3306  ;;  %v2934_v55 = vshrl.u32 %v2855_v28, 16  ;;  %v6427_v11 = vperm.slane %v3103_v21, %v5021_v53  ;;  %v2956_v3 = vpack.i.b16 %v2911_v41, %v2883_v30  ;;  %v6451_v31 = vpop.permute.xlu2 %3282 }
 0x418   : > { %v3151_v26 = vperm.slane %v3147_v39, %v6973_v23  ;;  %v2985_v0 = vpack.c.b16 %v2984_v24, %v2983_v58  ;;  %v2988_v2 = vunpack.c.l.b16 %v2932_v12  ;;  %v2957_v59 = vshrl.u32 %v2883_v30, 16 }
 0x419   : > { %v2935_v20 = vpack.i.b16 %v2934_v55, %v2933_v10  ;;  %v3077_v21 = vsel %vm911_vm12, %v6312_v34, %v3076_v56  ;;  %v2989_v60 = vunpack.c.l.b16 %v2956_v3  ;;  %v3130_v13 = vrot.slane %v3129_v1, 4 }
 0x41a   : > { %v3159_v62 = vsel %vm911_vm12, %v3158_v15, %v3151_v26  ;;  %v2958_v15 = vshrl.u32 %v2911_v41, 16  ;;  %v3160_v46 = vrot.slane %v3151_v26, 4  ;;  %v3178_v34 = vshrl.u32 %v6427_v11, 16 }
 0x41b   : > { %v6433_v14 = vperm.slane %v3159_v62, %v5021_v53  ;;  %2976 = vrot.lane.b32.xlu2 %v2975_v29, %s4410_s0  ;;  %v2993_v48 = vunpack.c.l.b16 %v2935_v20  ;;  %v2990_v16 = vpack.c.b16 %v2989_v60, %v2988_v2  ;;  %v3105_v56 = vsel %vm911_vm12, %v6374_v43, %v3104_v18 }
 0x41c   : > { %v3031_v33 = vpop.permute.xlu1 %3030  ;;  %2981 = vrot.lane.b32.xlu0 %v2980_v38, %s4407_s18  ;;  %v2959_v37 = vpack.i.b16 %v2958_v15, %v2957_v59  ;;  %v3086_v17 = vrot.slane %v6393_v7, 4  ;;  %v3177_v39 = vshrl.u32 %v6393_v7, 16  ;;  %v3161_v57 = vsel %vm911_vm12, %v6306_v35, %v3160_v46 }
 0x41d   : > { %v3119_v47 = vsel %vm911_vm12, %v3118_v25, %v3031_v33  ;;  %v3114_v25 = vrot.slane %v6427_v11, 4  ;;  %v3170_v27 = vrot.slane %v6433_v14, 4  ;;  %v3202_v24 = vshrl.u32 %v6433_v14, 16 }
 0x41e   : > { %v3123_v42 = vperm.slane %v3119_v47, %v6973_v23  ;;  %2986 = vrot.lane.b32.xlu1 %v2985_v0, %s4409_s19  ;;  %v2994_v54 = vunpack.c.l.b16 %v2959_v37  ;;  %v3087_v18 = vsel %vm911_vm12, 0, %v3086_v17  ;;  %v3179_v26 = vpack.i.b16 %v3178_v34, %v3177_v39 }
 0x41f   : > { %v6453_v61 = vpop.permute.xlu0 %3284  ;;  %v3115_v29 = vsel %vm911_vm12, 0, %v3114_v25  ;;  %v3171_v12 = vsel %vm911_vm12, 0, %v3170_v27  ;;  %v3085_v10 = vperm.slane %v3077_v21, %v5021_v53  ;;  %v3183_v62 = vshrl.u32 %v3087_v18, 16  ;;  %v6483_v34 = vpop.permute.xlu2 %3296 }
 0x420   : > { %v3131_v28 = vsel %vm911_vm12, %v3130_v13, %v3123_v42  ;;  %v3132_v63 = vrot.slane %v3123_v42, 4  ;;  %v2995_v58 = vpack.c.b16 %v2994_v54, %v2993_v48  ;;  %v3184_v0 = vshrl.u32 %v3115_v29, 16 }
 0x421   : > { %v6463_v43 = vperm.slane %v3131_v28, %v5021_v53  ;;  %v3113_v3 = vperm.slane %v3105_v56, %v5021_v53  ;;  %v3169_v2 = vperm.slane %v3161_v57, %v5021_v53  ;;  %v3208_v15 = vshrl.u32 %v3171_v12, 16 }
 0x422   : > { %v3133_v38 = vsel %vm911_vm12, %v3129_v1, %v3132_v63  ;;  %v3182_v1 = vpack.i.b16 %v3115_v29, %v3087_v18  ;;  %v3185_v13 = vpack.i.b16 %v3184_v0, %v3183_v62  ;;  %v3225_v21 = vunpack.c.l.b16 %v3179_v26 }
 0x423   : > { %v3141_v30 = vperm.slane %v3133_v38, %v5021_v53  ;;  %2991 = vrot.lane.b32.xlu2 %v2990_v16, %s4412_s17  ;;  %v3201_v41 = vshrl.u32 %v6463_v43, 16  ;;  %v3142_v35 = vrot.slane %v6463_v43, 4  ;;  %v3188_v17 = vpack.i.b16 %v3113_v3, %v3085_v10 }
 0x424   : > { %v6475_v55 = vpop.permute.xlu1 %3290  ;;  %2996 = vrot.lane.b32.xlu0 %v2995_v58, %s4413_s16  ;;  %v3230_v42 = vunpack.c.l.b16 %v3182_v1  ;;  %v3189_v25 = vshrl.u32 %v3085_v10, 16  ;;  %v3235_v28 = vunpack.c.l.b16 %v3185_v13  ;;  %v3190_v54 = vshrl.u32 %v3113_v3, 16 }
 0x425   : > { %v3203_v20 = vpack.i.b16 %v3202_v24, %v3201_v41  ;;  %v3143_v59 = vsel %vm911_vm12, 0, %v3142_v35  ;;  %v3212_v48 = vpack.i.b16 %v3169_v2, %v3141_v30  ;;  %v3213_v57 = vshrl.u32 %v3141_v30, 16 }
 0x426   : > { %v3206_v33 = vpack.i.b16 %v3171_v12, %v3143_v59  ;;  %v3207_v60 = vshrl.u32 %v3143_v59, 16  ;;  %v3214_v18 = vshrl.u32 %v3169_v2, 16  ;;  %v3088_v29 = vrot.slane %v3085_v10, 4 }
 0x427   : > { %v6481_v46 = vpop.permute.xlu0 %3298  ;;  %v3226_v47 = vunpack.c.l.b16 %v3203_v20  ;;  %v3241_v39 = vunpack.c.l.b16 %v3212_v48  ;;  %v3191_v26 = vpack.i.b16 %v3190_v54, %v3189_v25  ;;  %v3116_v24 = vrot.slane %v3113_v3, 4 }
 0x428   : > { %v3231_v16 = vunpack.c.l.b16 %v3206_v33  ;;  %v3209_v37 = vpack.i.b16 %v3208_v15, %v3207_v60  ;;  %v3144_v41 = vrot.slane %v3141_v30, 4  ;;  %v3330_v35 = vrot.slane %v6398_v5, 4 }
 0x429   : > { %v3227_v56 = vpack.c.b16 %v3226_v47, %v3225_v21  ;;  %v3414_v12 = vrot.slane %v6420_v22, 4  ;;  %v3215_v1 = vpack.i.b16 %v3214_v18, %v3213_v57  ;;  %v3172_v62 = vrot.slane %v3169_v2, 4 }
 0x42a   : > { %v3232_v27 = vpack.c.b16 %v3231_v16, %v3230_v42  ;;  %v3236_v63 = vunpack.c.l.b16 %v3209_v37  ;;  %v3240_v0 = vunpack.c.l.b16 %v3188_v17  ;;  %v3089_v20 = vsel %vm911_vm12, 0, %v3088_v29 }
 0x42b   : > { %3228 = vrot.lane.b32.xlu1 %v3227_v56, %s4408_s21  ;;  %v3117_v10 = vsel %vm911_vm12, 0, %v3116_v24  ;;  %v3145_v59 = vsel %vm911_vm12, 0, %v3144_v41  ;;  %v3245_v60 = vunpack.c.l.b16 %v3191_v26  ;;  %v3246_v15 = vunpack.c.l.b16 %v3215_v1 }
 0x42c   : > { %v3281_v38 = vpop.permute.xlu1 %3280  ;;  %3233 = vrot.lane.b32.xlu2 %v3232_v27, %s4411_s1  ;;  %v3237_v58 = vpack.c.b16 %v3236_v63, %v3235_v28  ;;  %v3173_v30 = vsel %vm911_vm12, 0, %v3172_v62  ;;  %v3194_v3 = vpack.i.b16 %v3117_v10, %v3089_v20  ;;  %v3324_v5 = vrot.slane %v6453_v61, 4  ;;  %v3303_v27 = vpop.permute.xlu2 %3302 }
 0x42d   : > { %v3242_v22 = vpack.c.b16 %v3241_v39, %v3240_v0  ;;  %v3218_v13 = vpack.i.b16 %v3173_v30, %v3145_v59  ;;  %v3196_v2 = vshrl.u32 %v3117_v10, 16  ;;  %v3331_v21 = vsel %vm911_vm12, %v3330_v35, %v3281_v38 }
 0x42e   : > { %3238 = vrot.lane.b32.xlu0 %v3237_v58, %s4410_s0  ;;  %v3247_v47 = vpack.c.b16 %v3246_v15, %v3245_v60  ;;  %v3195_v48 = vshrl.u32 %v3089_v20, 16  ;;  %v3219_v42 = vshrl.u32 %v3145_v59, 16  ;;  %v3250_v16 = vunpack.c.l.b16 %v3194_v3 }
 0x42f   : > { %v3277_v33 = vpop.permute.xlu0 %3276  ;;  %v3251_v37 = vunpack.c.l.b16 %v3218_v13  ;;  %v3220_v56 = vshrl.u32 %v3173_v30, 16  ;;  %v2569_v17 = vpack.i.b16 %v6259_v49, %v6295_v52  ;;  %v3386_v25 = vrot.slane %v6415_v36, 4 }
 0x430   : > { %v3197_v61 = vpack.i.b16 %v3196_v2, %v3195_v48  ;;  %v2593_v28 = vpack.i.b16 %v6336_v8, %v6263_v45  ;;  %v3176_v63 = vpack.i.b16 %v6427_v11, %v6393_v7  ;;  %v3408_v54 = vrot.slane %v3303_v27, 4 }
 0x431   : > { %v3335_v39 = vperm.slane %v3331_v21, %v6973_v23  ;;  %v3252_v18 = vpack.c.b16 %v3251_v37, %v3250_v16  ;;  %v3221_v49 = vpack.i.b16 %v3220_v56, %v3219_v42  ;;  %v3415_v52 = vsel %vm911_vm12, %v3414_v12, %v6481_v46 }
 0x432   : > { %v3325_v36 = vsel %vm911_vm12, %v3324_v5, %v3277_v33  ;;  %v6509_v29 = vunpack.c.l.b16 %v2569_v17  ;;  %v6511_v38 = vunpack.c.l.b16 %v2593_v28  ;;  %v3255_v58 = vunpack.c.l.b16 %v3197_v61 }
 0x433   : > { %3243 = vrot.lane.b32.xlu1 %v3242_v22, %s4407_s18  ;;  %v3256_v45 = vunpack.c.l.b16 %v3221_v49  ;;  %v3419_v24 = vperm.slane %v3415_v52, %v6973_v23  ;;  %v3336_v41 = vrot.slane %v3335_v39, 4  ;;  %v3329_v35 = vperm.slane %v3325_v36, %v6973_v23 }
 0x434   : > { %v3287_v57 = vpop.permute.xlu1 %3286  ;;  %3248 = vrot.lane.b32.xlu2 %v3247_v47, %s4409_s19  ;;  %v2617_v26 = vpack.c.b16 %v6511_v38, %v6509_v29  ;;  %v3387_v12 = vsel %vm911_vm12, %v3386_v25, %v6483_v34  ;;  %v3358_v62 = vrot.slane %v6475_v55, 4  ;;  %v3293_v30 = vpop.permute.xlu2 %3292  ;;  %v3200_v17 = vpack.i.b16 %v6433_v14, %v6463_v43 }
 0x435   : > { %v3257_v1 = vpack.c.b16 %v3256_v45, %v3255_v58  ;;  %v3391_v20 = vperm.slane %v3387_v12, %v6973_v23  ;;  %v3420_v10 = vrot.slane %v3419_v24, 4  ;;  %v3337_v59 = vsel %vm911_vm12, %v3336_v41, %v3329_v35 }
 0x436   : > { %3253 = vrot.lane.b32.xlu0 %v3252_v18, %s4412_s17  ;;  %v3359_v15 = vsel %vm911_vm12, %v3358_v62, %v6451_v31  ;;  %v3338_v3 = vrot.slane %v3329_v35, 4  ;;  %v6530_v55 = vperm.slane %v3337_v59, %v5021_v53  ;;  %v3352_v31 = vrot.slane %v3287_v57, 4 }
 0x437   : > { %v3295_v8 = vpop.permute.xlu0 %3294  ;;  %v3392_v22 = vrot.slane %v3391_v20, 4  ;;  %v3363_v2 = vperm.slane %v3359_v15, %v6973_v23  ;;  %v6558_v58 = vunpack.c.l.b16 %v3200_v17 }
 0x438   : > { %v3409_v46 = vsel %vm911_vm12, %v3408_v54, %v3295_v8  ;;  %v3339_v47 = vsel %vm911_vm12, %v3335_v39, %v3338_v3  ;;  %v3348_v16 = vrot.slane %v6530_v55, 4  ;;  %v3439_v49 = vshrl.u32 %v6530_v55, 16 }
 0x439   : > { %v3413_v0 = vperm.slane %v3409_v46, %v6973_v23  ;;  %v3364_v27 = vrot.slane %v3363_v2, 4  ;;  %v3347_v39 = vperm.slane %v3339_v47, %v5021_v53 }
 0x43a   : > { %v3349_v43 = vsel %vm911_vm12, 0, %v3348_v16 }
 0x43b   : > { %3258 = vrot.lane.b32.xlu1 %v3257_v1, %s4413_s16  ;;  %v3421_v34 = vsel %vm911_vm12, %v3420_v10, %v3413_v0  ;;  %v3422_v48 = vrot.slane %v3413_v0, 4  ;;  %v3445_v62 = vshrl.u32 %v3349_v43, 16 }
 0x43c   : > { %v3301_v33 = vpop.permute.xlu1 %3300  ;;  %v6536_v21 = vperm.slane %v3421_v34, %v5021_v53  ;;  %v3350_v34 = vrot.slane %v3347_v39, 4 }
 0x43d   : > { %v3380_v60 = vrot.slane %v3301_v33, 4  ;;  %v3423_v57 = vsel %vm911_vm12, %v3419_v24, %v3422_v48  ;;  %v6563_v24 = vunpack.c.l.b16 %v3176_v63  ;;  %v3451_v33 = vshrl.u32 %v3347_v39, 16 }
 0x43e   : > { %v3432_v61 = vrot.slane %v6536_v21, 4  ;;  %v3464_v35 = vshrl.u32 %v6536_v21, 16 }
 0x43f   : > { %v3381_v5 = vsel %vm911_vm12, %v3380_v60, %v3293_v30  ;;  %v3224_v60 = vpack.c.b16 %v6558_v58, %v6563_v24 }
 0x440   : > { %v3385_v13 = vperm.slane %v3381_v5, %v6973_v23  ;;  %v3433_v46 = vsel %vm911_vm12, 0, %v3432_v61 }
 0x441   : > { %v3470_v59 = vshrl.u32 %v3433_v46, 16 }
 0x442   : > { %v3393_v42 = vsel %vm911_vm12, %v3392_v22, %v3385_v13  ;;  %v3394_v37 = vrot.slane %v3385_v13, 4 }
 0x443   : > { %v6542_v56 = vperm.slane %v3393_v42, %v5021_v53 }
 0x444   : > { %v3279_v25 = vpop.permute.xlu1 %3278  ;;  %v3395_v52 = vsel %vm911_vm12, %v3391_v20, %v3394_v37 }
 0x445   : > { %v3353_v28 = vsel %vm911_vm12, %v3352_v31, %v3279_v25  ;;  %v3404_v54 = vrot.slane %v6542_v56, 4  ;;  %v3463_v14 = vshrl.u32 %v6542_v56, 16  ;;  %v3403_v12 = vperm.slane %v3395_v52, %v5021_v53 }
 0x446   : > { %v3357_v18 = vperm.slane %v3353_v28, %v6973_v23  ;;  %v3431_v23 = vperm.slane %v3423_v57, %v5021_v53 }
 0x447   : > { %v3405_v36 = vsel %vm911_vm12, 0, %v3404_v54  ;;  %v3465_v63 = vpack.i.b16 %v3464_v35, %v3463_v14  ;;  %v3406_v48 = vrot.slane %v3403_v12, 4  ;;  %v3475_v17 = vshrl.u32 %v3403_v12, 16 }
 0x448   : > { %v3365_v45 = vsel %vm911_vm12, %v3364_v27, %v3357_v18  ;;  %v3366_v8 = vrot.slane %v3357_v18, 4  ;;  %v3469_v0 = vshrl.u32 %v3405_v36, 16  ;;  %v3468_v10 = vpack.i.b16 %v3433_v46, %v3405_v36 }
 0x449   : > { %v6567_v41 = vperm.slane %v3365_v45, %v5021_v53  ;;  %v3476_v3 = vshrl.u32 %v3431_v23, 16  ;;  %v3488_v47 = vunpack.c.l.b16 %v3465_v63  ;;  %v3434_v28 = vrot.slane %v3431_v23, 4 }
 0x44a   : > { %v3367_v1 = vsel %vm911_vm12, %v3363_v2, %v3366_v8  ;;  %v3471_v13 = vpack.i.b16 %v3470_v59, %v3469_v0  ;;  %v3493_v16 = vunpack.c.l.b16 %v3468_v10  ;;  %v3474_v52 = vpack.i.b16 %v3431_v23, %v3403_v12 }
 0x44b   : > { %v3375_v20 = vperm.slane %v3367_v1, %v5021_v53  ;;  %v3376_v7 = vrot.slane %v6567_v41, 4  ;;  %v3440_v11 = vshrl.u32 %v6567_v41, 16  ;;  %v3351_v14 = vsel %vm911_vm12, 0, %v3350_v34 }
 0x44c   : > { %v3498_v18 = vunpack.c.l.b16 %v3471_v13  ;;  %v3477_v45 = vpack.i.b16 %v3476_v3, %v3475_v17  ;;  %v3435_v35 = vsel %vm911_vm12, 0, %v3434_v28  ;;  %v3503_v0 = vunpack.c.l.b16 %v3474_v52  ;;  %v6975_v13 = vld [vmem:[#allocation18_spill] sm:$0xff]  ;;  %v2360_v17 = vpop.permute.xlu1 %2359 }
 0x44d   : > { %v3441_v15 = vpack.i.b16 %v3440_v11, %v3439_v49  ;;  %v3377_v30 = vsel %vm911_vm12, 0, %v3376_v7  ;;  %v3452_v53 = vshrl.u32 %v3375_v20, 16  ;;  %v3378_v31 = vrot.slane %v3375_v20, 4 }
 0x44e   : > { %v3444_v5 = vpack.i.b16 %v3377_v30, %v3349_v43  ;;  %v3446_v22 = vshrl.u32 %v3377_v30, 16  ;;  %v3450_v27 = vpack.i.b16 %v3375_v20, %v3347_v39  ;;  %v3407_v43 = vsel %vm911_vm12, 0, %v3406_v48 }
 0x44f   : > { %v3487_v2 = vunpack.c.l.b16 %v3441_v15  ;;  %v3379_v61 = vsel %vm911_vm12, 0, %v3378_v31  ;;  %v3453_v49 = vpack.i.b16 %v3452_v53, %v3451_v33  ;;  %v3457_v20 = vshrl.u32 %v3351_v14, 16 }
 0x450   : > { %v3492_v42 = vunpack.c.l.b16 %v3444_v5  ;;  %v3447_v37 = vpack.i.b16 %v3446_v22, %v3445_v62  ;;  %v3456_v8 = vpack.i.b16 %v3379_v61, %v3351_v14  ;;  %v3502_v39 = vunpack.c.l.b16 %v3450_v27  ;;  %v6974_v22 = vld [vmem:[#allocation17_spill] sm:$0xff] }
 0x451   : > { %v3489_v25 = vpack.c.b16 %v3488_v47, %v3487_v2  ;;  %v3458_v46 = vshrl.u32 %v3379_v61, 16  ;;  %v3507_v1 = vunpack.c.l.b16 %v3453_v49  ;;  %v3480_v62 = vpack.i.b16 %v3435_v35, %v3407_v43  ;;  %v6976_v2 = vld [vmem:[#allocation15_spill] sm:$0xff]  ;;  %v6977_v47 = vld [vmem:[#allocation16_spill] sm:$0xff] }
 0x452   : > { %v3494_v54 = vpack.c.b16 %v3493_v16, %v3492_v42  ;;  %v3497_v57 = vunpack.c.l.b16 %v3447_v37  ;;  %v3481_v23 = vshrl.u32 %v3407_v43, 16  ;;  %v3508_v12 = vunpack.c.l.b16 %v3477_v45  ;;  %v2365_v37 = vpop.permute.xlu2 %2364  ;;  %v6979_v49 = vld [vmem:[#allocation24_spill] sm:$0xff]  ;;  %v2370_v43 = vpop.permute.xlu0 %2369  ;;  %v6981_v45 = vld [vmem:[#allocation21_spill] sm:$0xff] }
 0x453   : > { %3490 = vrot.lane.b32.xlu2 %v3489_v25, %s4408_s21  ;;  %v3512_v7 = vunpack.c.l.b16 %v3456_v8  ;;  %v3504_v11 = vpack.c.b16 %v3503_v0, %v3502_v39  ;;  %v3459_v63 = vpack.i.b16 %v3458_v46, %v3457_v20  ;;  %v3482_v10 = vshrl.u32 %v3435_v35, 16  ;;  %v6983_v46 = vld [vmem:[#allocation20_spill] sm:$0xff] }
 0x454   : > { %3495 = vrot.lane.b32.xlu0 %v3494_v54, %s4411_s1  ;;  %v3499_v36 = vpack.c.b16 %v3498_v18, %v3497_v57  ;;  %v3509_v59 = vpack.c.b16 %v3508_v12, %v3507_v1  ;;  %v3513_v33 = vunpack.c.l.b16 %v3480_v62  ;;  %v1049_v53 = vpack.i.b16 %v6975_v13, %v6974_v22  ;;  %v6978_v54 = vld [vmem:[#allocation22_spill] sm:$0xff] }
 0x455   : > { %v3483_v15 = vpack.i.b16 %v3482_v10, %v3481_v23  ;;  %v3517_v3 = vunpack.c.l.b16 %v3459_v63  ;;  %v1025_v31 = vpack.i.b16 %v6977_v47, %v6976_v2  ;;  %v3462_v48 = vpack.i.b16 %v6536_v21, %v6542_v56  ;;  %v6980_v21 = vld [vmem:[#allocation23_spill] sm:$0xff]  ;;  %v6984_v62 = vld [vmem:[#allocation26_spill] sm:$0xff] }
 0x456   : > { %3500 = vrot.lane.b32.xlu1 %v3499_v36, %s4410_s0  ;;  %v3514_v30 = vpack.c.b16 %v3513_v33, %v3512_v7  ;;  %v1072_v42 = vunpack.c.l.b16 %v1049_v53  ;;  %v3438_v27 = vpack.i.b16 %v6567_v41, %v6530_v55  ;;  %v2375_v36 = vpop.permute.xlu1 %2374  ;;  %v6982_v55 = vld [vmem:[#allocation19_spill] sm:$0xff] }
 0x457   : > { %v3518_v34 = vunpack.c.l.b16 %v3483_v15  ;;  %v1071_v16 = vunpack.c.l.b16 %v1025_v31  ;;  %v3485_v28 = vunpack.c.l.b16 %v3462_v48 }
 0x458   : > { %v3484_v61 = vunpack.c.l.b16 %v3438_v27  ;;  %v2938_v27 = vpack.i.b16 %v6282_v44, %v6286_v6 }
 0x459   : > { %v3519_v5 = vpack.c.b16 %v3518_v34, %v3517_v3  ;;  %v1073_v25 = vpack.c.b16 %v1072_v42, %v1071_v16 }
 0x45a   : > { %v3486_v18 = vpack.c.b16 %v3485_v28, %v3484_v61  ;;  %v2380_v14 = vpop.permute.xlu2 %2379  ;;  %v2385_v35 = vpop.permute.xlu0 %2384 }
 0x45b   : > { %3505 = vrot.lane.b32.xlu2 %v3504_v11, %s4407_s18  ;;  %v1112_v57 = vsel %vm1109_vm0, %v1073_v25, %v6978_v54 }
 0x45c   : > { %3510 = vrot.lane.b32.xlu0 %v3509_v59, %s4409_s19  ;;  %v1115_v52 = vsel %vm1113_vm1, %v1112_v57, %v6979_v49  ;;  %v2961_v49 = vunpack.c.l.b16 %v2938_v27 }
 0x45d   : > { %v1118_v56 = vsel %vm1116_vm5, %v1115_v52, %v6980_v21 }
 0x45e   : > { %3515 = vrot.lane.b32.xlu1 %v3514_v30, %s4412_s17  ;;  %v1121_v8 = vsel %vm1119_vm6, %v1118_v56, %v6981_v45  ;;  %v2390_v20 = vpop.permute.xlu1 %2389 }
 0x45f   : > { %v1124_v41 = vsel %vm1122_vm7, %v1121_v8, %v6982_v55 }
 0x460   : > { %v1127_v1 = vsel %vm1125_vm8, %v1124_v41, %v6983_v46  ;;  %v4111_v41 = vld [vmem:[%s6864_s3 + $0x30] sm:$0xff] }
 0x461   : > { %v1130_v0 = vsel %vm1128_vm9, %v1127_v1, %v6984_v62 }
 0x462   : > { %v2622_v39 = vpop.permute.xlu2 %2621 }
 0x463   : > { %3520 = vrot.lane.b32.xlu2 %v3519_v5, %s4413_s16 }
 0x46a   : > { %v2637_v23 = vpop.permute.xlu2 %2636 }
 0x472   : > { %v2652_v11 = vpop.permute.xlu2 %2651 }
 0x476   : > { %v2627_v12 = vpop.permute.xlu0 %2626 }
 0x478   : > { %v2632_v7 = vpop.permute.xlu1 %2631 }
 0x47a   : > { %v2977_v33 = vpop.permute.xlu2 %2976 }
 0x47e   : > { %3538 = vxpose.xlu0.c.b16.start [1/8] %v1130_v0, 128  ;;  %v2642_v63 = vpop.permute.xlu0 %2641 }
 0x480   : > { %v2647_v10 = vpop.permute.xlu1 %2646 }
 0x482   : > { %v6614_v3 = vpop.permute.xlu2 %2991 }
 0x486   : > { %v2967_v59 = vpop.permute.xlu0 %2966 }
 0x488   : > { %v2972_v15 = vpop.permute.xlu1 %2971 }
 0x48a   : > { %v6618_v22 = vpop.permute.xlu2 %3233 }
 0x48e   : > { %3539 = vxpose.xlu0.c.b16.cont [2/8] %v6059_v40, 128  ;;  %v2982_v30 = vpop.permute.xlu0 %2981  ;;  %v6985_v40 = vpack.c.b16 %v6235_v4, %v6233_v50 }
 0x490   : > { %v2987_v34 = vpop.permute.xlu1 %2986  ;;  %v2393_v53 = vsel %vm1109_vm0, %v6985_v40, %v2360_v17  ;;  %v2914_v17 = vpack.i.b16 %v6255_v19, %v6276_v9 }
 0x491   : > { %v2395_v2 = vsel %vm1113_vm1, %v2393_v53, %v2365_v37  ;;  %v2655_v37 = vsel %vm1109_vm0, %v2617_v26, %v2622_v39 }
 0x492   : > { %v2397_v47 = vsel %vm1116_vm5, %v2395_v2, %v2370_v43  ;;  %v6631_v31 = vpop.permute.xlu2 %3248  ;;  %v2657_v61 = vsel %vm1113_vm1, %v2655_v37, %v2627_v12  ;;  %v2960_v57 = vunpack.c.l.b16 %v2914_v17 }
 0x493   : > { %v2399_v48 = vsel %vm1119_vm6, %v2397_v47, %v2375_v36  ;;  %v2659_v54 = vsel %vm1116_vm5, %v2657_v61, %v2632_v7  ;;  %v4109_v7 = vld [vmem:[%s6864_s3 + $0x20] sm:$0xff] }
 0x494   : > { %v2401_v16 = vsel %vm1122_vm7, %v2399_v48, %v2380_v14  ;;  %v2661_v52 = vsel %vm1119_vm6, %v2659_v54, %v2637_v23  ;;  %v2962_v38 = vpack.c.b16 %v2961_v49, %v2960_v57  ;;  %v4110_v23 = vld [vmem:[%s6864_s3 + $0x28] sm:$0xff]  ;;  %v6728_v61 = vld [vmem:[%s6865_s4] ss:$0 sm:$0xff] }
 0x495   : > { %v2663_v29 = vsel %vm1122_vm7, %v2661_v52, %v2642_v63  ;;  %v4108_v63 = vld [vmem:[%s6864_s3 + $0x18] sm:$0xff] }
 0x496   : > { %v6616_v5 = vpop.permute.xlu0 %2996  ;;  %v2665_v6 = vsel %vm1125_vm8, %v2663_v29, %v2647_v10  ;;  %v3000_v43 = vsel %vm1109_vm0, %v2962_v38, %v2967_v59 }
 0x497   : > { %v2667_v56 = vsel %vm1128_vm9, %v2665_v6, %v2652_v11  ;;  %v3002_v36 = vsel %vm1113_vm1, %v3000_v43, %v2972_v15 }
 0x498   : > { %v3004_v46 = vsel %vm1116_vm5, %v3002_v36, %v2977_v33  ;;  %v4107_v33 = vld [vmem:[%s6864_s3 + $0x10] sm:$0xff] }
 0x49d   : > { %v6620_v13 = vpop.permute.xlu1 %3228 }
 0x49e   : > { %3540 = vxpose.xlu0.c.b16.cont [3/8] %v6068_v32, 128  ;;  %v3262_v59 = vsel %vm1109_vm0, %v3224_v60, %v6620_v13  ;;  %v4105_v60 = vld [vmem:[%s6864_s3] sm:$0xff] }
 0x49f   : > { %v3264_v15 = vsel %vm1113_vm1, %v3262_v59, %v6618_v22 }
 0x4a0   : > { %v6628_v32 = vpop.permute.xlu0 %3238 }
 0x4a1   : > { %v3266_v58 = vsel %vm1116_vm5, %v3264_v15, %v6628_v32 }
 0x4a5   : > { %v6634_v42 = vpop.permute.xlu1 %3243 }
 0x4a6   : > { %v3268_v24 = vsel %vm1119_vm6, %v3266_v58, %v6634_v42 }
 0x4a8   : > { %v6639_v4 = vpop.permute.xlu0 %3253 }
 0x4ad   : > { %v3491_v25 = vpop.permute.xlu2 %3490  ;;  %v6650_v28 = vpop.permute.xlu1 %3258 }
 0x4ae   : > { %3541 = vxpose.xlu0.c.b16.cont [4/8] %v6103_v51, 128  ;;  %v2403_v51 = vsel %vm1125_vm8, %v2401_v16, %v2385_v35  ;;  %v3524_v26 = vsel %vm1109_vm0, %v3486_v18, %v3491_v25  ;;  %v4112_v18 = vld [vmem:[%s6864_s3 + $0x38] sm:$0xff]  ;;  %v4113_v35 = vld [vmem:[%s6864_s3 + $0x40] sm:$0xff] }
 0x4af   : > { %v2405_v50 = vsel %vm1128_vm9, %v2403_v51, %v2390_v20  ;;  %3670 = vmatpush.bf16.msra.mxu0 %v4112_v18  ;;  %4114 = vmatpush.bf16.msra.mxu2 %v4112_v18  ;;  %v3006_v20 = vsel %vm1119_vm6, %v3004_v46, %v2982_v30  ;;  %v4106_v30 = vld [vmem:[%s6864_s3 + $0x8] sm:$0xff] }
 0x4b0   : > { %3726 = vmatpush.bf16.msra.mxu1 %v4113_v35  ;;  %4122 = vmatpush.bf16.msra.mxu3 %v4113_v35  ;;  %v3008_v12 = vsel %vm1122_vm7, %v3006_v20, %v2987_v34 }
 0x4b1   : > { %v3010_v11 = vsel %vm1125_vm8, %v3008_v12, %v6614_v3  ;;  %v3270_v3 = vsel %vm1122_vm7, %v3268_v24, %v6631_v31 }
 0x4b2   : > { %v3012_v10 = vsel %vm1128_vm9, %v3010_v11, %v6616_v5  ;;  %v3272_v34 = vsel %vm1125_vm8, %v3270_v3, %v6639_v4 }
 0x4b3   : > { %3671 = vmatpush.bf16.msra.mxu0 %v4111_v41  ;;  %4115 = vmatpush.bf16.msra.mxu2 %v4111_v41  ;;  %v3274_v5 = vsel %vm1128_vm9, %v3272_v34, %v6650_v28 }
 0x4b5   : > { %v3506_v19 = vpop.permute.xlu2 %3505 }
 0x4b7   : > { %3672 = vmatpush.bf16.msra.mxu0 %v4110_v23  ;;  %4116 = vmatpush.bf16.msra.mxu2 %v4110_v23 }
 0x4bb   : > { %3673 = vmatpush.bf16.msra.mxu0 %v4109_v7  ;;  %4117 = vmatpush.bf16.msra.mxu2 %v4109_v7 }
 0x4bd   : > { %v3521_v1 = vpop.permute.xlu2 %3520 }
 0x4be   : > { %3542 = vxpose.xlu0.c.b16.cont [5/8] %v2405_v50, 128 }
 0x4bf   : > { %3674 = vmatpush.bf16.msra.mxu0 %v4108_v63  ;;  %4118 = vmatpush.bf16.msra.mxu2 %v4108_v63 }
 0x4c3   : > { %3675 = vmatpush.bf16.msra.mxu0 %v4107_v33  ;;  %4119 = vmatpush.bf16.msra.mxu2 %v4107_v33 }
 0x4c6   : > { %v3496_v14 = vpop.permute.xlu0 %3495 }
 0x4c7   : > { %v3526_v9 = vsel %vm1113_vm1, %v3524_v26, %v3496_v14  ;;  %3676 = vmatpush.bf16.msra.mxu0 %v4106_v30  ;;  %4120 = vmatpush.bf16.msra.mxu2 %v4106_v30 }
 0x4c8   : > { %v3501_v44 = vpop.permute.xlu1 %3500 }
 0x4c9   : > { %v3528_v21 = vsel %vm1116_vm5, %v3526_v9, %v3501_v44 }
 0x4ca   : > { %v3530_v45 = vsel %vm1119_vm6, %v3528_v21, %v3506_v19 }
 0x4cb   : > { %3677 = vmatpush.bf16.msra.mxu0 %v4105_v60  ;;  %4121 = vmatpush.bf16.msra.mxu2 %v4105_v60 }
 0x4ce   : > { %3543 = vxpose.xlu0.c.b16.cont [6/8] %v2667_v56, 128  ;;  %v3511_v8 = vpop.permute.xlu0 %3510 }
 0x4cf   : > { %v3532_v39 = vsel %vm1122_vm7, %v3530_v45, %v3511_v8 }
 0x4d0   : > { %v3516_v55 = vpop.permute.xlu1 %3515 }
 0x4d1   : > { %v3534_v62 = vsel %vm1125_vm8, %v3532_v39, %v3516_v55 }
 0x4d2   : > { %v3536_v0 = vsel %vm1128_vm9, %v3534_v62, %v3521_v1 }
 0x4d3   : > { %3554 = vxpose.xlu1.c.b16.start.end [1/1] (short) %v3536_v0, 128 }
 0x4de   : > { %3544 = vxpose.xlu0.c.b16.cont [7/8] %v3012_v10, 128 }
 0x4ee   : > { %3545 = vxpose.xlu0.c.b16.end [8/8] %v3274_v5, 128 }
 0x52a   : > { %v3546_v22 = vpop.trf.xlu0 }
 0x52b   : > { %3678 = vmatmul.bf16.vlgmr.msra.gmra.mxu0 %v3546_v22 }
 0x53a   : > { %v3547_v13 = vpop.trf.xlu0 }
 0x53b   : > { %3683 = vmatmul.bf16.gmra.mxu0 %v3547_v13 }
 0x54a   : > { %v3548_v40 = vpop.trf.xlu0 }
 0x54b   : > { %3688 = vmatmul.bf16.gmra.mxu0 %v3548_v40 }
 0x55a   : > { %v3549_v2 = vpop.trf.xlu0 }
 0x55b   : > { %3693 = vmatmul.bf16.gmra.mxu0 %v3549_v2 }
 0x56a   : > { %v3550_v47 = vpop.trf.xlu0 }
 0x56b   : > { %3698 = vmatmul.bf16.vlgmr.msra.gmra.mxu2 %v3550_v47 }
 0x57a   : > { %v3551_v48 = vpop.trf.xlu0 }
 0x57b   : > { %3703 = vmatmul.bf16.gmra.mxu2 %v3551_v48 }
 0x57f   : > { %v3562_v53 = vpop.trf.xlu1 }
 0x580   : > { %4091 = vmatmul.msk.bf16.vlgmr.msra.gmra.mxu1 %vm1109_vm0, %v3562_v53 }
 0x58a   : > { %v3552_v16 = vpop.trf.xlu0 }
 0x58b   : > { %3708 = vmatmul.bf16.gmra.mxu2 %v3552_v16 }
 0x58f   : > { %v3563_v32 = vpop.trf.xlu1 }
 0x590   : > { %4092 = vmatmul.msk.bf16.gmra.mxu1 %vm1109_vm0, %v3563_v32 }
 0x59a   : > { %v3553_v25 = vpop.trf.xlu0 }
 0x59b   : > { %3713 = vmatmul.bf16.gmra.mxu2 %v3553_v25 }
 0x59f   : > { %v3564_v31 = vpop.trf.xlu1 }
 0x5a0   : > { %4093 = vmatmul.msk.bf16.gmra.mxu1 %vm1109_vm0, %v3564_v31 }
 0x5a8   : > { %v3679_v37 = vpop.f32.mrf.mxu0 }
 0x5a9   : > { %v3680_v28 = vadd.f32 %v6728_v61, %v3679_v37 }
 0x5af   : > { %v3565_v42 = vpop.trf.xlu1 }
 0x5b0   : > { %4094 = vmatmul.msk.bf16.gmra.mxu1 %vm1109_vm0, %v3565_v42  ;;  %v3681_v27 = vpop.f32.mrf.mxu0 }
 0x5b1   : > { %v3682_v14 = vadd.f32 %v6728_v61, %v3681_v27 }
 0x5b8   : > { %v3684_v57 = vpop.f32.mrf.mxu0 }
 0x5b9   : > { %v3685_v9 = vadd.f32 %v6728_v61, %v3684_v57 }
 0x5bf   : > { %v3566_v51 = vpop.trf.xlu1 }
 0x5c0   : > { %4095 = vmatmul.msk.bf16.gmra.mxu1 %vm1109_vm0, %v3566_v51  ;;  %v3686_v26 = vpop.f32.mrf.mxu0 }
 0x5c1   : > { %v3687_v56 = vadd.f32 %v6728_v61, %v3686_v26 }
 0x5c8   : > { %v3689_v21 = vpop.f32.mrf.mxu0 }
 0x5c9   : > { %v3690_v18 = vadd.f32 %v6728_v61, %v3689_v21 }
 0x5cf   : > { %v3567_v50 = vpop.trf.xlu1 }
 0x5d0   : > { %4096 = vmatmul.msk.bf16.vlgmr.msra.gmra.mxu3 %vm1109_vm0, %v3567_v50  ;;  %v3691_v39 = vpop.f32.mrf.mxu0 }
 0x5d1   : > { %v3692_v46 = vadd.f32 %v6728_v61, %v3691_v39 }
 0x5d8   : > { %v3694_v62 = vpop.f32.mrf.mxu0 }
 0x5d9   : > { %v3695_v23 = vadd.f32 %v6728_v61, %v3694_v62 }
 0x5df   : > { %v3568_v4 = vpop.trf.xlu1 }
 0x5e0   : > { %4097 = vmatmul.msk.bf16.gmra.mxu3 %vm1109_vm0, %v3568_v4  ;;  %v3696_v11 = vpop.f32.mrf.mxu0 }
 0x5e1   : > { %v3697_v59 = vadd.f32 %v6728_v61, %v3696_v11 }
 0x5ee   : > { %v3699_v10 = vpop.f32.mrf.mxu2 }
 0x5ef   : > { %v3569_v17 = vpop.trf.xlu1  ;;  %v3700_v58 = vadd.f32 %v6728_v61, %v3699_v10 }
 0x5f0   : > { %4098 = vmatmul.msk.bf16.gmra.mxu3 %vm1109_vm0, %v3569_v17 }
 0x5f6   : > { %v3701_v24 = vpop.f32.mrf.mxu2 }
 0x5f7   : > { %v3702_v5 = vadd.f32 %v6728_v61, %v3701_v24 }
 0x5fd   : > { %v3728_v54 = vpop.f32.mrf.mxu1 }
 0x5fe   : > { %v6731_v49 = vadd.f32 %v3728_v54, %v3680_v28  ;;  %v3704_v13 = vpop.f32.mrf.mxu2 }
 0x5ff   : > { %v3705_v32 = vadd.f32 %v6728_v61, %v3704_v13 }
 0x600   : > { %v3768_v52 = vmax.f32 %v6731_v49, 0.0 }
 0x605   : > { %v3730_v29 = vpop.f32.mrf.mxu1 }
 0x606   : > { %v6735_v38 = vadd.f32 %v3730_v29, %v3682_v14  ;;  %v3706_v2 = vpop.f32.mrf.mxu2 }
 0x607   : > { %v3707_v16 = vadd.f32 %v6728_v61, %v3706_v2 }
 0x608   : > { %v3769_v19 = vmax.f32 %v6735_v38, 0.0 }
 0x60d   : > { %v3733_v44 = vpop.f32.mrf.mxu1 }
 0x60e   : > { %v6739_v6 = vadd.f32 %v3733_v44, %v3685_v9  ;;  %v3709_v42 = vpop.f32.mrf.mxu2 }
 0x60f   : > { %v3710_v4 = vadd.f32 %v6728_v61, %v3709_v42 }
 0x610   : > { %v3770_v43 = vmax.f32 %v6739_v6, 0.0 }
 0x615   : > { %v3735_v36 = vpop.f32.mrf.mxu1 }
 0x616   : > { %v6743_v45 = vadd.f32 %v3735_v36, %v3687_v56  ;;  %v3711_v37 = vpop.f32.mrf.mxu2 }
 0x617   : > { %v3712_v54 = vadd.f32 %v6728_v61, %v3711_v37 }
 0x618   : > { %v3771_v8 = vmax.f32 %v6743_v45, 0.0 }
 0x61d   : > { %v3738_v55 = vpop.f32.mrf.mxu1 }
 0x61e   : > { %v6747_v41 = vadd.f32 %v3738_v55, %v3690_v18  ;;  %v3714_v29 = vpop.f32.mrf.mxu2 }
 0x61f   : > { %v3715_v9 = vadd.f32 %v6728_v61, %v3714_v29 }
 0x620   : > { %v3772_v35 = vmax.f32 %v6747_v41, 0.0 }
 0x625   : > { %v3740_v1 = vpop.f32.mrf.mxu1 }
 0x626   : > { %v6751_v0 = vadd.f32 %v3740_v1, %v3692_v46  ;;  %v3716_v36 = vpop.f32.mrf.mxu2 }
 0x627   : > { %v3717_v18 = vadd.f32 %v6728_v61, %v3716_v36 }
 0x628   : > { %v3773_v20 = vmax.f32 %v6751_v0, 0.0 }
 0x62d   : > { %v3743_v12 = vpop.f32.mrf.mxu1 }
 0x62e   : > { %v6755_v7 = vadd.f32 %v3743_v12, %v3695_v23 }
 0x630   : > { %v3774_v63 = vmax.f32 %v6755_v7, 0.0 }
 0x635   : > { %v3745_v33 = vpop.f32.mrf.mxu1 }
 0x636   : > { %v3746_v15 = vadd.f32 %v3745_v33, %v3697_v59 }
 0x638   : > { %v3775_v30 = vmax.f32 %v3746_v15, 0.0 }
 0x63d   : > { %v3748_v60 = vpop.f32.mrf.mxu1 }
 0x63e   : > { %v3749_v3 = vadd.f32 %v3748_v60, %v3700_v58 }
 0x640   : > { %v3776_v34 = vmax.f32 %v3749_v3, 0.0 }
 0x645   : > { %v3750_v22 = vpop.f32.mrf.mxu1 }
 0x646   : > { %v3751_v40 = vadd.f32 %v3750_v22, %v3702_v5 }
 0x648   : > { %v3777_v53 = vmax.f32 %v3751_v40, 0.0 }
 0x653   : > { %v3753_v47 = vpop.f32.mrf.mxu3 }
 0x654   : > { %v3754_v31 = vadd.f32 %v3753_v47, %v3705_v32 }
 0x656   : > { %v3778_v48 = vmax.f32 %v3754_v31, 0.0 }
 0x65b   : > { %v3755_v51 = vpop.f32.mrf.mxu3 }
 0x65c   : > { %v3756_v25 = vadd.f32 %v3755_v51, %v3707_v16 }
 0x65e   : > { %v3779_v50 = vmax.f32 %v3756_v25, 0.0 }
 0x663   : > { %v3758_v17 = vpop.f32.mrf.mxu3 }
 0x664   : > { %v3759_v27 = vadd.f32 %v3758_v17, %v3710_v4 }
 0x666   : > { %v3780_v28 = vmax.f32 %v3759_v27, 0.0 }
 0x66b   : > { %v3760_v57 = vpop.f32.mrf.mxu3 }
 0x66c   : > { %v3761_v14 = vadd.f32 %v3760_v57, %v3712_v54 }
 0x66e   : > { %v3781_v26 = vmax.f32 %v3761_v14, 0.0 }
 0x673   : > { %v3763_v44 = vpop.f32.mrf.mxu3 }
 0x674   : > { %v3764_v21 = vadd.f32 %v3763_v44, %v3715_v9 }
 0x676   : > { %v3782_v56 = vmax.f32 %v3764_v21, 0.0 }
 0x67a   : > { %3786 = sbr.rel (%p4010_p2) target bundleno = 1665 (0x681), region = 79 }
 0x67b   : > { %v3765_v39 = vpop.f32.mrf.mxu3 }
 0x67c   : > { %v3766_v55 = vadd.f32 %v3765_v39, %v3717_v18 }
 0x67e   : > { %v3783_v46 = vmax.f32 %v3766_v55, 0.0 }
 0x67f   : > { %vm3787_vm10 = vcmask 253952   ;;  %v4415_v1 = vmov 0.0  }
 0x680   : > { %3788 = vst.msk [vmem:[#allocation3] sm:$0x1] %vm3787_vm10, %v4415_v1 }
 0x681 PF: > { %v3790_v62 = vsel %vm1113_vm1, %v3768_v52, 0.0  ;;  %v3791_v23 = vsel %vm1113_vm1, %v3769_v19, 0.0  ;;  %v3793_v61 = vsel %vm1113_vm1, %v3770_v43, 0.0  ;;  %v3795_v7 = vsel %vm1113_vm1, %v3771_v8, 0.0 }
 0x682   : > { %v3792_v12 = vadd.f32 %v3791_v23, %v3790_v62  ;;  %v3797_v49 = vsel %vm1113_vm1, %v3772_v35, 0.0  ;;  %v3799_v52 = vsel %vm1113_vm1, %v3773_v20, 0.0  ;;  %v3801_v19 = vsel %vm1113_vm1, %v3774_v63, 0.0 }
 0x683   : > { %v3803_v43 = vsel %vm1113_vm1, %v3775_v30, 0.0  ;;  %v3805_v45 = vsel %vm1113_vm1, %v3776_v34, 0.0  ;;  %v3807_v33 = vsel %vm1113_vm1, %v3777_v53, 0.0  ;;  %v3809_v35 = vsel %vm1113_vm1, %v3778_v48, 0.0 }
 0x684   : > { %v3794_v11 = vadd.f32 %v3793_v61, %v3792_v12  ;;  %v3811_v0 = vsel %vm1113_vm1, %v3779_v50, 0.0  ;;  %v3813_v20 = vsel %vm1113_vm1, %v3780_v28, 0.0  ;;  %v3815_v63 = vsel %vm1113_vm1, %v3781_v26, 0.0 }
 0x685   : > { %v3817_v30 = vsel %vm1113_vm1, %v3782_v56, 0.0  ;;  %v3819_v34 = vsel %vm1113_vm1, %v3783_v46, 0.0  ;;  %vm3828_vm11 = vcmask 253952  }
 0x686   : > { %v3796_v10 = vadd.f32 %v3795_v7, %v3794_v11 }
 0x687   : > { %v3789_v47 = vld [vmem:[#allocation3] sm:$0x1] }
 0x688   : > { %v3798_v38 = vadd.f32 %v3797_v49, %v3796_v10 }
 0x68a   : > { %v3800_v6 = vadd.f32 %v3799_v52, %v3798_v38 }
 0x68c   : > { %v3802_v59 = vadd.f32 %v3801_v19, %v3800_v6 }
 0x68e   : > { %v3804_v8 = vadd.f32 %v3803_v43, %v3802_v59 }
 0x690   : > { %v3806_v41 = vadd.f32 %v3805_v45, %v3804_v8 }
 0x692   : > { %v3808_v15 = vadd.f32 %v3807_v33, %v3806_v41 }
 0x694   : > { %v3810_v58 = vadd.f32 %v3809_v35, %v3808_v15 }
 0x696   : > { %v3812_v24 = vadd.f32 %v3811_v0, %v3810_v58 }
 0x698   : > { %v3814_v60 = vadd.f32 %v3813_v20, %v3812_v24 }
 0x69a   : > { %v3816_v3 = vadd.f32 %v3815_v63, %v3814_v60 }
 0x69c   : > { %v3818_v5 = vadd.f32 %v3817_v30, %v3816_v3 }
 0x69e   : > { %v3820_v22 = vadd.f32 %v3819_v34, %v3818_v5 }
 0x6a0   : > { %v3821_v13 = vrot.slane %v3820_v22, 4 }
 0x6a2   : > { %v3822_v40 = vadd.f32 %v3821_v13, %v3820_v22 }
 0x6a4   : > { %v3823_v53 = vrot.slane %v3822_v40, 2 }
 0x6a6   : > { %v3824_v2 = vadd.f32 %v3823_v53, %v3822_v40 }
 0x6a8   : > { %v3825_v32 = vrot.slane %v3824_v2, 1 }
 0x6aa   : > { %v3826_v31 = vadd.f32 %v3825_v32, %v3824_v2  ;;  %3832 = sbr.rel (%p4038_p5) target bundleno = 1849 (0x739), region = 83 }
 0x6ac   : > { %v3827_v48 = vadd.f32 %v3826_v31, %v3789_v47 }
 0x6ae   : > { %3829 = vst.msk [vmem:[#allocation3] sm:$0x1] %vm3828_vm11, %v3827_v48 }
 0x6af   : > { %v3838_v42 = vld [vmem:[%s6866_s5 + $0x18] sm:$0xff]  ;;  %v3837_v16 = vld [vmem:[%s6866_s5 + $0x10] sm:$0xff]  ;;  %v3836_v25 = vld [vmem:[%s6866_s5 + $0x8] sm:$0xff]  ;;  %vm3863_vm12 = vcmask 106496  }
 0x6b0   : > { %3855 = vmatpush.msra.mxu0 %v3838_v42  ;;  %v3835_v50 = vld [vmem:[%s6866_s5] sm:$0xff] }
 0x6b1   : > { %v3839_v37 = vld [vmem:[%s6867_s6] sm:$0x1] }
 0x6b2   : > { %3856 = vmatpush.msra.mxu0 %v3837_v16 }
 0x6b4   : > { %3857 = vmatpush.msra.mxu0 %v3836_v25 }
 0x6b5   : > { %v3833_v51 = vld [vmem:[#allocation3] sm:$0x1] }
 0x6b6   : > { %v3834_v4 = vmul.f32 0.00390625, %v3833_v51  ;;  %3858 = vmatpush.msra.mxu0 %v3835_v50 }
 0x6b8   : > { %4101 = vmatmul.msk.f32.vlgmr.msra.gmra.mxu0 %vm1113_vm1, %v3834_v4 }
 0x735   : > { %v3860_v17 = vpop.f32.mrf.mxu0 }
 0x736   : > { %v3861_v27 = vadd.f32 %v3860_v17, %v3839_v37 }
 0x738   : > { %3864 = vst.msk [vmem:[%s4564_s10] sm:$0x1] %vm3863_vm12, %v3861_v27 }
 0x739 PF: > { %s3874_s0 = scalar_lea.hbm %s6868_s7, %s4380_s28  ;;  %s3876_s1 = sshll.u32 %s4564_s10, 4  ;;  %s3877_s1 = int_to_ptr.vmem [resolvable:$true] %s3876_s1 }
 0x73a   : > { %s3878_s17 = sshll.u32 %s3874_s0, 4  ;;  %s6986_s16 = sand.u32 1, %s4368_s25   ;;  %s3879_s17 = int_to_ptr.hbm [resolvable:$true] %s3878_s17 }
 0x73b   : > { %s3866_s9 = scalar_lea.sflag [#allocation5], %s6986_s16  ;;  %s4300_s20 = sshra.s32 %s3879_s17, 4  ;;  %s4301_s20 = int_to_ptr.hbm [resolvable:$true] %s4300_s20 }
 0x73c   : > { %s4302_s12 = scalar_lea.hbm %s4301_s20, 1  ;;  %s4306_s27 = scalar_lea.hbm %s6868_s7, 2 }
 0x73d   : > { %p4303_p6 = scmp.ne.s32.totalorder %s4301_s20, %s4302_s12  ;;  %p4307_p10 = scmp.lt.s32.totalorder %s4301_s20, %s6868_s7 }
 0x73e   : > { %p4308_p11 = scmp.lt.s32.totalorder %s4306_s27, %s4302_s12 }
 0x73f   : > { %p4304_p7 = pnand %p4303_p6, %p4506_p3 }
 0x740   : > { %p4309_p12 = por %p4308_p11, %p4307_p10 }
 0x741   : > { %p4305_p8 = pneg %p4304_p7 }
 0x743   : > { %p4310_p13 = pnand %p4309_p12, %p4305_p8 }
 0x745   : > { %4313 = shalt.err (!%p4310_p13)
}
 0x746   : > { %4132 = dma.vmem_to_hbm [thread:$0]  (%p4506_p3), %s3877_s1, 16, %s3879_s17, %s3866_s9  }
 0x747 PF: > { %p4149_p0 = scmp.ge.s32.totalorder %s4392_s8, 2  ;;  %s3890_s28 = sand.u32 1, %s4364_s24  }
 0x748   : > { %s3891_s10 = scalar_lea.sflag [#allocation5], %s3890_s28 }
 0x749   : > { %p4142_p1 = pnand %p4149_p0, %p4516_p9 }
 0x74b   : > { %p4143_p2 = pneg %p4142_p1 }
 0x74d   : > { %4359 = dma.done.wait (%p4143_p2), %s3891_s10, 16  }
 0x74e   : > { %4361 = vsyncadd (%p4143_p2), %s3891_s10, 4294967280  ;;  %s22_s8 = sadd.s32 1, %s4392_s8   ;;  %s6987_s14 = sld [smem:[#allocation13_spill]] }
 0x74f   : > { %p19_p4 = scmp.ge.s32.totalorder %s22_s8, 6   ;;  %s6988_s24 = smov %s4368_s25 }
 0x750   : > { %s6989_s25 = smov %s4372_s26  ;;  %s6990_s26 = smov %s4536_s22 }
 0x751   : > { %s6991_s27 = smov %s4384_s29  ;;  %s6992_s28 = smov %s4388_s30 }
 0x752   : > { %s6993_s29 = smov %s6996_s11  ;;  %21 = sbr.rel (!%p19_p4) target bundleno = 10 (0xa), region = 140 }
 0x754   : > { %s6994_s30 = smov %s6987_s14 }
 0x757   :  { %3896 = vsyncpa [#allocation5], 1 }
 0x758   :  { %3898 = vsyncpa [#allocation5 + $0x1], 1 }
 0x759   :  { %3899 = vsyncpa [#allocation6], 1 }
 0x75a   :  { %3901 = vsyncpa [#allocation6 + $0x1], 1 }
 0x75b   :  { %3902 = vsyncpa [#allocation8], 1 }

</bundles_post_ra>
